<compile_context>
chip_gen: v7x
topology: tpu7x:2x2x1
jax: 0.10.0
libtpu: 0.0.40
codegen_flags: <defaults>
</compile_context>

<pallas_src>
import functools

import jax
import jax.numpy as jnp
from jax import lax
from jax.experimental import pallas as pl
from jax.experimental.pallas import tpu as pltpu

# ------------------------- tiny ViT config -------------------------
IMG = 32          # image size (H = W)
PATCH = 8         # patch size  -> 16 patches
IN_CH = 3         # channels
EMBED = 32        # embedding dim
HEADS = 4
DH = EMBED // HEADS
DEPTH = 2
MLP = 64
NUM_CLASSES = 10
BATCH = 2
LN_EPS = 1e-6     # timm ViT LayerNorm eps

N_PATCHES = (IMG // PATCH) ** 2            # 16
SEQ = N_PATCHES + 1                        # 17 real rows (CLS at row 0, timm order)
SEQ_PAD = 24                               # per-image rows padded to a sublane multiple
PATCH_DIM = IN_CH * PATCH * PATCH          # 192
LOGIT_PAD = 128                            # lane-dense padded logits width
MAX_CHUNK = 8                              # images folded into one grid step

# ---- matmul-weight slab row offsets (every weight zero-padded to 128 lanes) ----
W_PATCH = 0                                            # (192, 32)
W_LAYER0 = PATCH_DIM                                   # per-layer block start
W_QKV, W_PROJ, W_FC1, W_FC2 = 0, EMBED, 2 * EMBED, 3 * EMBED
W_LAYER_STRIDE = 3 * EMBED + MLP                       # qkv(32)+proj(32)+fc1(32)+fc2(64)
W_HEAD = W_LAYER0 + DEPTH * W_LAYER_STRIDE             # (32, 128)  padded head weight
W_ROWS = W_HEAD + EMBED                                # 544 rows total

# ---- vector slab layout ----
# row 0                     : additive key mask (0 for col<SEQ, -1e9 for pad cols)
# rows [1, 1+chunk*SEQ_PAD) : pos table (CLS+pos0 at row 0, pos+patch_b for patches, 0 pad)
# then per layer (8 rows)   : ln1_g, ln1_b, qkv_b, proj_b, ln2_g, ln2_b, fc1_b, fc2_b
# then                      : norm_g, norm_b, head_b (lane-padded)
V_MASK = 0
V_POS = 1
V_LAYER_STRIDE = 8


# ------------------------- fused whole-model kernel -------------------------

def _layernorm(x, g, b):
    mu = jnp.mean(x, axis=-1, keepdims=True)
    var = jnp.mean(jnp.square(x - mu), axis=-1, keepdims=True)
    return (x - mu) * lax.rsqrt(var + LN_EPS) * g + b


def _gelu(x):
    # exact GELU (matches torch.nn.GELU default used by timm ViT MLP)
    return 0.5 * x * (1.0 + lax.erf(x * 0.7071067811865476))


def _vit_fused_kernel(patches_ref, w_ref, v_ref, out_ref, *, chunk):
    M = chunk * SEQ_PAD
    v_blk = V_POS + M
    v_tail = v_blk + DEPTH * V_LAYER_STRIDE
    scale = 1.0 / (DH ** 0.5)

    def vec(row, n):                                   # (1, n) vector from the vec slab
        return v_ref[row:row + 1, 0:n]

    # ---- patch embedding; CLS token / pos embed / patch bias folded into pos table ----
    x = jnp.dot(patches_ref[0], w_ref[W_PATCH:W_PATCH + PATCH_DIM, 0:EMBED],
                preferred_element_type=jnp.float32)
    x = x + v_ref[V_POS:V_POS + M, 0:EMBED]            # (M, E) token slab, whole chunk

    key_mask = v_ref[V_MASK:V_MASK + 1, 0:SEQ_PAD]     # (1, SEQ_PAD): 0 real / -1e9 pad

    for d in range(DEPTH):
        wb = W_LAYER0 + d * W_LAYER_STRIDE
        vb = v_blk + d * V_LAYER_STRIDE

        # ----- attention: one fused QKV matmul over the whole chunk, per-image scores,
        #       lane-concat of head outputs, one (E,E) projection matmul -----
        h = _layernorm(x, vec(vb + 0, EMBED), vec(vb + 1, EMBED))
        qkv = jnp.dot(h, w_ref[wb + W_QKV:wb + W_QKV + EMBED, 0:3 * EMBED],
                      preferred_element_type=jnp.float32) + vec(vb + 2, 3 * EMBED)
        per_img = []
        for i in range(chunk):
            r0 = i * SEQ_PAD
            qkv_i = qkv[r0:r0 + SEQ_PAD, :]            # (SEQ_PAD, 3E), aligned row block
            heads = []
            for hd in range(HEADS):
                q = qkv_i[:, hd * DH:(hd + 1) * DH]
                k = qkv_i[:, EMBED + hd * DH:EMBED + (hd + 1) * DH]
                v = qkv_i[:, 2 * EMBED + hd * DH:2 * EMBED + (hd + 1) * DH]
                s = lax.dot_general(q, k, (((1,), (1,)), ((), ())),
                                    preferred_element_type=jnp.float32) * scale + key_mask
                s = s - jnp.max(s, axis=-1, keepdims=True)
                p = jnp.exp(s)
                p = p / jnp.sum(p, axis=-1, keepdims=True)          # exact softmax
                heads.append(jnp.dot(p, v, preferred_element_type=jnp.float32))
            per_img.append(jnp.concatenate(heads, axis=1))          # (SEQ_PAD, E)
        attn = jnp.concatenate(per_img, axis=0)                     # (M, E)
        x = x + jnp.dot(attn, w_ref[wb + W_PROJ:wb + W_PROJ + EMBED, 0:EMBED],
                        preferred_element_type=jnp.float32) + vec(vb + 3, EMBED)

        # ----- MLP branch (pre-LN + FC1 + GELU + FC2 fused, whole chunk at once) -----
        h = _layernorm(x, vec(vb + 4, EMBED), vec(vb + 5, EMBED))
        h = jnp.dot(h, w_ref[wb + W_FC1:wb + W_FC1 + EMBED, 0:MLP],
                    preferred_element_type=jnp.float32) + vec(vb + 6, MLP)
        h = _gelu(h)
        x = x + jnp.dot(h, w_ref[wb + W_FC2:wb + W_FC2 + MLP, 0:EMBED],
                        preferred_element_type=jnp.float32) + vec(vb + 7, EMBED)

    # ----- final LN on CLS rows (row 0 of each image block) + replaced Linear head -----
    cls = jnp.concatenate([x[i * SEQ_PAD:i * SEQ_PAD + 1, :] for i in range(chunk)], axis=0)
    cls = _layernorm(cls, vec(v_tail + 0, EMBED), vec(v_tail + 1, EMBED))
    logits = jnp.dot(cls, w_ref[W_HEAD:W_HEAD + EMBED, :],
                     preferred_element_type=jnp.float32) + v_ref[v_tail + 2:v_tail + 3, :]
    out_ref[0] = logits                                # (chunk, 128) lane-dense writeback


# ------------------------- parameter init -------------------------
# TODO(synk): timm `from_pretrained=True` checkpoint weights cannot be loaded here;
# parameters are deterministic random tensors with the same (timm-layout) shapes instead.

def init_params(key):
    def nrm(k, shape, scale=0.02):
        return scale * jax.random.normal(k, shape, dtype=jnp.float32)

    keys = iter(jax.random.split(key, 8 + DEPTH * 12))
    params = {
        "patch_w": nrm(next(keys), (PATCH_DIM, EMBED)),
        "patch_b": jnp.zeros((EMBED,), jnp.float32),
        "cls_token": nrm(next(keys), (1, 1, EMBED)),
        "pos_embed": nrm(next(keys), (1, SEQ, EMBED)),
        "norm_g": jnp.ones((EMBED,), jnp.float32),
        "norm_b": jnp.zeros((EMBED,), jnp.float32),
        "head_w": nrm(next(keys), (EMBED, NUM_CLASSES)),   # the replaced nn.Linear head
        "head_b": jnp.zeros((NUM_CLASSES,), jnp.float32),
        "blocks": [],
    }
    for _ in range(DEPTH):
        params["blocks"].append({
            "ln1_g": jnp.ones((EMBED,), jnp.float32),
            "ln1_b": jnp.zeros((EMBED,), jnp.float32),
            "qkv_w": nrm(next(keys), (EMBED, 3 * EMBED)),   # feature axis = (3, head, dh)
            "qkv_b": jnp.zeros((3 * EMBED,), jnp.float32),
            "proj_w": nrm(next(keys), (EMBED, EMBED)),
            "proj_b": jnp.zeros((EMBED,), jnp.float32),
            "ln2_g": jnp.ones((EMBED,), jnp.float32),
            "ln2_b": jnp.zeros((EMBED,), jnp.float32),
            "fc1_w": nrm(next(keys), (EMBED, MLP)),
            "fc1_b": jnp.zeros((MLP,), jnp.float32),
            "fc2_w": nrm(next(keys), (MLP, EMBED)),
            "fc2_b": jnp.zeros((EMBED,), jnp.float32),
        })
    return params


# ------------------------- weight packing + forward -------------------------

def _pack_params(params, chunk):
    """Pack all weights/biases into two lane-dense (R, 128) f32 slabs (wrapper-side,
    weight-only reshapes/pads). Layout must match the row-offset constants above."""
    def pad128(a):
        return jnp.pad(a, ((0, 0), (0, LOGIT_PAD - a.shape[1])))

    blocks = params["blocks"]

    # matmul-weight slab
    w_rows = [pad128(params["patch_w"])]
    for blk in blocks:
        w_rows += [pad128(blk["qkv_w"]), pad128(blk["proj_w"]),
                   pad128(blk["fc1_w"]), pad128(blk["fc2_w"])]
    w_rows.append(pad128(params["head_w"]))
    w_slab = jnp.concatenate(w_rows, axis=0)                           # (W_ROWS, 128)

    # vector slab: key mask, pos table (CLS/pos/patch-bias folded), per-layer vectors
    key_mask = jnp.where(jnp.arange(LOGIT_PAD) < SEQ, 0.0, -1e9).astype(jnp.float32)[None, :]
    pos = params["pos_embed"][0]                                       # (SEQ, E)
    cls_row = (params["cls_token"][0, 0] + pos[0])[None, :]            # CLS + pos[0]
    patch_rows = pos[1:] + params["patch_b"][None, :]                  # pos[i] + patch bias
    pos_img = jnp.concatenate(
        [cls_row, patch_rows, jnp.zeros((SEQ_PAD - SEQ, EMBED), jnp.float32)], axis=0)
    pos_all = jnp.tile(pos_img, (chunk, 1))                            # (chunk*SEQ_PAD, E)

    v_rows = [key_mask, pad128(pos_all)]
    for blk in blocks:
        v_rows += [pad128(blk[k][None, :]) for k in
                   ("ln1_g", "ln1_b", "qkv_b", "proj_b",
                    "ln2_g", "ln2_b", "fc1_b", "fc2_b")]
    v_rows += [pad128(params["norm_g"][None, :]),
               pad128(params["norm_b"][None, :]),
               pad128(params["head_b"][None, :])]
    v_slab = jnp.concatenate(v_rows, axis=0)
    pad_rows = (-v_slab.shape[0]) % 8                                  # sublane-align rows
    if pad_rows:
        v_slab = jnp.pad(v_slab, ((0, pad_rows), (0, 0)))
    return w_slab, v_slab


def base_timm_model_forward(params, x_nchw):
    """Equivalent of BaseTimmModel.forward: x -> ViT backbone -> Linear(num_classes)."""
    x = x_nchw.astype(jnp.float32)
    N, C, H, W = x.shape
    hp, wp = H // PATCH, W // PATCH

    # unfold NCHW -> per-patch vectors in timm's (C, Ph, Pw) flatten order.
    patches = (x.reshape(N, C, hp, PATCH, wp, PATCH)
               .transpose(0, 2, 4, 1, 3, 5)
               .reshape(N, hp * wp, C * PATCH * PATCH))
    # row 0 per image = zero CLS slot (masked-in via pos table), rows SEQ..SEQ_PAD-1 = pad.
    patches = jnp.pad(patches, ((0, 0), (1, SEQ_PAD - SEQ), (0, 0)))   # (N, SEQ_PAD, PD)

    chunk = min(N, MAX_CHUNK)                 # images folded into one grid step
    nchunks = -(-N // chunk)
    n_pad = nchunks * chunk
    if n_pad != N:
        patches = jnp.pad(patches, ((0, n_pad - N), (0, 0), (0, 0)))
    patches = patches.reshape(nchunks, chunk * SEQ_PAD, PATCH_DIM)

    w_slab, v_slab = _pack_params(params, chunk)

    out = pl.pallas_call(
        functools.partial(_vit_fused_kernel, chunk=chunk),
        out_shape=jax.ShapeDtypeStruct((nchunks, chunk, LOGIT_PAD), jnp.float32),
        grid=(nchunks,),
        in_specs=[
            pl.BlockSpec((1, chunk * SEQ_PAD, PATCH_DIM), lambda b: (b, 0, 0)),  # tokens
            pl.BlockSpec((W_ROWS, 128), lambda b: (0, 0)),                       # weights
            pl.BlockSpec(v_slab.shape, lambda b: (0, 0)),                        # vectors
        ],
        out_specs=pl.BlockSpec((1, chunk, LOGIT_PAD), lambda b: (b, 0, 0)),
        compiler_params=pltpu.CompilerParams(dimension_semantics=("parallel",)),
    )(patches, w_slab, v_slab)

    return out.reshape(n_pad, LOGIT_PAD)[:N, :NUM_CLASSES]


if __name__ == "__main__":
    key = jax.random.PRNGKey(0)
    k_in, k_par = jax.random.split(key)
    x = jax.random.normal(k_in, (BATCH, IN_CH, IMG, IMG), dtype=jnp.float32)
    params = init_params(k_par)

    logits = jax.jit(base_timm_model_forward)(params, x)
    jax.block_until_ready(logits)
    assert logits.shape == (BATCH, NUM_CLASSES)
    assert bool(jnp.all(jnp.isfinite(logits)))
    print("KERNEL_OK")
</pallas_src>

<mosaic_0001>
module attributes {stable_mosaic.version = 11 : i64} {
  func.func @_vit_fused_kernel(%arg0: i32, %arg1: memref<1x48x192xf32, #tpu.memory_space<vmem>>, %arg2: memref<544x128xf32, #tpu.memory_space<vmem>>, %arg3: memref<72x128xf32, #tpu.memory_space<vmem>>, %arg4: memref<1x2x128xf32, #tpu.memory_space<vmem>>) attributes {dimension_semantics = [#tpu.dimension_semantics<parallel>], iteration_bounds = array<i64: 1>, scalar_prefetch = 0 : i64, scratch_operands = 0 : i64, tpu.core_type = #tpu.core_type<tc>, window_params = [{transform_indices = @transform_0, window_bounds = array<i64: 1, 48, 192>}, {pipeline_mode = #tpu.pipeline_mode<synchronous>, transform_indices = @transform_1, window_bounds = array<i64: 544, 128>}, {pipeline_mode = #tpu.pipeline_mode<synchronous>, transform_indices = @transform_2, window_bounds = array<i64: 72, 128>}, {transform_indices = @transform_3, window_bounds = array<i64: 1, 2, 128>}]} {
    %c0 = arith.constant 0 : index
    %c0_0 = arith.constant 0 : index
    %c0_1 = arith.constant 0 : index
    %0 = vector.load %arg1[%c0, %c0_0, %c0_1] : memref<1x48x192xf32, #tpu.memory_space<vmem>>, vector<1x48x192xf32>
    %1 = vector.shape_cast %0 : vector<1x48x192xf32> to vector<48x192xf32>
    %c0_2 = arith.constant 0 : index
    %c0_3 = arith.constant 0 : index
    %2 = vector.load %arg2[%c0_2, %c0_3] : memref<544x128xf32, #tpu.memory_space<vmem>>, vector<192x32xf32>
    %cst = arith.constant dense<0.000000e+00> : vector<48x32xf32>
    %3 = tpu.matmul %1, %2, %cst {dimension_numbers = #tpu.dot_dimension_numbers<[1], [0], [0], [1], [0, 0, 1, 1], [], []>} : vector<48x192xf32>, vector<192x32xf32>, vector<48x32xf32> -> vector<48x32xf32>
    %c1 = arith.constant 1 : index
    %c0_4 = arith.constant 0 : index
    %4 = vector.load %arg3[%c1, %c0_4] : memref<72x128xf32, #tpu.memory_space<vmem>>, vector<48x32xf32>
    %5 = arith.addf %3, %4 : vector<48x32xf32>
    %c0_5 = arith.constant 0 : index
    %c0_6 = arith.constant 0 : index
    %6 = vector.load %arg3[%c0_5, %c0_6] : memref<72x128xf32, #tpu.memory_space<vmem>>, vector<1x24xf32>
    %c49 = arith.constant 49 : index
    %c0_7 = arith.constant 0 : index
    %7 = vector.load %arg3[%c49, %c0_7] : memref<72x128xf32, #tpu.memory_space<vmem>>, vector<1x32xf32>
    %c50 = arith.constant 50 : index
    %c0_8 = arith.constant 0 : index
    %8 = vector.load %arg3[%c50, %c0_8] : memref<72x128xf32, #tpu.memory_space<vmem>>, vector<1x32xf32>
    %cst_9 = arith.constant dense<0.000000e+00> : vector<48xf32>
    %9 = vector.multi_reduction <add>, %5, %cst_9 [1] : vector<48x32xf32> to vector<48xf32>
    %10 = vector.shape_cast %9 : vector<48xf32> to vector<48x1xf32>
    %cst_10 = arith.constant 3.200000e+01 : f32
    %11 = vector.broadcast %cst_10 : f32 to vector<48x1xf32>
    %12 = arith.divf %10, %11 : vector<48x1xf32>
    %13 = vector.broadcast %12 : vector<48x1xf32> to vector<48x32xf32>
    %14 = arith.subf %5, %13 : vector<48x32xf32>
    %15 = arith.mulf %14, %14 : vector<48x32xf32>
    %cst_11 = arith.constant dense<0.000000e+00> : vector<48xf32>
    %16 = vector.multi_reduction <add>, %15, %cst_11 [1] : vector<48x32xf32> to vector<48xf32>
    %17 = vector.shape_cast %16 : vector<48xf32> to vector<48x1xf32>
    %cst_12 = arith.constant 3.200000e+01 : f32
    %18 = vector.broadcast %cst_12 : f32 to vector<48x1xf32>
    %19 = arith.divf %17, %18 : vector<48x1xf32>
    %20 = vector.broadcast %12 : vector<48x1xf32> to vector<48x32xf32>
    %21 = arith.subf %5, %20 : vector<48x32xf32>
    %cst_13 = arith.constant 9.99999997E-7 : f32
    %22 = vector.broadcast %cst_13 : f32 to vector<48x1xf32>
    %23 = arith.addf %19, %22 : vector<48x1xf32>
    %24 = math.rsqrt %23 : vector<48x1xf32>
    %25 = vector.broadcast %24 : vector<48x1xf32> to vector<48x32xf32>
    %26 = arith.mulf %21, %25 : vector<48x32xf32>
    %27 = vector.broadcast %7 : vector<1x32xf32> to vector<48x32xf32>
    %28 = arith.mulf %26, %27 : vector<48x32xf32>
    %29 = vector.broadcast %8 : vector<1x32xf32> to vector<48x32xf32>
    %30 = arith.addf %28, %29 : vector<48x32xf32>
    %c192 = arith.constant 192 : index
    %c0_14 = arith.constant 0 : index
    %31 = vector.load %arg2[%c192, %c0_14] : memref<544x128xf32, #tpu.memory_space<vmem>>, vector<32x96xf32>
    %cst_15 = arith.constant dense<0.000000e+00> : vector<48x96xf32>
    %32 = tpu.matmul %30, %31, %cst_15 {dimension_numbers = #tpu.dot_dimension_numbers<[1], [0], [0], [1], [0, 0, 1, 1], [], []>} : vector<48x32xf32>, vector<32x96xf32>, vector<48x96xf32> -> vector<48x96xf32>
    %c51 = arith.constant 51 : index
    %c0_16 = arith.constant 0 : index
    %33 = vector.load %arg3[%c51, %c0_16] : memref<72x128xf32, #tpu.memory_space<vmem>>, vector<1x96xf32>
    %34 = vector.broadcast %33 : vector<1x96xf32> to vector<48x96xf32>
    %35 = arith.addf %32, %34 : vector<48x96xf32>
    %36 = vector.extract_strided_slice %35 {offsets = [0, 0], sizes = [24, 96], strides = [1, 1]} : vector<48x96xf32> to vector<24x96xf32>
    %37 = vector.extract_strided_slice %36 {offsets = [0, 0], sizes = [24, 8], strides = [1, 1]} : vector<24x96xf32> to vector<24x8xf32>
    %38 = vector.extract_strided_slice %36 {offsets = [0, 32], sizes = [24, 8], strides = [1, 1]} : vector<24x96xf32> to vector<24x8xf32>
    %39 = vector.extract_strided_slice %36 {offsets = [0, 64], sizes = [24, 8], strides = [1, 1]} : vector<24x96xf32> to vector<24x8xf32>
    %cst_17 = arith.constant dense<0.000000e+00> : vector<24x24xf32>
    %40 = tpu.matmul %37, %38, %cst_17 {dimension_numbers = #tpu.dot_dimension_numbers<[1], [1], [0], [0], [0, 0, 1, 0], [], []>} : vector<24x8xf32>, vector<24x8xf32>, vector<24x24xf32> -> vector<24x24xf32>
    %cst_18 = arith.constant 0.353553385 : f32
    %41 = vector.broadcast %cst_18 : f32 to vector<24x24xf32>
    %42 = arith.mulf %40, %41 : vector<24x24xf32>
    %43 = vector.broadcast %6 : vector<1x24xf32> to vector<24x24xf32>
    %44 = arith.addf %42, %43 : vector<24x24xf32>
    %cst_19 = arith.constant dense<0xFF800000> : vector<24xf32>
    %45 = vector.multi_reduction <maximumf>, %44, %cst_19 [1] : vector<24x24xf32> to vector<24xf32>
    %46 = vector.shape_cast %45 : vector<24xf32> to vector<24x1xf32>
    %47 = vector.broadcast %46 : vector<24x1xf32> to vector<24x24xf32>
    %48 = arith.subf %44, %47 : vector<24x24xf32>
    %49 = math.exp %48 : vector<24x24xf32>
    %cst_20 = arith.constant dense<0.000000e+00> : vector<24xf32>
    %50 = vector.multi_reduction <add>, %49, %cst_20 [1] : vector<24x24xf32> to vector<24xf32>
    %51 = vector.shape_cast %50 : vector<24xf32> to vector<24x1xf32>
    %52 = vector.broadcast %51 : vector<24x1xf32> to vector<24x24xf32>
    %53 = arith.divf %49, %52 : vector<24x24xf32>
    %cst_21 = arith.constant dense<0.000000e+00> : vector<24x8xf32>
    %54 = tpu.matmul %53, %39, %cst_21 {dimension_numbers = #tpu.dot_dimension_numbers<[1], [0], [0], [1], [0, 0, 1, 1], [], []>} : vector<24x24xf32>, vector<24x8xf32>, vector<24x8xf32> -> vector<24x8xf32>
    %55 = vector.extract_strided_slice %36 {offsets = [0, 8], sizes = [24, 8], strides = [1, 1]} : vector<24x96xf32> to vector<24x8xf32>
    %56 = vector.extract_strided_slice %36 {offsets = [0, 40], sizes = [24, 8], strides = [1, 1]} : vector<24x96xf32> to vector<24x8xf32>
    %57 = vector.extract_strided_slice %36 {offsets = [0, 72], sizes = [24, 8], strides = [1, 1]} : vector<24x96xf32> to vector<24x8xf32>
    %cst_22 = arith.constant dense<0.000000e+00> : vector<24x24xf32>
    %58 = tpu.matmul %55, %56, %cst_22 {dimension_numbers = #tpu.dot_dimension_numbers<[1], [1], [0], [0], [0, 0, 1, 0], [], []>} : vector<24x8xf32>, vector<24x8xf32>, vector<24x24xf32> -> vector<24x24xf32>
    %cst_23 = arith.constant 0.353553385 : f32
    %59 = vector.broadcast %cst_23 : f32 to vector<24x24xf32>
    %60 = arith.mulf %58, %59 : vector<24x24xf32>
    %61 = vector.broadcast %6 : vector<1x24xf32> to vector<24x24xf32>
    %62 = arith.addf %60, %61 : vector<24x24xf32>
    %cst_24 = arith.constant dense<0xFF800000> : vector<24xf32>
    %63 = vector.multi_reduction <maximumf>, %62, %cst_24 [1] : vector<24x24xf32> to vector<24xf32>
    %64 = vector.shape_cast %63 : vector<24xf32> to vector<24x1xf32>
    %65 = vector.broadcast %64 : vector<24x1xf32> to vector<24x24xf32>
    %66 = arith.subf %62, %65 : vector<24x24xf32>
    %67 = math.exp %66 : vector<24x24xf32>
    %cst_25 = arith.constant dense<0.000000e+00> : vector<24xf32>
    %68 = vector.multi_reduction <add>, %67, %cst_25 [1] : vector<24x24xf32> to vector<24xf32>
    %69 = vector.shape_cast %68 : vector<24xf32> to vector<24x1xf32>
    %70 = vector.broadcast %69 : vector<24x1xf32> to vector<24x24xf32>
    %71 = arith.divf %67, %70 : vector<24x24xf32>
    %cst_26 = arith.constant dense<0.000000e+00> : vector<24x8xf32>
    %72 = tpu.matmul %71, %57, %cst_26 {dimension_numbers = #tpu.dot_dimension_numbers<[1], [0], [0], [1], [0, 0, 1, 1], [], []>} : vector<24x24xf32>, vector<24x8xf32>, vector<24x8xf32> -> vector<24x8xf32>
    %73 = vector.extract_strided_slice %36 {offsets = [0, 16], sizes = [24, 8], strides = [1, 1]} : vector<24x96xf32> to vector<24x8xf32>
    %74 = vector.extract_strided_slice %36 {offsets = [0, 48], sizes = [24, 8], strides = [1, 1]} : vector<24x96xf32> to vector<24x8xf32>
    %75 = vector.extract_strided_slice %36 {offsets = [0, 80], sizes = [24, 8], strides = [1, 1]} : vector<24x96xf32> to vector<24x8xf32>
    %cst_27 = arith.constant dense<0.000000e+00> : vector<24x24xf32>
    %76 = tpu.matmul %73, %74, %cst_27 {dimension_numbers = #tpu.dot_dimension_numbers<[1], [1], [0], [0], [0, 0, 1, 0], [], []>} : vector<24x8xf32>, vector<24x8xf32>, vector<24x24xf32> -> vector<24x24xf32>
    %cst_28 = arith.constant 0.353553385 : f32
    %77 = vector.broadcast %cst_28 : f32 to vector<24x24xf32>
    %78 = arith.mulf %76, %77 : vector<24x24xf32>
    %79 = vector.broadcast %6 : vector<1x24xf32> to vector<24x24xf32>
    %80 = arith.addf %78, %79 : vector<24x24xf32>
    %cst_29 = arith.constant dense<0xFF800000> : vector<24xf32>
    %81 = vector.multi_reduction <maximumf>, %80, %cst_29 [1] : vector<24x24xf32> to vector<24xf32>
    %82 = vector.shape_cast %81 : vector<24xf32> to vector<24x1xf32>
    %83 = vector.broadcast %82 : vector<24x1xf32> to vector<24x24xf32>
    %84 = arith.subf %80, %83 : vector<24x24xf32>
    %85 = math.exp %84 : vector<24x24xf32>
    %cst_30 = arith.constant dense<0.000000e+00> : vector<24xf32>
    %86 = vector.multi_reduction <add>, %85, %cst_30 [1] : vector<24x24xf32> to vector<24xf32>
    %87 = vector.shape_cast %86 : vector<24xf32> to vector<24x1xf32>
    %88 = vector.broadcast %87 : vector<24x1xf32> to vector<24x24xf32>
    %89 = arith.divf %85, %88 : vector<24x24xf32>
    %cst_31 = arith.constant dense<0.000000e+00> : vector<24x8xf32>
    %90 = tpu.matmul %89, %75, %cst_31 {dimension_numbers = #tpu.dot_dimension_numbers<[1], [0], [0], [1], [0, 0, 1, 1], [], []>} : vector<24x24xf32>, vector<24x8xf32>, vector<24x8xf32> -> vector<24x8xf32>
    %91 = vector.extract_strided_slice %36 {offsets = [0, 24], sizes = [24, 8], strides = [1, 1]} : vector<24x96xf32> to vector<24x8xf32>
    %92 = vector.extract_strided_slice %36 {offsets = [0, 56], sizes = [24, 8], strides = [1, 1]} : vector<24x96xf32> to vector<24x8xf32>
    %93 = vector.extract_strided_slice %36 {offsets = [0, 88], sizes = [24, 8], strides = [1, 1]} : vector<24x96xf32> to vector<24x8xf32>
    %cst_32 = arith.constant dense<0.000000e+00> : vector<24x24xf32>
    %94 = tpu.matmul %91, %92, %cst_32 {dimension_numbers = #tpu.dot_dimension_numbers<[1], [1], [0], [0], [0, 0, 1, 0], [], []>} : vector<24x8xf32>, vector<24x8xf32>, vector<24x24xf32> -> vector<24x24xf32>
    %cst_33 = arith.constant 0.353553385 : f32
    %95 = vector.broadcast %cst_33 : f32 to vector<24x24xf32>
    %96 = arith.mulf %94, %95 : vector<24x24xf32>
    %97 = vector.broadcast %6 : vector<1x24xf32> to vector<24x24xf32>
    %98 = arith.addf %96, %97 : vector<24x24xf32>
    %cst_34 = arith.constant dense<0xFF800000> : vector<24xf32>
    %99 = vector.multi_reduction <maximumf>, %98, %cst_34 [1] : vector<24x24xf32> to vector<24xf32>
    %100 = vector.shape_cast %99 : vector<24xf32> to vector<24x1xf32>
    %101 = vector.broadcast %100 : vector<24x1xf32> to vector<24x24xf32>
    %102 = arith.subf %98, %101 : vector<24x24xf32>
    %103 = math.exp %102 : vector<24x24xf32>
    %cst_35 = arith.constant dense<0.000000e+00> : vector<24xf32>
    %104 = vector.multi_reduction <add>, %103, %cst_35 [1] : vector<24x24xf32> to vector<24xf32>
    %105 = vector.shape_cast %104 : vector<24xf32> to vector<24x1xf32>
    %106 = vector.broadcast %105 : vector<24x1xf32> to vector<24x24xf32>
    %107 = arith.divf %103, %106 : vector<24x24xf32>
    %cst_36 = arith.constant dense<0.000000e+00> : vector<24x8xf32>
    %108 = tpu.matmul %107, %93, %cst_36 {dimension_numbers = #tpu.dot_dimension_numbers<[1], [0], [0], [1], [0, 0, 1, 1], [], []>} : vector<24x24xf32>, vector<24x8xf32>, vector<24x8xf32> -> vector<24x8xf32>
    %109 = tpu.concatenate %54, %72, %90, %108 in 1 : vector<24x8xf32>, vector<24x8xf32>, vector<24x8xf32>, vector<24x8xf32> -> vector<24x32xf32>
    %110 = vector.extract_strided_slice %35 {offsets = [24, 0], sizes = [24, 96], strides = [1, 1]} : vector<48x96xf32> to vector<24x96xf32>
    %111 = vector.extract_strided_slice %110 {offsets = [0, 0], sizes = [24, 8], strides = [1, 1]} : vector<24x96xf32> to vector<24x8xf32>
    %112 = vector.extract_strided_slice %110 {offsets = [0, 32], sizes = [24, 8], strides = [1, 1]} : vector<24x96xf32> to vector<24x8xf32>
    %113 = vector.extract_strided_slice %110 {offsets = [0, 64], sizes = [24, 8], strides = [1, 1]} : vector<24x96xf32> to vector<24x8xf32>
    %cst_37 = arith.constant dense<0.000000e+00> : vector<24x24xf32>
    %114 = tpu.matmul %111, %112, %cst_37 {dimension_numbers = #tpu.dot_dimension_numbers<[1], [1], [0], [0], [0, 0, 1, 0], [], []>} : vector<24x8xf32>, vector<24x8xf32>, vector<24x24xf32> -> vector<24x24xf32>
    %cst_38 = arith.constant 0.353553385 : f32
    %115 = vector.broadcast %cst_38 : f32 to vector<24x24xf32>
    %116 = arith.mulf %114, %115 : vector<24x24xf32>
    %117 = vector.broadcast %6 : vector<1x24xf32> to vector<24x24xf32>
    %118 = arith.addf %116, %117 : vector<24x24xf32>
    %cst_39 = arith.constant dense<0xFF800000> : vector<24xf32>
    %119 = vector.multi_reduction <maximumf>, %118, %cst_39 [1] : vector<24x24xf32> to vector<24xf32>
    %120 = vector.shape_cast %119 : vector<24xf32> to vector<24x1xf32>
    %121 = vector.broadcast %120 : vector<24x1xf32> to vector<24x24xf32>
    %122 = arith.subf %118, %121 : vector<24x24xf32>
    %123 = math.exp %122 : vector<24x24xf32>
    %cst_40 = arith.constant dense<0.000000e+00> : vector<24xf32>
    %124 = vector.multi_reduction <add>, %123, %cst_40 [1] : vector<24x24xf32> to vector<24xf32>
    %125 = vector.shape_cast %124 : vector<24xf32> to vector<24x1xf32>
    %126 = vector.broadcast %125 : vector<24x1xf32> to vector<24x24xf32>
    %127 = arith.divf %123, %126 : vector<24x24xf32>
    %cst_41 = arith.constant dense<0.000000e+00> : vector<24x8xf32>
    %128 = tpu.matmul %127, %113, %cst_41 {dimension_numbers = #tpu.dot_dimension_numbers<[1], [0], [0], [1], [0, 0, 1, 1], [], []>} : vector<24x24xf32>, vector<24x8xf32>, vector<24x8xf32> -> vector<24x8xf32>
    %129 = vector.extract_strided_slice %110 {offsets = [0, 8], sizes = [24, 8], strides = [1, 1]} : vector<24x96xf32> to vector<24x8xf32>
    %130 = vector.extract_strided_slice %110 {offsets = [0, 40], sizes = [24, 8], strides = [1, 1]} : vector<24x96xf32> to vector<24x8xf32>
    %131 = vector.extract_strided_slice %110 {offsets = [0, 72], sizes = [24, 8], strides = [1, 1]} : vector<24x96xf32> to vector<24x8xf32>
    %cst_42 = arith.constant dense<0.000000e+00> : vector<24x24xf32>
    %132 = tpu.matmul %129, %130, %cst_42 {dimension_numbers = #tpu.dot_dimension_numbers<[1], [1], [0], [0], [0, 0, 1, 0], [], []>} : vector<24x8xf32>, vector<24x8xf32>, vector<24x24xf32> -> vector<24x24xf32>
    %cst_43 = arith.constant 0.353553385 : f32
    %133 = vector.broadcast %cst_43 : f32 to vector<24x24xf32>
    %134 = arith.mulf %132, %133 : vector<24x24xf32>
    %135 = vector.broadcast %6 : vector<1x24xf32> to vector<24x24xf32>
    %136 = arith.addf %134, %135 : vector<24x24xf32>
    %cst_44 = arith.constant dense<0xFF800000> : vector<24xf32>
    %137 = vector.multi_reduction <maximumf>, %136, %cst_44 [1] : vector<24x24xf32> to vector<24xf32>
    %138 = vector.shape_cast %137 : vector<24xf32> to vector<24x1xf32>
    %139 = vector.broadcast %138 : vector<24x1xf32> to vector<24x24xf32>
    %140 = arith.subf %136, %139 : vector<24x24xf32>
    %141 = math.exp %140 : vector<24x24xf32>
    %cst_45 = arith.constant dense<0.000000e+00> : vector<24xf32>
    %142 = vector.multi_reduction <add>, %141, %cst_45 [1] : vector<24x24xf32> to vector<24xf32>
    %143 = vector.shape_cast %142 : vector<24xf32> to vector<24x1xf32>
    %144 = vector.broadcast %143 : vector<24x1xf32> to vector<24x24xf32>
    %145 = arith.divf %141, %144 : vector<24x24xf32>
    %cst_46 = arith.constant dense<0.000000e+00> : vector<24x8xf32>
    %146 = tpu.matmul %145, %131, %cst_46 {dimension_numbers = #tpu.dot_dimension_numbers<[1], [0], [0], [1], [0, 0, 1, 1], [], []>} : vector<24x24xf32>, vector<24x8xf32>, vector<24x8xf32> -> vector<24x8xf32>
    %147 = vector.extract_strided_slice %110 {offsets = [0, 16], sizes = [24, 8], strides = [1, 1]} : vector<24x96xf32> to vector<24x8xf32>
    %148 = vector.extract_strided_slice %110 {offsets = [0, 48], sizes = [24, 8], strides = [1, 1]} : vector<24x96xf32> to vector<24x8xf32>
    %149 = vector.extract_strided_slice %110 {offsets = [0, 80], sizes = [24, 8], strides = [1, 1]} : vector<24x96xf32> to vector<24x8xf32>
    %cst_47 = arith.constant dense<0.000000e+00> : vector<24x24xf32>
    %150 = tpu.matmul %147, %148, %cst_47 {dimension_numbers = #tpu.dot_dimension_numbers<[1], [1], [0], [0], [0, 0, 1, 0], [], []>} : vector<24x8xf32>, vector<24x8xf32>, vector<24x24xf32> -> vector<24x24xf32>
    %cst_48 = arith.constant 0.353553385 : f32
    %151 = vector.broadcast %cst_48 : f32 to vector<24x24xf32>
    %152 = arith.mulf %150, %151 : vector<24x24xf32>
    %153 = vector.broadcast %6 : vector<1x24xf32> to vector<24x24xf32>
    %154 = arith.addf %152, %153 : vector<24x24xf32>
    %cst_49 = arith.constant dense<0xFF800000> : vector<24xf32>
    %155 = vector.multi_reduction <maximumf>, %154, %cst_49 [1] : vector<24x24xf32> to vector<24xf32>
    %156 = vector.shape_cast %155 : vector<24xf32> to vector<24x1xf32>
    %157 = vector.broadcast %156 : vector<24x1xf32> to vector<24x24xf32>
    %158 = arith.subf %154, %157 : vector<24x24xf32>
    %159 = math.exp %158 : vector<24x24xf32>
    %cst_50 = arith.constant dense<0.000000e+00> : vector<24xf32>
    %160 = vector.multi_reduction <add>, %159, %cst_50 [1] : vector<24x24xf32> to vector<24xf32>
    %161 = vector.shape_cast %160 : vector<24xf32> to vector<24x1xf32>
    %162 = vector.broadcast %161 : vector<24x1xf32> to vector<24x24xf32>
    %163 = arith.divf %159, %162 : vector<24x24xf32>
    %cst_51 = arith.constant dense<0.000000e+00> : vector<24x8xf32>
    %164 = tpu.matmul %163, %149, %cst_51 {dimension_numbers = #tpu.dot_dimension_numbers<[1], [0], [0], [1], [0, 0, 1, 1], [], []>} : vector<24x24xf32>, vector<24x8xf32>, vector<24x8xf32> -> vector<24x8xf32>
    %165 = vector.extract_strided_slice %110 {offsets = [0, 24], sizes = [24, 8], strides = [1, 1]} : vector<24x96xf32> to vector<24x8xf32>
    %166 = vector.extract_strided_slice %110 {offsets = [0, 56], sizes = [24, 8], strides = [1, 1]} : vector<24x96xf32> to vector<24x8xf32>
    %167 = vector.extract_strided_slice %110 {offsets = [0, 88], sizes = [24, 8], strides = [1, 1]} : vector<24x96xf32> to vector<24x8xf32>
    %cst_52 = arith.constant dense<0.000000e+00> : vector<24x24xf32>
    %168 = tpu.matmul %165, %166, %cst_52 {dimension_numbers = #tpu.dot_dimension_numbers<[1], [1], [0], [0], [0, 0, 1, 0], [], []>} : vector<24x8xf32>, vector<24x8xf32>, vector<24x24xf32> -> vector<24x24xf32>
    %cst_53 = arith.constant 0.353553385 : f32
    %169 = vector.broadcast %cst_53 : f32 to vector<24x24xf32>
    %170 = arith.mulf %168, %169 : vector<24x24xf32>
    %171 = vector.broadcast %6 : vector<1x24xf32> to vector<24x24xf32>
    %172 = arith.addf %170, %171 : vector<24x24xf32>
    %cst_54 = arith.constant dense<0xFF800000> : vector<24xf32>
    %173 = vector.multi_reduction <maximumf>, %172, %cst_54 [1] : vector<24x24xf32> to vector<24xf32>
    %174 = vector.shape_cast %173 : vector<24xf32> to vector<24x1xf32>
    %175 = vector.broadcast %174 : vector<24x1xf32> to vector<24x24xf32>
    %176 = arith.subf %172, %175 : vector<24x24xf32>
    %177 = math.exp %176 : vector<24x24xf32>
    %cst_55 = arith.constant dense<0.000000e+00> : vector<24xf32>
    %178 = vector.multi_reduction <add>, %177, %cst_55 [1] : vector<24x24xf32> to vector<24xf32>
    %179 = vector.shape_cast %178 : vector<24xf32> to vector<24x1xf32>
    %180 = vector.broadcast %179 : vector<24x1xf32> to vector<24x24xf32>
    %181 = arith.divf %177, %180 : vector<24x24xf32>
    %cst_56 = arith.constant dense<0.000000e+00> : vector<24x8xf32>
    %182 = tpu.matmul %181, %167, %cst_56 {dimension_numbers = #tpu.dot_dimension_numbers<[1], [0], [0], [1], [0, 0, 1, 1], [], []>} : vector<24x24xf32>, vector<24x8xf32>, vector<24x8xf32> -> vector<24x8xf32>
    %183 = tpu.concatenate %128, %146, %164, %182 in 1 : vector<24x8xf32>, vector<24x8xf32>, vector<24x8xf32>, vector<24x8xf32> -> vector<24x32xf32>
    %184 = tpu.concatenate %109, %183 in 0 : vector<24x32xf32>, vector<24x32xf32> -> vector<48x32xf32>
    %c224 = arith.constant 224 : index
    %c0_57 = arith.constant 0 : index
    %185 = vector.load %arg2[%c224, %c0_57] : memref<544x128xf32, #tpu.memory_space<vmem>>, vector<32x32xf32>
    %cst_58 = arith.constant dense<0.000000e+00> : vector<48x32xf32>
    %186 = tpu.matmul %184, %185, %cst_58 {dimension_numbers = #tpu.dot_dimension_numbers<[1], [0], [0], [1], [0, 0, 1, 1], [], []>} : vector<48x32xf32>, vector<32x32xf32>, vector<48x32xf32> -> vector<48x32xf32>
    %187 = arith.addf %5, %186 : vector<48x32xf32>
    %c52 = arith.constant 52 : index
    %c0_59 = arith.constant 0 : index
    %188 = vector.load %arg3[%c52, %c0_59] : memref<72x128xf32, #tpu.memory_space<vmem>>, vector<1x32xf32>
    %189 = vector.broadcast %188 : vector<1x32xf32> to vector<48x32xf32>
    %190 = arith.addf %187, %189 : vector<48x32xf32>
    %c53 = arith.constant 53 : index
    %c0_60 = arith.constant 0 : index
    %191 = vector.load %arg3[%c53, %c0_60] : memref<72x128xf32, #tpu.memory_space<vmem>>, vector<1x32xf32>
    %c54 = arith.constant 54 : index
    %c0_61 = arith.constant 0 : index
    %192 = vector.load %arg3[%c54, %c0_61] : memref<72x128xf32, #tpu.memory_space<vmem>>, vector<1x32xf32>
    %cst_62 = arith.constant dense<0.000000e+00> : vector<48xf32>
    %193 = vector.multi_reduction <add>, %190, %cst_62 [1] : vector<48x32xf32> to vector<48xf32>
    %194 = vector.shape_cast %193 : vector<48xf32> to vector<48x1xf32>
    %cst_63 = arith.constant 3.200000e+01 : f32
    %195 = vector.broadcast %cst_63 : f32 to vector<48x1xf32>
    %196 = arith.divf %194, %195 : vector<48x1xf32>
    %197 = vector.broadcast %196 : vector<48x1xf32> to vector<48x32xf32>
    %198 = arith.subf %190, %197 : vector<48x32xf32>
    %199 = arith.mulf %198, %198 : vector<48x32xf32>
    %cst_64 = arith.constant dense<0.000000e+00> : vector<48xf32>
    %200 = vector.multi_reduction <add>, %199, %cst_64 [1] : vector<48x32xf32> to vector<48xf32>
    %201 = vector.shape_cast %200 : vector<48xf32> to vector<48x1xf32>
    %cst_65 = arith.constant 3.200000e+01 : f32
    %202 = vector.broadcast %cst_65 : f32 to vector<48x1xf32>
    %203 = arith.divf %201, %202 : vector<48x1xf32>
    %204 = vector.broadcast %196 : vector<48x1xf32> to vector<48x32xf32>
    %205 = arith.subf %190, %204 : vector<48x32xf32>
    %cst_66 = arith.constant 9.99999997E-7 : f32
    %206 = vector.broadcast %cst_66 : f32 to vector<48x1xf32>
    %207 = arith.addf %203, %206 : vector<48x1xf32>
    %208 = math.rsqrt %207 : vector<48x1xf32>
    %209 = vector.broadcast %208 : vector<48x1xf32> to vector<48x32xf32>
    %210 = arith.mulf %205, %209 : vector<48x32xf32>
    %211 = vector.broadcast %191 : vector<1x32xf32> to vector<48x32xf32>
    %212 = arith.mulf %210, %211 : vector<48x32xf32>
    %213 = vector.broadcast %192 : vector<1x32xf32> to vector<48x32xf32>
    %214 = arith.addf %212, %213 : vector<48x32xf32>
    %c256 = arith.constant 256 : index
    %c0_67 = arith.constant 0 : index
    %215 = vector.load %arg2[%c256, %c0_67] : memref<544x128xf32, #tpu.memory_space<vmem>>, vector<32x64xf32>
    %cst_68 = arith.constant dense<0.000000e+00> : vector<48x64xf32>
    %216 = tpu.matmul %214, %215, %cst_68 {dimension_numbers = #tpu.dot_dimension_numbers<[1], [0], [0], [1], [0, 0, 1, 1], [], []>} : vector<48x32xf32>, vector<32x64xf32>, vector<48x64xf32> -> vector<48x64xf32>
    %c55 = arith.constant 55 : index
    %c0_69 = arith.constant 0 : index
    %217 = vector.load %arg3[%c55, %c0_69] : memref<72x128xf32, #tpu.memory_space<vmem>>, vector<1x64xf32>
    %218 = vector.broadcast %217 : vector<1x64xf32> to vector<48x64xf32>
    %219 = arith.addf %216, %218 : vector<48x64xf32>
    %cst_70 = arith.constant 5.000000e-01 : f32
    %220 = vector.broadcast %cst_70 : f32 to vector<48x64xf32>
    %221 = arith.mulf %220, %219 : vector<48x64xf32>
    %cst_71 = arith.constant 0.707106769 : f32
    %222 = vector.broadcast %cst_71 : f32 to vector<48x64xf32>
    %223 = arith.mulf %219, %222 : vector<48x64xf32>
    %224 = math.erf %223 : vector<48x64xf32>
    %cst_72 = arith.constant 1.000000e+00 : f32
    %225 = vector.broadcast %cst_72 : f32 to vector<48x64xf32>
    %226 = arith.addf %225, %224 : vector<48x64xf32>
    %227 = arith.mulf %221, %226 : vector<48x64xf32>
    %c288 = arith.constant 288 : index
    %c0_73 = arith.constant 0 : index
    %228 = vector.load %arg2[%c288, %c0_73] : memref<544x128xf32, #tpu.memory_space<vmem>>, vector<64x32xf32>
    %cst_74 = arith.constant dense<0.000000e+00> : vector<48x32xf32>
    %229 = tpu.matmul %227, %228, %cst_74 {dimension_numbers = #tpu.dot_dimension_numbers<[1], [0], [0], [1], [0, 0, 1, 1], [], []>} : vector<48x64xf32>, vector<64x32xf32>, vector<48x32xf32> -> vector<48x32xf32>
    %230 = arith.addf %190, %229 : vector<48x32xf32>
    %c56 = arith.constant 56 : index
    %c0_75 = arith.constant 0 : index
    %231 = vector.load %arg3[%c56, %c0_75] : memref<72x128xf32, #tpu.memory_space<vmem>>, vector<1x32xf32>
    %232 = vector.broadcast %231 : vector<1x32xf32> to vector<48x32xf32>
    %233 = arith.addf %230, %232 : vector<48x32xf32>
    %c57 = arith.constant 57 : index
    %c0_76 = arith.constant 0 : index
    %234 = vector.load %arg3[%c57, %c0_76] : memref<72x128xf32, #tpu.memory_space<vmem>>, vector<1x32xf32>
    %c58 = arith.constant 58 : index
    %c0_77 = arith.constant 0 : index
    %235 = vector.load %arg3[%c58, %c0_77] : memref<72x128xf32, #tpu.memory_space<vmem>>, vector<1x32xf32>
    %cst_78 = arith.constant dense<0.000000e+00> : vector<48xf32>
    %236 = vector.multi_reduction <add>, %233, %cst_78 [1] : vector<48x32xf32> to vector<48xf32>
    %237 = vector.shape_cast %236 : vector<48xf32> to vector<48x1xf32>
    %cst_79 = arith.constant 3.200000e+01 : f32
    %238 = vector.broadcast %cst_79 : f32 to vector<48x1xf32>
    %239 = arith.divf %237, %238 : vector<48x1xf32>
    %240 = vector.broadcast %239 : vector<48x1xf32> to vector<48x32xf32>
    %241 = arith.subf %233, %240 : vector<48x32xf32>
    %242 = arith.mulf %241, %241 : vector<48x32xf32>
    %cst_80 = arith.constant dense<0.000000e+00> : vector<48xf32>
    %243 = vector.multi_reduction <add>, %242, %cst_80 [1] : vector<48x32xf32> to vector<48xf32>
    %244 = vector.shape_cast %243 : vector<48xf32> to vector<48x1xf32>
    %cst_81 = arith.constant 3.200000e+01 : f32
    %245 = vector.broadcast %cst_81 : f32 to vector<48x1xf32>
    %246 = arith.divf %244, %245 : vector<48x1xf32>
    %247 = vector.broadcast %239 : vector<48x1xf32> to vector<48x32xf32>
    %248 = arith.subf %233, %247 : vector<48x32xf32>
    %cst_82 = arith.constant 9.99999997E-7 : f32
    %249 = vector.broadcast %cst_82 : f32 to vector<48x1xf32>
    %250 = arith.addf %246, %249 : vector<48x1xf32>
    %251 = math.rsqrt %250 : vector<48x1xf32>
    %252 = vector.broadcast %251 : vector<48x1xf32> to vector<48x32xf32>
    %253 = arith.mulf %248, %252 : vector<48x32xf32>
    %254 = vector.broadcast %234 : vector<1x32xf32> to vector<48x32xf32>
    %255 = arith.mulf %253, %254 : vector<48x32xf32>
    %256 = vector.broadcast %235 : vector<1x32xf32> to vector<48x32xf32>
    %257 = arith.addf %255, %256 : vector<48x32xf32>
    %c352 = arith.constant 352 : index
    %c0_83 = arith.constant 0 : index
    %258 = vector.load %arg2[%c352, %c0_83] : memref<544x128xf32, #tpu.memory_space<vmem>>, vector<32x96xf32>
    %cst_84 = arith.constant dense<0.000000e+00> : vector<48x96xf32>
    %259 = tpu.matmul %257, %258, %cst_84 {dimension_numbers = #tpu.dot_dimension_numbers<[1], [0], [0], [1], [0, 0, 1, 1], [], []>} : vector<48x32xf32>, vector<32x96xf32>, vector<48x96xf32> -> vector<48x96xf32>
    %c59 = arith.constant 59 : index
    %c0_85 = arith.constant 0 : index
    %260 = vector.load %arg3[%c59, %c0_85] : memref<72x128xf32, #tpu.memory_space<vmem>>, vector<1x96xf32>
    %261 = vector.broadcast %260 : vector<1x96xf32> to vector<48x96xf32>
    %262 = arith.addf %259, %261 : vector<48x96xf32>
    %263 = vector.extract_strided_slice %262 {offsets = [0, 0], sizes = [24, 96], strides = [1, 1]} : vector<48x96xf32> to vector<24x96xf32>
    %264 = vector.extract_strided_slice %263 {offsets = [0, 0], sizes = [24, 8], strides = [1, 1]} : vector<24x96xf32> to vector<24x8xf32>
    %265 = vector.extract_strided_slice %263 {offsets = [0, 32], sizes = [24, 8], strides = [1, 1]} : vector<24x96xf32> to vector<24x8xf32>
    %266 = vector.extract_strided_slice %263 {offsets = [0, 64], sizes = [24, 8], strides = [1, 1]} : vector<24x96xf32> to vector<24x8xf32>
    %cst_86 = arith.constant dense<0.000000e+00> : vector<24x24xf32>
    %267 = tpu.matmul %264, %265, %cst_86 {dimension_numbers = #tpu.dot_dimension_numbers<[1], [1], [0], [0], [0, 0, 1, 0], [], []>} : vector<24x8xf32>, vector<24x8xf32>, vector<24x24xf32> -> vector<24x24xf32>
    %cst_87 = arith.constant 0.353553385 : f32
    %268 = vector.broadcast %cst_87 : f32 to vector<24x24xf32>
    %269 = arith.mulf %267, %268 : vector<24x24xf32>
    %270 = vector.broadcast %6 : vector<1x24xf32> to vector<24x24xf32>
    %271 = arith.addf %269, %270 : vector<24x24xf32>
    %cst_88 = arith.constant dense<0xFF800000> : vector<24xf32>
    %272 = vector.multi_reduction <maximumf>, %271, %cst_88 [1] : vector<24x24xf32> to vector<24xf32>
    %273 = vector.shape_cast %272 : vector<24xf32> to vector<24x1xf32>
    %274 = vector.broadcast %273 : vector<24x1xf32> to vector<24x24xf32>
    %275 = arith.subf %271, %274 : vector<24x24xf32>
    %276 = math.exp %275 : vector<24x24xf32>
    %cst_89 = arith.constant dense<0.000000e+00> : vector<24xf32>
    %277 = vector.multi_reduction <add>, %276, %cst_89 [1] : vector<24x24xf32> to vector<24xf32>
    %278 = vector.shape_cast %277 : vector<24xf32> to vector<24x1xf32>
    %279 = vector.broadcast %278 : vector<24x1xf32> to vector<24x24xf32>
    %280 = arith.divf %276, %279 : vector<24x24xf32>
    %cst_90 = arith.constant dense<0.000000e+00> : vector<24x8xf32>
    %281 = tpu.matmul %280, %266, %cst_90 {dimension_numbers = #tpu.dot_dimension_numbers<[1], [0], [0], [1], [0, 0, 1, 1], [], []>} : vector<24x24xf32>, vector<24x8xf32>, vector<24x8xf32> -> vector<24x8xf32>
    %282 = vector.extract_strided_slice %263 {offsets = [0, 8], sizes = [24, 8], strides = [1, 1]} : vector<24x96xf32> to vector<24x8xf32>
    %283 = vector.extract_strided_slice %263 {offsets = [0, 40], sizes = [24, 8], strides = [1, 1]} : vector<24x96xf32> to vector<24x8xf32>
    %284 = vector.extract_strided_slice %263 {offsets = [0, 72], sizes = [24, 8], strides = [1, 1]} : vector<24x96xf32> to vector<24x8xf32>
    %cst_91 = arith.constant dense<0.000000e+00> : vector<24x24xf32>
    %285 = tpu.matmul %282, %283, %cst_91 {dimension_numbers = #tpu.dot_dimension_numbers<[1], [1], [0], [0], [0, 0, 1, 0], [], []>} : vector<24x8xf32>, vector<24x8xf32>, vector<24x24xf32> -> vector<24x24xf32>
    %cst_92 = arith.constant 0.353553385 : f32
    %286 = vector.broadcast %cst_92 : f32 to vector<24x24xf32>
    %287 = arith.mulf %285, %286 : vector<24x24xf32>
    %288 = vector.broadcast %6 : vector<1x24xf32> to vector<24x24xf32>
    %289 = arith.addf %287, %288 : vector<24x24xf32>
    %cst_93 = arith.constant dense<0xFF800000> : vector<24xf32>
    %290 = vector.multi_reduction <maximumf>, %289, %cst_93 [1] : vector<24x24xf32> to vector<24xf32>
    %291 = vector.shape_cast %290 : vector<24xf32> to vector<24x1xf32>
    %292 = vector.broadcast %291 : vector<24x1xf32> to vector<24x24xf32>
    %293 = arith.subf %289, %292 : vector<24x24xf32>
    %294 = math.exp %293 : vector<24x24xf32>
    %cst_94 = arith.constant dense<0.000000e+00> : vector<24xf32>
    %295 = vector.multi_reduction <add>, %294, %cst_94 [1] : vector<24x24xf32> to vector<24xf32>
    %296 = vector.shape_cast %295 : vector<24xf32> to vector<24x1xf32>
    %297 = vector.broadcast %296 : vector<24x1xf32> to vector<24x24xf32>
    %298 = arith.divf %294, %297 : vector<24x24xf32>
    %cst_95 = arith.constant dense<0.000000e+00> : vector<24x8xf32>
    %299 = tpu.matmul %298, %284, %cst_95 {dimension_numbers = #tpu.dot_dimension_numbers<[1], [0], [0], [1], [0, 0, 1, 1], [], []>} : vector<24x24xf32>, vector<24x8xf32>, vector<24x8xf32> -> vector<24x8xf32>
    %300 = vector.extract_strided_slice %263 {offsets = [0, 16], sizes = [24, 8], strides = [1, 1]} : vector<24x96xf32> to vector<24x8xf32>
    %301 = vector.extract_strided_slice %263 {offsets = [0, 48], sizes = [24, 8], strides = [1, 1]} : vector<24x96xf32> to vector<24x8xf32>
    %302 = vector.extract_strided_slice %263 {offsets = [0, 80], sizes = [24, 8], strides = [1, 1]} : vector<24x96xf32> to vector<24x8xf32>
    %cst_96 = arith.constant dense<0.000000e+00> : vector<24x24xf32>
    %303 = tpu.matmul %300, %301, %cst_96 {dimension_numbers = #tpu.dot_dimension_numbers<[1], [1], [0], [0], [0, 0, 1, 0], [], []>} : vector<24x8xf32>, vector<24x8xf32>, vector<24x24xf32> -> vector<24x24xf32>
    %cst_97 = arith.constant 0.353553385 : f32
    %304 = vector.broadcast %cst_97 : f32 to vector<24x24xf32>
    %305 = arith.mulf %303, %304 : vector<24x24xf32>
    %306 = vector.broadcast %6 : vector<1x24xf32> to vector<24x24xf32>
    %307 = arith.addf %305, %306 : vector<24x24xf32>
    %cst_98 = arith.constant dense<0xFF800000> : vector<24xf32>
    %308 = vector.multi_reduction <maximumf>, %307, %cst_98 [1] : vector<24x24xf32> to vector<24xf32>
    %309 = vector.shape_cast %308 : vector<24xf32> to vector<24x1xf32>
    %310 = vector.broadcast %309 : vector<24x1xf32> to vector<24x24xf32>
    %311 = arith.subf %307, %310 : vector<24x24xf32>
    %312 = math.exp %311 : vector<24x24xf32>
    %cst_99 = arith.constant dense<0.000000e+00> : vector<24xf32>
    %313 = vector.multi_reduction <add>, %312, %cst_99 [1] : vector<24x24xf32> to vector<24xf32>
    %314 = vector.shape_cast %313 : vector<24xf32> to vector<24x1xf32>
    %315 = vector.broadcast %314 : vector<24x1xf32> to vector<24x24xf32>
    %316 = arith.divf %312, %315 : vector<24x24xf32>
    %cst_100 = arith.constant dense<0.000000e+00> : vector<24x8xf32>
    %317 = tpu.matmul %316, %302, %cst_100 {dimension_numbers = #tpu.dot_dimension_numbers<[1], [0], [0], [1], [0, 0, 1, 1], [], []>} : vector<24x24xf32>, vector<24x8xf32>, vector<24x8xf32> -> vector<24x8xf32>
    %318 = vector.extract_strided_slice %263 {offsets = [0, 24], sizes = [24, 8], strides = [1, 1]} : vector<24x96xf32> to vector<24x8xf32>
    %319 = vector.extract_strided_slice %263 {offsets = [0, 56], sizes = [24, 8], strides = [1, 1]} : vector<24x96xf32> to vector<24x8xf32>
    %320 = vector.extract_strided_slice %263 {offsets = [0, 88], sizes = [24, 8], strides = [1, 1]} : vector<24x96xf32> to vector<24x8xf32>
    %cst_101 = arith.constant dense<0.000000e+00> : vector<24x24xf32>
    %321 = tpu.matmul %318, %319, %cst_101 {dimension_numbers = #tpu.dot_dimension_numbers<[1], [1], [0], [0], [0, 0, 1, 0], [], []>} : vector<24x8xf32>, vector<24x8xf32>, vector<24x24xf32> -> vector<24x24xf32>
    %cst_102 = arith.constant 0.353553385 : f32
    %322 = vector.broadcast %cst_102 : f32 to vector<24x24xf32>
    %323 = arith.mulf %321, %322 : vector<24x24xf32>
    %324 = vector.broadcast %6 : vector<1x24xf32> to vector<24x24xf32>
    %325 = arith.addf %323, %324 : vector<24x24xf32>
    %cst_103 = arith.constant dense<0xFF800000> : vector<24xf32>
    %326 = vector.multi_reduction <maximumf>, %325, %cst_103 [1] : vector<24x24xf32> to vector<24xf32>
    %327 = vector.shape_cast %326 : vector<24xf32> to vector<24x1xf32>
    %328 = vector.broadcast %327 : vector<24x1xf32> to vector<24x24xf32>
    %329 = arith.subf %325, %328 : vector<24x24xf32>
    %330 = math.exp %329 : vector<24x24xf32>
    %cst_104 = arith.constant dense<0.000000e+00> : vector<24xf32>
    %331 = vector.multi_reduction <add>, %330, %cst_104 [1] : vector<24x24xf32> to vector<24xf32>
    %332 = vector.shape_cast %331 : vector<24xf32> to vector<24x1xf32>
    %333 = vector.broadcast %332 : vector<24x1xf32> to vector<24x24xf32>
    %334 = arith.divf %330, %333 : vector<24x24xf32>
    %cst_105 = arith.constant dense<0.000000e+00> : vector<24x8xf32>
    %335 = tpu.matmul %334, %320, %cst_105 {dimension_numbers = #tpu.dot_dimension_numbers<[1], [0], [0], [1], [0, 0, 1, 1], [], []>} : vector<24x24xf32>, vector<24x8xf32>, vector<24x8xf32> -> vector<24x8xf32>
    %336 = tpu.concatenate %281, %299, %317, %335 in 1 : vector<24x8xf32>, vector<24x8xf32>, vector<24x8xf32>, vector<24x8xf32> -> vector<24x32xf32>
    %337 = vector.extract_strided_slice %262 {offsets = [24, 0], sizes = [24, 96], strides = [1, 1]} : vector<48x96xf32> to vector<24x96xf32>
    %338 = vector.extract_strided_slice %337 {offsets = [0, 0], sizes = [24, 8], strides = [1, 1]} : vector<24x96xf32> to vector<24x8xf32>
    %339 = vector.extract_strided_slice %337 {offsets = [0, 32], sizes = [24, 8], strides = [1, 1]} : vector<24x96xf32> to vector<24x8xf32>
    %340 = vector.extract_strided_slice %337 {offsets = [0, 64], sizes = [24, 8], strides = [1, 1]} : vector<24x96xf32> to vector<24x8xf32>
    %cst_106 = arith.constant dense<0.000000e+00> : vector<24x24xf32>
    %341 = tpu.matmul %338, %339, %cst_106 {dimension_numbers = #tpu.dot_dimension_numbers<[1], [1], [0], [0], [0, 0, 1, 0], [], []>} : vector<24x8xf32>, vector<24x8xf32>, vector<24x24xf32> -> vector<24x24xf32>
    %cst_107 = arith.constant 0.353553385 : f32
    %342 = vector.broadcast %cst_107 : f32 to vector<24x24xf32>
    %343 = arith.mulf %341, %342 : vector<24x24xf32>
    %344 = vector.broadcast %6 : vector<1x24xf32> to vector<24x24xf32>
    %345 = arith.addf %343, %344 : vector<24x24xf32>
    %cst_108 = arith.constant dense<0xFF800000> : vector<24xf32>
    %346 = vector.multi_reduction <maximumf>, %345, %cst_108 [1] : vector<24x24xf32> to vector<24xf32>
    %347 = vector.shape_cast %346 : vector<24xf32> to vector<24x1xf32>
    %348 = vector.broadcast %347 : vector<24x1xf32> to vector<24x24xf32>
    %349 = arith.subf %345, %348 : vector<24x24xf32>
    %350 = math.exp %349 : vector<24x24xf32>
    %cst_109 = arith.constant dense<0.000000e+00> : vector<24xf32>
    %351 = vector.multi_reduction <add>, %350, %cst_109 [1] : vector<24x24xf32> to vector<24xf32>
    %352 = vector.shape_cast %351 : vector<24xf32> to vector<24x1xf32>
    %353 = vector.broadcast %352 : vector<24x1xf32> to vector<24x24xf32>
    %354 = arith.divf %350, %353 : vector<24x24xf32>
    %cst_110 = arith.constant dense<0.000000e+00> : vector<24x8xf32>
    %355 = tpu.matmul %354, %340, %cst_110 {dimension_numbers = #tpu.dot_dimension_numbers<[1], [0], [0], [1], [0, 0, 1, 1], [], []>} : vector<24x24xf32>, vector<24x8xf32>, vector<24x8xf32> -> vector<24x8xf32>
    %356 = vector.extract_strided_slice %337 {offsets = [0, 8], sizes = [24, 8], strides = [1, 1]} : vector<24x96xf32> to vector<24x8xf32>
    %357 = vector.extract_strided_slice %337 {offsets = [0, 40], sizes = [24, 8], strides = [1, 1]} : vector<24x96xf32> to vector<24x8xf32>
    %358 = vector.extract_strided_slice %337 {offsets = [0, 72], sizes = [24, 8], strides = [1, 1]} : vector<24x96xf32> to vector<24x8xf32>
    %cst_111 = arith.constant dense<0.000000e+00> : vector<24x24xf32>
    %359 = tpu.matmul %356, %357, %cst_111 {dimension_numbers = #tpu.dot_dimension_numbers<[1], [1], [0], [0], [0, 0, 1, 0], [], []>} : vector<24x8xf32>, vector<24x8xf32>, vector<24x24xf32> -> vector<24x24xf32>
    %cst_112 = arith.constant 0.353553385 : f32
    %360 = vector.broadcast %cst_112 : f32 to vector<24x24xf32>
    %361 = arith.mulf %359, %360 : vector<24x24xf32>
    %362 = vector.broadcast %6 : vector<1x24xf32> to vector<24x24xf32>
    %363 = arith.addf %361, %362 : vector<24x24xf32>
    %cst_113 = arith.constant dense<0xFF800000> : vector<24xf32>
    %364 = vector.multi_reduction <maximumf>, %363, %cst_113 [1] : vector<24x24xf32> to vector<24xf32>
    %365 = vector.shape_cast %364 : vector<24xf32> to vector<24x1xf32>
    %366 = vector.broadcast %365 : vector<24x1xf32> to vector<24x24xf32>
    %367 = arith.subf %363, %366 : vector<24x24xf32>
    %368 = math.exp %367 : vector<24x24xf32>
    %cst_114 = arith.constant dense<0.000000e+00> : vector<24xf32>
    %369 = vector.multi_reduction <add>, %368, %cst_114 [1] : vector<24x24xf32> to vector<24xf32>
    %370 = vector.shape_cast %369 : vector<24xf32> to vector<24x1xf32>
    %371 = vector.broadcast %370 : vector<24x1xf32> to vector<24x24xf32>
    %372 = arith.divf %368, %371 : vector<24x24xf32>
    %cst_115 = arith.constant dense<0.000000e+00> : vector<24x8xf32>
    %373 = tpu.matmul %372, %358, %cst_115 {dimension_numbers = #tpu.dot_dimension_numbers<[1], [0], [0], [1], [0, 0, 1, 1], [], []>} : vector<24x24xf32>, vector<24x8xf32>, vector<24x8xf32> -> vector<24x8xf32>
    %374 = vector.extract_strided_slice %337 {offsets = [0, 16], sizes = [24, 8], strides = [1, 1]} : vector<24x96xf32> to vector<24x8xf32>
    %375 = vector.extract_strided_slice %337 {offsets = [0, 48], sizes = [24, 8], strides = [1, 1]} : vector<24x96xf32> to vector<24x8xf32>
    %376 = vector.extract_strided_slice %337 {offsets = [0, 80], sizes = [24, 8], strides = [1, 1]} : vector<24x96xf32> to vector<24x8xf32>
    %cst_116 = arith.constant dense<0.000000e+00> : vector<24x24xf32>
    %377 = tpu.matmul %374, %375, %cst_116 {dimension_numbers = #tpu.dot_dimension_numbers<[1], [1], [0], [0], [0, 0, 1, 0], [], []>} : vector<24x8xf32>, vector<24x8xf32>, vector<24x24xf32> -> vector<24x24xf32>
    %cst_117 = arith.constant 0.353553385 : f32
    %378 = vector.broadcast %cst_117 : f32 to vector<24x24xf32>
    %379 = arith.mulf %377, %378 : vector<24x24xf32>
    %380 = vector.broadcast %6 : vector<1x24xf32> to vector<24x24xf32>
    %381 = arith.addf %379, %380 : vector<24x24xf32>
    %cst_118 = arith.constant dense<0xFF800000> : vector<24xf32>
    %382 = vector.multi_reduction <maximumf>, %381, %cst_118 [1] : vector<24x24xf32> to vector<24xf32>
    %383 = vector.shape_cast %382 : vector<24xf32> to vector<24x1xf32>
    %384 = vector.broadcast %383 : vector<24x1xf32> to vector<24x24xf32>
    %385 = arith.subf %381, %384 : vector<24x24xf32>
    %386 = math.exp %385 : vector<24x24xf32>
    %cst_119 = arith.constant dense<0.000000e+00> : vector<24xf32>
    %387 = vector.multi_reduction <add>, %386, %cst_119 [1] : vector<24x24xf32> to vector<24xf32>
    %388 = vector.shape_cast %387 : vector<24xf32> to vector<24x1xf32>
    %389 = vector.broadcast %388 : vector<24x1xf32> to vector<24x24xf32>
    %390 = arith.divf %386, %389 : vector<24x24xf32>
    %cst_120 = arith.constant dense<0.000000e+00> : vector<24x8xf32>
    %391 = tpu.matmul %390, %376, %cst_120 {dimension_numbers = #tpu.dot_dimension_numbers<[1], [0], [0], [1], [0, 0, 1, 1], [], []>} : vector<24x24xf32>, vector<24x8xf32>, vector<24x8xf32> -> vector<24x8xf32>
    %392 = vector.extract_strided_slice %337 {offsets = [0, 24], sizes = [24, 8], strides = [1, 1]} : vector<24x96xf32> to vector<24x8xf32>
    %393 = vector.extract_strided_slice %337 {offsets = [0, 56], sizes = [24, 8], strides = [1, 1]} : vector<24x96xf32> to vector<24x8xf32>
    %394 = vector.extract_strided_slice %337 {offsets = [0, 88], sizes = [24, 8], strides = [1, 1]} : vector<24x96xf32> to vector<24x8xf32>
    %cst_121 = arith.constant dense<0.000000e+00> : vector<24x24xf32>
    %395 = tpu.matmul %392, %393, %cst_121 {dimension_numbers = #tpu.dot_dimension_numbers<[1], [1], [0], [0], [0, 0, 1, 0], [], []>} : vector<24x8xf32>, vector<24x8xf32>, vector<24x24xf32> -> vector<24x24xf32>
    %cst_122 = arith.constant 0.353553385 : f32
    %396 = vector.broadcast %cst_122 : f32 to vector<24x24xf32>
    %397 = arith.mulf %395, %396 : vector<24x24xf32>
    %398 = vector.broadcast %6 : vector<1x24xf32> to vector<24x24xf32>
    %399 = arith.addf %397, %398 : vector<24x24xf32>
    %cst_123 = arith.constant dense<0xFF800000> : vector<24xf32>
    %400 = vector.multi_reduction <maximumf>, %399, %cst_123 [1] : vector<24x24xf32> to vector<24xf32>
    %401 = vector.shape_cast %400 : vector<24xf32> to vector<24x1xf32>
    %402 = vector.broadcast %401 : vector<24x1xf32> to vector<24x24xf32>
    %403 = arith.subf %399, %402 : vector<24x24xf32>
    %404 = math.exp %403 : vector<24x24xf32>
    %cst_124 = arith.constant dense<0.000000e+00> : vector<24xf32>
    %405 = vector.multi_reduction <add>, %404, %cst_124 [1] : vector<24x24xf32> to vector<24xf32>
    %406 = vector.shape_cast %405 : vector<24xf32> to vector<24x1xf32>
    %407 = vector.broadcast %406 : vector<24x1xf32> to vector<24x24xf32>
    %408 = arith.divf %404, %407 : vector<24x24xf32>
    %cst_125 = arith.constant dense<0.000000e+00> : vector<24x8xf32>
    %409 = tpu.matmul %408, %394, %cst_125 {dimension_numbers = #tpu.dot_dimension_numbers<[1], [0], [0], [1], [0, 0, 1, 1], [], []>} : vector<24x24xf32>, vector<24x8xf32>, vector<24x8xf32> -> vector<24x8xf32>
    %410 = tpu.concatenate %355, %373, %391, %409 in 1 : vector<24x8xf32>, vector<24x8xf32>, vector<24x8xf32>, vector<24x8xf32> -> vector<24x32xf32>
    %411 = tpu.concatenate %336, %410 in 0 : vector<24x32xf32>, vector<24x32xf32> -> vector<48x32xf32>
    %c384 = arith.constant 384 : index
    %c0_126 = arith.constant 0 : index
    %412 = vector.load %arg2[%c384, %c0_126] : memref<544x128xf32, #tpu.memory_space<vmem>>, vector<32x32xf32>
    %cst_127 = arith.constant dense<0.000000e+00> : vector<48x32xf32>
    %413 = tpu.matmul %411, %412, %cst_127 {dimension_numbers = #tpu.dot_dimension_numbers<[1], [0], [0], [1], [0, 0, 1, 1], [], []>} : vector<48x32xf32>, vector<32x32xf32>, vector<48x32xf32> -> vector<48x32xf32>
    %414 = arith.addf %233, %413 : vector<48x32xf32>
    %c60 = arith.constant 60 : index
    %c0_128 = arith.constant 0 : index
    %415 = vector.load %arg3[%c60, %c0_128] : memref<72x128xf32, #tpu.memory_space<vmem>>, vector<1x32xf32>
    %416 = vector.broadcast %415 : vector<1x32xf32> to vector<48x32xf32>
    %417 = arith.addf %414, %416 : vector<48x32xf32>
    %c61 = arith.constant 61 : index
    %c0_129 = arith.constant 0 : index
    %418 = vector.load %arg3[%c61, %c0_129] : memref<72x128xf32, #tpu.memory_space<vmem>>, vector<1x32xf32>
    %c62 = arith.constant 62 : index
    %c0_130 = arith.constant 0 : index
    %419 = vector.load %arg3[%c62, %c0_130] : memref<72x128xf32, #tpu.memory_space<vmem>>, vector<1x32xf32>
    %cst_131 = arith.constant dense<0.000000e+00> : vector<48xf32>
    %420 = vector.multi_reduction <add>, %417, %cst_131 [1] : vector<48x32xf32> to vector<48xf32>
    %421 = vector.shape_cast %420 : vector<48xf32> to vector<48x1xf32>
    %cst_132 = arith.constant 3.200000e+01 : f32
    %422 = vector.broadcast %cst_132 : f32 to vector<48x1xf32>
    %423 = arith.divf %421, %422 : vector<48x1xf32>
    %424 = vector.broadcast %423 : vector<48x1xf32> to vector<48x32xf32>
    %425 = arith.subf %417, %424 : vector<48x32xf32>
    %426 = arith.mulf %425, %425 : vector<48x32xf32>
    %cst_133 = arith.constant dense<0.000000e+00> : vector<48xf32>
    %427 = vector.multi_reduction <add>, %426, %cst_133 [1] : vector<48x32xf32> to vector<48xf32>
    %428 = vector.shape_cast %427 : vector<48xf32> to vector<48x1xf32>
    %cst_134 = arith.constant 3.200000e+01 : f32
    %429 = vector.broadcast %cst_134 : f32 to vector<48x1xf32>
    %430 = arith.divf %428, %429 : vector<48x1xf32>
    %431 = vector.broadcast %423 : vector<48x1xf32> to vector<48x32xf32>
    %432 = arith.subf %417, %431 : vector<48x32xf32>
    %cst_135 = arith.constant 9.99999997E-7 : f32
    %433 = vector.broadcast %cst_135 : f32 to vector<48x1xf32>
    %434 = arith.addf %430, %433 : vector<48x1xf32>
    %435 = math.rsqrt %434 : vector<48x1xf32>
    %436 = vector.broadcast %435 : vector<48x1xf32> to vector<48x32xf32>
    %437 = arith.mulf %432, %436 : vector<48x32xf32>
    %438 = vector.broadcast %418 : vector<1x32xf32> to vector<48x32xf32>
    %439 = arith.mulf %437, %438 : vector<48x32xf32>
    %440 = vector.broadcast %419 : vector<1x32xf32> to vector<48x32xf32>
    %441 = arith.addf %439, %440 : vector<48x32xf32>
    %c416 = arith.constant 416 : index
    %c0_136 = arith.constant 0 : index
    %442 = vector.load %arg2[%c416, %c0_136] : memref<544x128xf32, #tpu.memory_space<vmem>>, vector<32x64xf32>
    %cst_137 = arith.constant dense<0.000000e+00> : vector<48x64xf32>
    %443 = tpu.matmul %441, %442, %cst_137 {dimension_numbers = #tpu.dot_dimension_numbers<[1], [0], [0], [1], [0, 0, 1, 1], [], []>} : vector<48x32xf32>, vector<32x64xf32>, vector<48x64xf32> -> vector<48x64xf32>
    %c63 = arith.constant 63 : index
    %c0_138 = arith.constant 0 : index
    %444 = vector.load %arg3[%c63, %c0_138] : memref<72x128xf32, #tpu.memory_space<vmem>>, vector<1x64xf32>
    %445 = vector.broadcast %444 : vector<1x64xf32> to vector<48x64xf32>
    %446 = arith.addf %443, %445 : vector<48x64xf32>
    %cst_139 = arith.constant 5.000000e-01 : f32
    %447 = vector.broadcast %cst_139 : f32 to vector<48x64xf32>
    %448 = arith.mulf %447, %446 : vector<48x64xf32>
    %cst_140 = arith.constant 0.707106769 : f32
    %449 = vector.broadcast %cst_140 : f32 to vector<48x64xf32>
    %450 = arith.mulf %446, %449 : vector<48x64xf32>
    %451 = math.erf %450 : vector<48x64xf32>
    %cst_141 = arith.constant 1.000000e+00 : f32
    %452 = vector.broadcast %cst_141 : f32 to vector<48x64xf32>
    %453 = arith.addf %452, %451 : vector<48x64xf32>
    %454 = arith.mulf %448, %453 : vector<48x64xf32>
    %c448 = arith.constant 448 : index
    %c0_142 = arith.constant 0 : index
    %455 = vector.load %arg2[%c448, %c0_142] : memref<544x128xf32, #tpu.memory_space<vmem>>, vector<64x32xf32>
    %cst_143 = arith.constant dense<0.000000e+00> : vector<48x32xf32>
    %456 = tpu.matmul %454, %455, %cst_143 {dimension_numbers = #tpu.dot_dimension_numbers<[1], [0], [0], [1], [0, 0, 1, 1], [], []>} : vector<48x64xf32>, vector<64x32xf32>, vector<48x32xf32> -> vector<48x32xf32>
    %457 = arith.addf %417, %456 : vector<48x32xf32>
    %c64 = arith.constant 64 : index
    %c0_144 = arith.constant 0 : index
    %458 = vector.load %arg3[%c64, %c0_144] : memref<72x128xf32, #tpu.memory_space<vmem>>, vector<1x32xf32>
    %459 = vector.broadcast %458 : vector<1x32xf32> to vector<48x32xf32>
    %460 = arith.addf %457, %459 : vector<48x32xf32>
    %461 = vector.extract_strided_slice %460 {offsets = [0, 0], sizes = [1, 32], strides = [1, 1]} : vector<48x32xf32> to vector<1x32xf32>
    %462 = vector.extract_strided_slice %460 {offsets = [24, 0], sizes = [1, 32], strides = [1, 1]} : vector<48x32xf32> to vector<1x32xf32>
    %463 = tpu.concatenate %461, %462 in 0 : vector<1x32xf32>, vector<1x32xf32> -> vector<2x32xf32>
    %c65 = arith.constant 65 : index
    %c0_145 = arith.constant 0 : index
    %464 = vector.load %arg3[%c65, %c0_145] : memref<72x128xf32, #tpu.memory_space<vmem>>, vector<1x32xf32>
    %c66 = arith.constant 66 : index
    %c0_146 = arith.constant 0 : index
    %465 = vector.load %arg3[%c66, %c0_146] : memref<72x128xf32, #tpu.memory_space<vmem>>, vector<1x32xf32>
    %cst_147 = arith.constant dense<0.000000e+00> : vector<2xf32>
    %466 = vector.multi_reduction <add>, %463, %cst_147 [1] : vector<2x32xf32> to vector<2xf32>
    %467 = vector.shape_cast %466 : vector<2xf32> to vector<2x1xf32>
    %cst_148 = arith.constant 3.200000e+01 : f32
    %468 = vector.broadcast %cst_148 : f32 to vector<2x1xf32>
    %469 = arith.divf %467, %468 : vector<2x1xf32>
    %470 = vector.broadcast %469 : vector<2x1xf32> to vector<2x32xf32>
    %471 = arith.subf %463, %470 : vector<2x32xf32>
    %472 = arith.mulf %471, %471 : vector<2x32xf32>
    %cst_149 = arith.constant dense<0.000000e+00> : vector<2xf32>
    %473 = vector.multi_reduction <add>, %472, %cst_149 [1] : vector<2x32xf32> to vector<2xf32>
    %474 = vector.shape_cast %473 : vector<2xf32> to vector<2x1xf32>
    %cst_150 = arith.constant 3.200000e+01 : f32
    %475 = vector.broadcast %cst_150 : f32 to vector<2x1xf32>
    %476 = arith.divf %474, %475 : vector<2x1xf32>
    %477 = vector.broadcast %469 : vector<2x1xf32> to vector<2x32xf32>
    %478 = arith.subf %463, %477 : vector<2x32xf32>
    %cst_151 = arith.constant 9.99999997E-7 : f32
    %479 = vector.broadcast %cst_151 : f32 to vector<2x1xf32>
    %480 = arith.addf %476, %479 : vector<2x1xf32>
    %481 = math.rsqrt %480 : vector<2x1xf32>
    %482 = vector.broadcast %481 : vector<2x1xf32> to vector<2x32xf32>
    %483 = arith.mulf %478, %482 : vector<2x32xf32>
    %484 = vector.broadcast %464 : vector<1x32xf32> to vector<2x32xf32>
    %485 = arith.mulf %483, %484 : vector<2x32xf32>
    %486 = vector.broadcast %465 : vector<1x32xf32> to vector<2x32xf32>
    %487 = arith.addf %485, %486 : vector<2x32xf32>
    %c512 = arith.constant 512 : index
    %c0_152 = arith.constant 0 : index
    %488 = vector.load %arg2[%c512, %c0_152] : memref<544x128xf32, #tpu.memory_space<vmem>>, vector<32x128xf32>
    %cst_153 = arith.constant dense<0.000000e+00> : vector<2x128xf32>
    %489 = tpu.matmul %487, %488, %cst_153 {dimension_numbers = #tpu.dot_dimension_numbers<[1], [0], [0], [1], [0, 0, 1, 1], [], []>} : vector<2x32xf32>, vector<32x128xf32>, vector<2x128xf32> -> vector<2x128xf32>
    %c67 = arith.constant 67 : index
    %c0_154 = arith.constant 0 : index
    %490 = vector.load %arg3[%c67, %c0_154] : memref<72x128xf32, #tpu.memory_space<vmem>>, vector<1x128xf32>
    %491 = vector.broadcast %490 : vector<1x128xf32> to vector<2x128xf32>
    %492 = arith.addf %489, %491 : vector<2x128xf32>
    %c0_155 = arith.constant 0 : index
    %c0_156 = arith.constant 0 : index
    %c0_157 = arith.constant 0 : index
    %493 = vector.load %arg4[%c0_155, %c0_156, %c0_157] : memref<1x2x128xf32, #tpu.memory_space<vmem>>, vector<1x2x128xf32>
    %494 = vector.shape_cast %493 : vector<1x2x128xf32> to vector<2x128xf32>
    %495 = vector.shape_cast %492 : vector<2x128xf32> to vector<1x2x128xf32>
    tpu.vector_store %arg4[%c0_155, %c0_156, %c0_157], %495 {strides = array<i32>} : memref<1x2x128xf32, #tpu.memory_space<vmem>>, vector<1x2x128xf32>,
    return
  }
  func.func @transform_0(%arg0: i32) -> (i32, i32, i32) {
    %c0_i32 = arith.constant 0 : i32
    %c0_i32_0 = arith.constant 0 : i32
    %c0_i32_1 = arith.constant 0 : i32
    return %arg0, %c0_i32, %c0_i32_0 : i32, i32, i32
  }
  func.func @transform_1(%arg0: i32) -> (i32, i32) {
    %c0_i32 = arith.constant 0 : i32
    %c0_i32_0 = arith.constant 0 : i32
    %c0_i32_1 = arith.constant 0 : i32
    return %c0_i32, %c0_i32_0 : i32, i32
  }
  func.func @transform_2(%arg0: i32) -> (i32, i32) {
    %c0_i32 = arith.constant 0 : i32
    %c0_i32_0 = arith.constant 0 : i32
    %c0_i32_1 = arith.constant 0 : i32
    return %c0_i32, %c0_i32_0 : i32, i32
  }
  func.func @transform_3(%arg0: i32) -> (i32, i32, i32) {
    %c0_i32 = arith.constant 0 : i32
    %c0_i32_0 = arith.constant 0 : i32
    %c0_i32_1 = arith.constant 0 : i32
    return %arg0, %c0_i32, %c0_i32_0 : i32, i32, i32
  }
}

</mosaic_0001>

<bundles_post_ra>
// kernel: base_timm_model_forward.1
= control target key start
LH: loop header
LB: loop body
LE: loop exit
PB: predicated region body
PF: predicated region fallthrough
CT: control target
= control target key end

     0   :  { %v7668_v3 = vmov 0.0|0.0   ;;  %vm57_vm0 = vcmask 523264   ;;  %s9660_s0 = inlined_call_operand.vmem [shape: f32[1,48,192], index: 0, kind: input, shape index: {}]   ;;  %s9661_s1 = inlined_call_operand.vmem [shape: f32[544,128], index: 1, kind: input, shape index: {}]   ;;  %s9662_s2 = inlined_call_operand.vmem [shape: f32[72,128], index: 2, kind: input, shape index: {}]   ;;  %s9663_s3 = inlined_call_operand.hbm [shape: f32[1,2,128], index: 3, kind: output, shape index: {}]  }
   0x1   :  { %v27_v0 = vld [vmem:[%s9661_s1] sm:$0xff]  ;;  %v28_v1 = vld [vmem:[%s9661_s1 + $0x8] sm:$0xff]  ;;  %v29_v2 = vld [vmem:[%s9661_s1 + $0x10] sm:$0xff]  ;;  %6960 = vmatprep.subr.bf16.mxu0 %v7668_v3 }
   0x2   :  { %v6961_v4 = vpack.c.bf16 %v28_v1, %v27_v0  ;;  %v30_v5 = vld [vmem:[%s9661_s1 + $0x18] sm:$0xff]  ;;  %v31_v7 = vld [vmem:[%s9661_s1 + $0x20] sm:$0xff]  ;;  %v32_v8 = vld [vmem:[%s9661_s1 + $0x28] sm:$0xff] }
   0x3   :  { %v6964_v6 = vpack.c.bf16 %v30_v5, %v29_v2  ;;  %v6967_v9 = vpack.c.bf16 %v32_v8, %v31_v7  ;;  %v33_v10 = vld [vmem:[%s9661_s1 + $0x30] sm:$0xff]  ;;  %v34_v11 = vld [vmem:[%s9661_s1 + $0x38] sm:$0xff]  ;;  %v16_v12 = vld [vmem:[%s9660_s0 + $0x8] sm:$0xff] }
   0x4   :  { %6962 = vmatpush1.bf16.msra.mxu0 %v6961_v4  ;;  %5813 = vmatprep.mubr.msk.f32.mxu0 %vm57_vm0, %v16_v12  ;;  %v6970_v13 = vpack.c.bf16 %v34_v11, %v33_v10  ;;  %v35_v14 = vld [vmem:[%s9661_s1 + $0x40] sm:$0xff]  ;;  %v36_v15 = vld [vmem:[%s9661_s1 + $0x48] sm:$0xff] }
   0x5   :  { %6963 = vmatprep.subr.bf16.mxu0 %v7668_v3 }
   0x8   :  { %6965 = vmatpush1.bf16.msra.mxu0 %v6964_v6 }
   0x9   :  { %6966 = vmatprep.subr.bf16.mxu0 %v7668_v3 }
   0xc   :  { %6968 = vmatpush1.bf16.msra.mxu0 %v6967_v9 }
   0xd   :  { %6969 = vmatprep.subr.bf16.mxu0 %v7668_v3 }
   0xe   :  { %8 = vsyncpa [#allocation3], 0  ;;  %v6973_v16 = vpack.c.bf16 %v36_v15, %v35_v14  ;;  %v37_v17 = vld [vmem:[%s9661_s1 + $0x50] sm:$0xff]  ;;  %v38_v18 = vld [vmem:[%s9661_s1 + $0x58] sm:$0xff]  ;;  %vm174_vm1 = vcmask 261120   ;;  %s7669_s28 = smov 96  }
   0xf   :  { %v6976_v19 = vpack.c.bf16 %v38_v18, %v37_v17  ;;  %v39_v20 = vld [vmem:[%s9661_s1 + $0x60] sm:$0xff]  ;;  %v40_v21 = vld [vmem:[%s9661_s1 + $0x68] sm:$0xff]  ;;  %v41_v23 = vld [vmem:[%s9661_s1 + $0x70] sm:$0xff]  ;;  %vm7670_vm2 = vmmov 0   ;;  %vm405_vm3 = vcmask 64512   ;;  %vm508_vm5 = vcmask 195584  }
  0x10   :  { %6971 = vmatpush1.bf16.msra.mxu0 %v6970_v13  ;;  %v6979_v22 = vpack.c.bf16 %v40_v21, %v39_v20  ;;  %v42_v24 = vld [vmem:[%s9661_s1 + $0x78] sm:$0xff]  ;;  %v43_v26 = vld [vmem:[%s9661_s1 + $0x80] sm:$0xff]  ;;  %v44_v27 = vld [vmem:[%s9661_s1 + $0x88] sm:$0xff]  ;;  %s7672_s4 = smov 64   ;;  %s7673_s5 = smov 88   ;;  %vm1402_vm6 = vcmask 130048  }
  0x11   :  { %6972 = vmatprep.subr.bf16.mxu0 %v7668_v3  ;;  %v6982_v25 = vpack.c.bf16 %v42_v24, %v41_v23  ;;  %v6985_v28 = vpack.c.bf16 %v44_v27, %v43_v26  ;;  %v45_v29 = vld [vmem:[%s9661_s1 + $0x90] sm:$0xff]  ;;  %v46_v30 = vld [vmem:[%s9661_s1 + $0x98] sm:$0xff]  ;;  %v47_v32 = vld [vmem:[%s9661_s1 + $0xa0] sm:$0xff]  ;;  %s7674_s6 = smov 120   ;;  %s7676_s7 = smov 80   ;;  %vm5688_vm7 = vcmask 1040384  }
  0x12   :  { %v6988_v31 = vpack.c.bf16 %v46_v30, %v45_v29  ;;  %v48_v33 = vld [vmem:[%s9661_s1 + $0xa8] sm:$0xff]  ;;  %v49_v35 = vld [vmem:[%s9661_s1 + $0xb0] sm:$0xff]  ;;  %v50_v36 = vld [vmem:[%s9661_s1 + $0xb8] sm:$0xff]  ;;  %s7677_s8 = smov 72   ;;  %s7678_s9 = smov 112   ;;  %vm5692_vm8 = vcmask 254976  }
  0x13   :  { %v6991_v34 = vpack.c.bf16 %v48_v33, %v47_v32  ;;  %v6994_v37 = vpack.c.bf16 %v50_v36, %v49_v35  ;;  %v15_v38 = vld [vmem:[%s9660_s0] sm:$0xff]  ;;  %v18_v39 = vld [vmem:[%s9660_s0 + $0x18] sm:$0xff]  ;;  %v17_v40 = vld [vmem:[%s9660_s0 + $0x10] sm:$0xff]  ;;  %s7679_s10 = smov 104   ;;  %s7680_s11 = smov 48  }
  0x14   :  { %6974 = vmatpush1.bf16.msra.mxu0 %v6973_v16  ;;  %v20_v41 = vld [vmem:[%s9660_s0 + $0x28] sm:$0xff]  ;;  %v19_v42 = vld [vmem:[%s9660_s0 + $0x20] sm:$0xff]  ;;  %v22_v43 = vld [vmem:[%s9660_s0 + $0x38] sm:$0xff]  ;;  %s7681_s12 = smov 40   ;;  %s7682_s13 = smov 8  }
  0x15   :  { %6975 = vmatprep.subr.bf16.mxu0 %v7668_v3  ;;  %v21_v44 = vld [vmem:[%s9660_s0 + $0x30] sm:$0xff]  ;;  %v24_v45 = vld [vmem:[%s9660_s0 + $0x48] sm:$0xff]  ;;  %v23_v46 = vld [vmem:[%s9660_s0 + $0x40] sm:$0xff]  ;;  %s7683_s22 = smov 16   ;;  %s7684_s23 = smov 24  }
  0x16   :  { %v26_v47 = vld [vmem:[%s9660_s0 + $0x58] sm:$0xff]  ;;  %v25_v48 = vld [vmem:[%s9660_s0 + $0x50] sm:$0xff]  ;;  %v51_v49 = vld [vmem:[%s9662_s2 + $0x1] sm:$0xff]  ;;  %s7675_s0 = smov 56  }
  0x17   :  { %v52_v53 = vld [vmem:[%s9662_s2 + $0x9] sm:$0xff]  ;;  %v53_v58 = vld [vmem:[%s9662_s2 + $0x11] sm:$0xff]  ;;  %v54_v63 = vld [vmem:[%s9662_s2 + $0x19] sm:$0xff] }
  0x18   :  { %6977 = vmatpush1.bf16.msra.mxu0 %v6976_v19  ;;  %v55_v21 = vld [vmem:[%s9662_s2 + $0x21] sm:$0xff]  ;;  %vm7957_vm4 = vmpackc.low %vm405_vm3, %vm405_vm3 }
  0x19   :  { %6978 = vmatprep.subr.bf16.mxu0 %v7668_v3  ;;  %v274_v36 = vld [vmem:[%s9661_s1 + $0xc0] sm:$0xff] }
  0x1c   :  { %6980 = vmatpush1.bf16.msra.mxu0 %v6979_v22 }
  0x1d   :  { %6981 = vmatprep.subr.bf16.mxu0 %v7668_v3 }
  0x20   :  { %6983 = vmatpush1.bf16.msra.mxu0 %v6982_v25 }
  0x21   :  { %6984 = vmatprep.subr.bf16.mxu0 %v7668_v3 }
  0x24   :  { %6986 = vmatpush1.bf16.msra.mxu0 %v6985_v28  ;;  %v56_v28 = vld [vmem:[%s9662_s2 + $0x29] sm:$0xff] }
  0x25   :  { %6987 = vmatprep.subr.bf16.mxu0 %v7668_v3 }
  0x28   :  { %6989 = vmatpush1.bf16.msra.mxu0 %v6988_v31 }
  0x29   :  { %6990 = vmatprep.subr.bf16.mxu0 %v7668_v3 }
  0x2c   :  { %6992 = vmatpush1.bf16.msra.mxu0 %v6991_v34 }
  0x2d   :  { %6993 = vmatprep.subr.bf16.mxu0 %v7668_v3 }
  0x30   :  { %6995 = vmatpush1.bf16.msra.mxu0 %v6994_v37  ;;  %v275_v37 = vld [vmem:[%s9661_s1 + $0xc8] sm:$0xff] }
  0x31   :  { %7022 = vmatprep.subr.bf16.mxu0 %v7668_v3 }
  0x33   :  { %141 = vmatmul.mubr.f32.vlgmr.msra.gmra.mrb[0].mxu0 %v15_v38  ;;  %v6996_v38 = vpack.c.bf16 %v275_v37, %v274_v36 }
  0x34   :  { %5814 = vmatprep.mubr.msk.f32.mxu0 %vm57_vm0, %v18_v39  ;;  %v276_v39 = vld [vmem:[%s9661_s1 + $0xd0] sm:$0xff] }
  0x35   :  { %6997 = vmatprep.subr.bf16.mxu1 %v6996_v38 }
  0x36   :  { %6999 = vmatpush3.bf16.msra.mxu1 %v6996_v38 }
  0x37   :  { %146 = vmatmul.mubr.f32.gmra.mrb[2].mxu0 %v17_v40  ;;  %v277_v40 = vld [vmem:[%s9661_s1 + $0xd8] sm:$0xff] }
  0x38   :  { %5815 = vmatprep.mubr.msk.f32.mxu0 %vm57_vm0, %v20_v41  ;;  %v7000_v41 = vpack.c.bf16 %v277_v40, %v276_v39  ;;  %v7930_v39 = vld [vmem:[%s9662_s2 + $0x33] ss:$0 sm:$0xff] }
  0x3a   :  { %7001 = vmatprep.subr.bf16.mxu1 %v7000_v41 }
  0x3b   :  { %151 = vmatmul.mubr.f32.gmra.mrb[4].mxu0 %v19_v42  ;;  %7003 = vmatpush3.bf16.msra.mxu1 %v7000_v41 }
  0x3c   :  { %5816 = vmatprep.mubr.msk.f32.mxu0 %vm57_vm0, %v22_v43  ;;  %7004 = vmatprep.subr.bf16.mxu1 %v7668_v3 }
  0x3f   :  { %156 = vmatmul.mubr.f32.gmra.mrb[6].mxu0 %v21_v44 }
  0x40   :  { %5817 = vmatprep.mubr.msk.f32.mxu0 %vm57_vm0, %v24_v45 }
  0x43   :  { %161 = vmatmul.mubr.f32.gmra.mrb[8].mxu0 %v23_v46 }
  0x44   :  { %5818 = vmatprep.mubr.msk.f32.mxu0 %vm57_vm0, %v26_v47 }
  0x47   :  { %166 = vmatmul.mubr.f32.gmra.mrb[10].mxu0 %v25_v48 }
 0x106   :  { %v142_v50 = vpop.f32.mrb[0].mxu0 }
 0x107   :  { %v7836_v51 = vadd.f32 %v142_v50, %v51_v49  ;;  %v144_v52 = vpop.f32.mrb[1].mxu0 }
 0x109   :  { %v175_v54 = vsel %vm174_vm1, %v7836_v51, 0.0 }
 0x10a   :  { %v147_v55 = vpop.f32.mrb[2].mxu0  ;;  %176 = vadd.xlane.f32.xlu0 %v175_v54 }
 0x10b   :  { %v7843_v56 = vadd.f32 %v147_v55, %v52_v53  ;;  %v149_v57 = vpop.f32.mrb[3].mxu0 }
 0x10d   :  { %v178_v59 = vsel %vm174_vm1, %v7843_v56, 0.0 }
 0x10e   :  { %v152_v60 = vpop.f32.mrb[4].mxu0  ;;  %179 = vadd.xlane.f32.xlu0 %v178_v59 }
 0x10f   :  { %v7850_v61 = vadd.f32 %v152_v60, %v53_v58  ;;  %v154_v62 = vpop.f32.mrb[5].mxu0  ;;  %v5819_v60 = vld [vmem:[%s9662_s2 + $0x31] ss:$0 sm:$0xff] }
 0x111   :  { %v181_v0 = vsel %vm174_vm1, %v7850_v61, 0.0 }
 0x112   :  { %v157_v1 = vpop.f32.mrb[6].mxu0  ;;  %182 = vadd.xlane.f32.xlu1 %v181_v0 }
 0x113   :  { %v7857_v2 = vadd.f32 %v157_v1, %v54_v63  ;;  %v159_v4 = vpop.f32.mrb[7].mxu0 }
 0x114   :  { %v5820_v4 = vld [vmem:[%s9662_s2 + $0x32] ss:$0 sm:$0xff] }
 0x115   :  { %v184_v5 = vsel %vm174_vm1, %v7857_v2, 0.0 }
 0x116   :  { %185 = vadd.xlane.f32.xlu1 %v184_v5  ;;  %v162_v6 = vpop.f32.mrb[8].mxu0 }
 0x117   :  { %v164_v7 = vpop.f32.mrb[9].mxu0  ;;  %v7875_v26 = vadd.f32 %v162_v6, %v55_v21 }
 0x119   :  { %v187_v32 = vsel %vm174_vm1, %v7875_v26, 0.0 }
 0x11a   :  { %v167_v8 = vpop.f32.mrb[10].mxu0 }
 0x11b   :  { %v169_v9 = vpop.f32.mrb[11].mxu0  ;;  %v7886_v31 = vadd.f32 %v167_v8, %v56_v28 }
 0x11d   :  { %v190_v35 = vsel %vm174_vm1, %v7886_v31, 0.0 }
 0x197   :  { %v177_v10 = vpop.xlane.xlu0 %176 }
 0x198   :  { %v194_v11 = vmul.f32 0.03125, %v177_v10 }
 0x19a   :  { %v200_v12 = vsub.f32 %v7836_v51, %v194_v11 }
 0x19b   :  { %v180_v13 = vpop.xlane.xlu0 %179 }
 0x19c   :  { %v195_v14 = vmul.f32 0.03125, %v180_v13  ;;  %v206_v15 = vmul.f32 %v200_v12, %v200_v12 }
 0x19e   :  { %v7863_v16 = vsub.f32 %v7843_v56, %v195_v14  ;;  %v212_v17 = vsel %vm174_vm1, %v206_v15, 0.0 }
 0x19f   :  { %v183_v18 = vpop.xlane.xlu1 %182  ;;  %213 = vadd.xlane.f32.xlu0 %v212_v17 }
 0x1a0   :  { %v196_v19 = vmul.f32 0.03125, %v183_v18  ;;  %v207_v20 = vmul.f32 %v7863_v16, %v7863_v16 }
 0x1a2   :  { %v7872_v22 = vsub.f32 %v7850_v61, %v196_v19  ;;  %v215_v23 = vsel %vm174_vm1, %v207_v20, 0.0 }
 0x1a3   :  { %v186_v24 = vpop.xlane.xlu1 %185  ;;  %216 = vadd.xlane.f32.xlu1 %v215_v23 }
 0x1a4   :  { %v197_v25 = vmul.f32 0.03125, %v186_v24  ;;  %v208_v27 = vmul.f32 %v7872_v22, %v7872_v22 }
 0x1a6   :  { %v7883_v29 = vsub.f32 %v7857_v2, %v197_v25  ;;  %v218_v30 = vsel %vm174_vm1, %v208_v27, 0.0 }
 0x1a7   :  { %219 = vadd.xlane.f32.xlu0 %v218_v30 }
 0x1a8   :  { %v209_v33 = vmul.f32 %v7883_v29, %v7883_v29 }
 0x1aa   :  { %v221_v34 = vsel %vm174_vm1, %v209_v33, 0.0 }
 0x1ab   :  { %188 = vadd.xlane.f32.xlu0 %v187_v32  ;;  %222 = vadd.xlane.f32.xlu1 %v221_v34 }
 0x1af   :  { %191 = vadd.xlane.f32.xlu1 %v190_v35 }
 0x22c   :  { %v214_v42 = vpop.xlane.xlu0 %213 }
 0x22d   :  { %v230_v43 = vmul.f32 0.03125, %v214_v42 }
 0x22f   :  { %v236_v44 = vadd.f32 1e-06, %v230_v43 }
 0x230   :  { %v217_v45 = vpop.xlane.xlu1 %216 }
 0x231   :  { %7376 = vrsqrt.f32 %v236_v44  ;;  %v231_v46 = vmul.f32 0.03125, %v217_v45  ;;  %v7671_v45 = vmov 0.0  }
 0x232   :  { %6415 = vmatprep.mubr.msk.f32.mxu0 %vm7670_vm2, %v7671_v45 }
 0x233   :  { %v237_v47 = vadd.f32 1e-06, %v231_v46 }
 0x234   :  { %v220_v48 = vpop.xlane.xlu0 %219 }
 0x235   :  { %7378 = vrsqrt.f32 %v237_v47  ;;  %v232_v49 = vmul.f32 0.03125, %v220_v48 }
 0x237   :  { %v238_v50 = vadd.f32 1e-06, %v232_v49 }
 0x238   :  { %v223_v52 = vpop.xlane.xlu1 %222  ;;  %v189_v53 = vpop.xlane.xlu0 %188 }
 0x239   :  { %7380 = vrsqrt.f32 %v238_v50  ;;  %v233_v54 = vmul.f32 0.03125, %v223_v52  ;;  %v198_v55 = vmul.f32 0.03125, %v189_v53 }
 0x23b   :  { %v7377_v57 = vpop.eup %7376  ;;  %v239_v58 = vadd.f32 1e-06, %v233_v54  ;;  %v204_v59 = vsub.f32 %v7875_v26, %v198_v55 }
 0x23c   :  { %v192_v62 = vpop.xlane.xlu1 %191  ;;  %v248_v63 = vmul.f32 %v7377_v57, %v200_v12 }
 0x23d   :  { %7382 = vrsqrt.f32 %v239_v58  ;;  %v199_v0 = vmul.f32 0.03125, %v192_v62  ;;  %v210_v1 = vmul.f32 %v204_v59, %v204_v59 }
 0x23e   :  { %v258_v5 = vmul.f32 %v5819_v60, %v248_v63 }
 0x23f   :  { %v7379_v6 = vpop.eup %7378  ;;  %v205_v7 = vsub.f32 %v7886_v31, %v199_v0  ;;  %v224_v8 = vsel %vm174_vm1, %v210_v1, 0.0 }
 0x240   :  { %225 = vadd.xlane.f32.xlu0 %v224_v8  ;;  %v268_v9 = vadd.f32 %v5820_v4, %v258_v5  ;;  %v249_v10 = vmul.f32 %v7379_v6, %v7863_v16 }
 0x241   :  { %v211_v11 = vmul.f32 %v205_v7, %v205_v7 }
 0x242   :  { %6325 = vmatprep.mubr.msk.f32.mxu1 %vm174_vm1, %v268_v9  ;;  %v259_v12 = vmul.f32 %v5819_v60, %v249_v10 }
 0x243   :  { %v7381_v13 = vpop.eup %7380  ;;  %v227_v14 = vsel %vm174_vm1, %v211_v11, 0.0 }
 0x244   :  { %228 = vadd.xlane.f32.xlu1 %v227_v14  ;;  %v269_v15 = vadd.f32 %v5820_v4, %v259_v12  ;;  %v250_v17 = vmul.f32 %v7381_v13, %v7872_v22 }
 0x246   :  { %6326 = vmatmul.mubr.msk.f32.vlgmr.msra.gmra.mrb[0].mxu1 %vm174_vm1, %v269_v15  ;;  %v260_v18 = vmul.f32 %v5819_v60, %v250_v17 }
 0x247   :  { %v7383_v19 = vpop.eup %7382 }
 0x248   :  { %v270_v20 = vadd.f32 %v5820_v4, %v260_v18  ;;  %v251_v21 = vmul.f32 %v7383_v19, %v7883_v29 }
 0x24a   :  { %6328 = vmatprep.mubr.msk.f32.mxu1 %vm174_vm1, %v270_v20  ;;  %v261_v16 = vmul.f32 %v5819_v60, %v251_v21 }
 0x24c   :  { %v271_v23 = vadd.f32 %v5820_v4, %v261_v16 }
 0x24e   :  { %6329 = vmatmul.mubr.msk.f32.gmra.mrb[2].mxu1 %vm174_vm1, %v271_v23 }
 0x2cd   :  { %v226_v24 = vpop.xlane.xlu0 %225 }
 0x2ce   :  { %v234_v25 = vmul.f32 0.03125, %v226_v24 }
 0x2d0   :  { %v240_v27 = vadd.f32 1e-06, %v234_v25 }
 0x2d1   :  { %v229_v28 = vpop.xlane.xlu1 %228 }
 0x2d2   :  { %7384 = vrsqrt.f32 %v240_v27  ;;  %v235_v30 = vmul.f32 0.03125, %v229_v28 }
 0x2d4   :  { %v241_v22 = vadd.f32 1e-06, %v235_v30 }
 0x2d6   :  { %7386 = vrsqrt.f32 %v241_v22 }
 0x2dc   :  { %v7385_v32 = vpop.eup %7384 }
 0x2dd   :  { %v252_v33 = vmul.f32 %v7385_v32, %v204_v59 }
 0x2df   :  { %v262_v34 = vmul.f32 %v5819_v60, %v252_v33 }
 0x2e0   :  { %v7387_v35 = vpop.eup %7386 }
 0x2e1   :  { %v272_v36 = vadd.f32 %v5820_v4, %v262_v34  ;;  %v253_v29 = vmul.f32 %v7387_v35, %v205_v7 }
 0x2e3   :  { %6331 = vmatprep.mubr.msk.f32.mxu1 %vm174_vm1, %v272_v36  ;;  %v263_v37 = vmul.f32 %v5819_v60, %v253_v29  ;;  %v7985_v60 = vld [vmem:[%s9662_s2] ss:$0 sm:$0xff] }
 0x2e5   :  { %v273_v38 = vadd.f32 %v5820_v4, %v263_v37 }
 0x2e7   :  { %6332 = vmatmul.mubr.msk.f32.gmra.mrb[4].mxu1 %vm174_vm1, %v273_v38 }
 0x2e8   :  { %6340 = vmatprep.mubr.msk.f32.mxu1 %vm7670_vm2, %v7671_v45 }
 0x319   :  { %v6327_v40 = vpop.f32.mrb[0].mxu1 }
 0x31a   :  { %v7933_v41 = vadd.f32 %v6327_v40, %v7930_v39  ;;  %v367_v42 = vpop.f32.mrb[1].mxu1 }
 0x31b   :  { %v7936_v43 = vadd.f32 %v7930_v39, %v367_v42 }
 0x31d   :  { %v7940_v44 = vpack.i.bf16 %v7933_v41, %v7936_v43 }
 0x31f   :  { %7217 = vrot.lane.b32.xlu0 %v7940_v44, %s7669_s28 }
 0x321   :  { %v7948_v46 = vpop.f32.mrb[2].mxu1 }
 0x322   :  { %v377_v47 = vpop.f32.mrb[3].mxu1 }
 0x323   :  { %v7951_v48 = vadd.f32 %v7930_v39, %v377_v47 }
 0x325   :  { %403 = vrot.lane.b32.xlu1 %v7951_v48, %s7669_s28 }
 0x391   :  { %v7218_v49 = vpop.permute.xlu0 %7217 }
 0x392   :  { %v7220_v50 = vunpack.i.h.bf16 %v7218_v49  ;;  %v7219_v52 = vunpack.i.l.bf16 %v7218_v49 }
 0x394   :  { %v7005_v54 = vpack.c.bf16 %v7220_v50, %v7219_v52 }
 0x396   :  { %7007 = vmatpush3.bf16.xpose.msk.msra.mxu1 %vm7957_vm4, %v7005_v54 }
 0x397   :  { %6338 = vmatprep.subr.mxu1 %v7671_v45  ;;  %v404_v55 = vpop.permute.xlu1 %403 }
 0x39e   :  { %6339 = vmatpush3.xpose.msk.msra.mxu1 %vm405_vm3, %v404_v55 }
 0x39f   :  { %7008 = vmatprep.subr.bf16.mxu1 %v7668_v3 }
 0x3a1   :  { %6341 = vmatmul.mubr.msk.f32.vlgmr.msra.gmra.mrb[6].mxu1 %vm405_vm3, %v7936_v43 }
 0x3a2   :  { %6343 = vmatprep.mubr.msk.f32.mxu1 %vm7670_vm2, %v7671_v45 }
 0x3a5   :  { %6344 = vmatmul.mubr.msk.f32.gmra.mrb[8].mxu1 %vm405_vm3, %v7933_v41 }
 0x3a6   :  { %6346 = vmatprep.mubr.msk.f32.mxu1 %vm7670_vm2, %v7671_v45 }
 0x3a9   :  { %6347 = vmatmul.mubr.msk.f32.gmra.mrb[10].mxu1 %vm405_vm3, %v7951_v48 }
 0x3aa   :  { %6355 = vmatprep.mubr.msk.f32.mxu1 %vm7670_vm2, %v7671_v45 }
 0x3ba   :  { %v7978_v57 = vpop.f32.mrb[4].mxu1 }
 0x3bb   :  { %v7980_v58 = vpop.f32.mrb[5].mxu1 }
 0x474   :  { %v484_v59 = vpop.f32.mrb[6].mxu1 }
 0x475   :  { %v498_v62 = vmul.f32 0.35355338, %v484_v59  ;;  %v6342_v63 = vpop.f32.mrb[7].mxu1 }
 0x477   :  { %v505_v0 = vadd.f32 %v7985_v60, %v498_v62 }
 0x478   :  { %v489_v1 = vpop.f32.mrb[8].mxu1 }
 0x479   :  { %v499_v4 = vmul.f32 0.35355338, %v489_v1  ;;  %v6345_v5 = vpop.f32.mrb[9].mxu1  ;;  %v509_v6 = vsel %vm508_vm5, %v505_v0, -inf }
 0x47a   :  { %510 = vmax.xlane.f32.xlu1 %v509_v6 }
 0x47b   :  { %v506_v7 = vadd.f32 %v7985_v60, %v499_v4 }
 0x47c   :  { %v494_v8 = vpop.f32.mrb[10].mxu1 }
 0x47d   :  { %v500_v9 = vmul.f32 0.35355338, %v494_v8  ;;  %v6348_v10 = vpop.f32.mrb[11].mxu1  ;;  %v512_v11 = vsel %vm508_vm5, %v506_v7, -inf }
 0x47e   :  { %513 = vmax.xlane.f32.xlu0 %v512_v11 }
 0x47f   :  { %v507_v12 = vadd.f32 %v7985_v60, %v500_v9 }
 0x481   :  { %v515_v13 = vsel %vm508_vm5, %v507_v12, -inf }
 0x482   :  { %516 = vmax.xlane.f32.xlu0 %v515_v13 }
 0x507   :  { %v511_v14 = vpop.xlane.xlu1 %510 }
 0x508   :  { %v518_v15 = vsub.f32 %v505_v0, %v511_v14 }
 0x50a   :  { %v521_v17 = vmul.f32 1.442695, %v518_v15 }
 0x50b   :  { %v514_v18 = vpop.xlane.xlu0 %513 }
 0x50c   :  { %7388 = vpow2.f32 %v521_v17  ;;  %v519_v19 = vsub.f32 %v506_v7, %v514_v18 }
 0x50e   :  { %v523_v20 = vmul.f32 1.442695, %v519_v19 }
 0x50f   :  { %v517_v25 = vpop.xlane.xlu0 %516 }
 0x510   :  { %7390 = vpow2.f32 %v523_v20  ;;  %v520_v27 = vsub.f32 %v507_v12, %v517_v25 }
 0x512   :  { %v525_v28 = vmul.f32 1.442695, %v520_v27 }
 0x514   :  { %7392 = vpow2.f32 %v525_v28 }
 0x516   :  { %v7389_v21 = vpop.eup %7388 }
 0x517   :  { %v527_v16 = vsel %vm508_vm5, %v7389_v21, 0.0 }
 0x518   :  { %528 = vadd.xlane.f32.xlu1 %v527_v16 }
 0x51a   :  { %v7391_v23 = vpop.eup %7390 }
 0x51b   :  { %v530_v24 = vsel %vm508_vm5, %v7391_v23, 0.0 }
 0x51c   :  { %531 = vadd.xlane.f32.xlu0 %v530_v24 }
 0x51e   :  { %v7393_v30 = vpop.eup %7392 }
 0x51f   :  { %v533_v22 = vsel %vm508_vm5, %v7393_v30, 0.0 }
 0x529   :  { %546 = vrot.lane.b32.xlu1 %v7951_v48, %s7672_s4 }
 0x52d   :  { %7227 = vrot.lane.b32.xlu1 %v7940_v44, %s7673_s5 }
 0x531   :  { %650 = vrot.lane.b32.xlu1 %v7951_v48, %s7673_s5 }
 0x532   :  { %7222 = vrot.lane.b32.xlu0 %v7940_v44, %s7672_s4 }
 0x536   :  { %640 = vrot.lane.b32.xlu0 %v7936_v43, %s7674_s6 }
 0x53a   :  { %644 = vrot.lane.b32.xlu0 %v7951_v48, %s7674_s6 }
 0x555   :  { %534 = vadd.xlane.f32.xlu1 %v533_v22 }
 0x566   :  { %642 = vrot.lane.b32.xlu1 %v7933_v41, %s7674_s6 }
 0x5a5   :  { %v529_v32 = vpop.xlane.xlu1 %528 }
 0x5a6   :  { %7394 = vrcp.f32 %v529_v32 }
 0x5a9   :  { %v532_v33 = vpop.xlane.xlu0 %531  ;;  %v547_v35 = vpop.permute.xlu1 %546 }
 0x5aa   :  { %7396 = vrcp.f32 %v532_v33 }
 0x5ad   :  { %v7223_v34 = vpop.permute.xlu0 %7222  ;;  %v7228_v40 = vpop.permute.xlu1 %7227 }
 0x5ae   :  { %v7225_v36 = vunpack.i.h.bf16 %v7223_v34  ;;  %v7224_v29 = vunpack.i.l.bf16 %v7223_v34  ;;  %v7230_v49 = vunpack.i.h.bf16 %v7228_v40  ;;  %v7229_v50 = vunpack.i.l.bf16 %v7228_v40 }
 0x5b0   :  { %v7009_v37 = vpack.c.bf16 %v7225_v36, %v7224_v29  ;;  %v7395_v38 = vpop.eup %7394  ;;  %v7012_v54 = vpack.c.bf16 %v7230_v49, %v7229_v50 }
 0x5b1   :  { %v537_v42 = vmul.f32 %v7395_v38, %v7389_v21  ;;  %v651_v55 = vpop.permute.xlu1 %650  ;;  %v641_v0 = vpop.permute.xlu0 %640 }
 0x5b2   :  { %7010 = vmatpush3.bf16.msra.mxu1 %v7009_v37 }
 0x5b3   :  { %6353 = vmatprep.subr.mxu1 %v7671_v45 }
 0x5b4   :  { %v7397_v47 = vpop.eup %7396 }
 0x5b5   :  { %v539_v52 = vmul.f32 %v7397_v47, %v7391_v23  ;;  %v645_v4 = vpop.permute.xlu0 %644 }
 0x5b6   :  { %6354 = vmatpush3.msra.mxu1 %v547_v35 }
 0x5b7   :  { %6356 = vmatmul.mubr.msk.f32.vlgmr.msra.gmra.mrb[12].mxu1 %vm508_vm5, %v537_v42  ;;  %7011 = vmatprep.subr.bf16.mxu1 %v7668_v3 }
 0x5b8   :  { %6358 = vmatprep.mubr.msk.f32.mxu1 %vm7670_vm2, %v7671_v45 }
 0x5bb   :  { %6359 = vmatmul.mubr.msk.f32.gmra.mrb[14].mxu1 %vm508_vm5, %v539_v52  ;;  %v8074_v52 = vadd.f32 %v7930_v39, %v7980_v58 }
 0x5bc   :  { %6361 = vmatprep.mubr.msk.f32.mxu1 %vm7670_vm2, %v7671_v45 }
 0x5bd   :  { %7014 = vmatpush3.bf16.xpose.msk.msra.mxu1 %vm7957_vm4, %v7012_v54 }
 0x5be   :  { %6368 = vmatprep.subr.mxu1 %v7671_v45 }
 0x5c5   :  { %6369 = vmatpush3.xpose.msk.msra.mxu1 %vm405_vm3, %v651_v55  ;;  %v8078_v55 = vadd.f32 %v7948_v46, %v7930_v39  ;;  %v8096_v46 = vadd.f32 %v7978_v57, %v7930_v39 }
 0x5c6   :  { %7015 = vmatprep.subr.bf16.mxu1 %v7668_v3 }
 0x5e2   :  { %v535_v59 = vpop.xlane.xlu1 %534 }
 0x5e3   :  { %7398 = vrcp.f32 %v535_v59  ;;  %v8084_v59 = vpack.i.bf16 %v8074_v52, %v8078_v55 }
 0x5e6   :  { %v643_v1 = vpop.permute.xlu1 %642 }
 0x5ed   :  { %v7399_v62 = vpop.eup %7398 }
 0x5ee   :  { %v541_v63 = vmul.f32 %v7399_v62, %v7393_v30 }
 0x5f0   :  { %6362 = vmatmul.mubr.msk.f32.gmra.mrb[16].mxu1 %vm508_vm5, %v541_v63 }
 0x5f1   :  { %6370 = vmatprep.mubr.msk.f32.mxu1 %vm7670_vm2, %v7671_v45 }
 0x5f4   :  { %6371 = vmatmul.mubr.msk.f32.vlgmr.msra.gmra.mrb[18].mxu1 %vm405_vm3, %v641_v0 }
 0x5f5   :  { %6373 = vmatprep.mubr.msk.f32.mxu1 %vm7670_vm2, %v7671_v45 }
 0x5f8   :  { %6374 = vmatmul.mubr.msk.f32.gmra.mrb[20].mxu1 %vm405_vm3, %v643_v1 }
 0x5f9   :  { %6376 = vmatprep.mubr.msk.f32.mxu1 %vm7670_vm2, %v7671_v45 }
 0x5fc   :  { %6377 = vmatmul.mubr.msk.f32.gmra.mrb[22].mxu1 %vm405_vm3, %v645_v4 }
 0x5fd   :  { %6385 = vmatprep.mubr.msk.f32.mxu1 %vm7670_vm2, %v7671_v45 }
 0x68a   :  { %v8035_v5 = vpop.f32.mrb[12].mxu1 }
 0x68b   :  { %v6357_v6 = vpop.f32.mrb[13].mxu1 }
 0x68e   :  { %v8037_v7 = vpop.f32.mrb[14].mxu1 }
 0x68f   :  { %v6360_v8 = vpop.f32.mrb[15].mxu1 }
 0x6c3   :  { %v8039_v9 = vpop.f32.mrb[16].mxu1 }
 0x6c4   :  { %v6363_v10 = vpop.f32.mrb[17].mxu1 }
 0x6c7   :  { %v730_v11 = vpop.f32.mrb[18].mxu1 }
 0x6c8   :  { %v744_v12 = vmul.f32 0.35355338, %v730_v11  ;;  %v6372_v13 = vpop.f32.mrb[19].mxu1 }
 0x6ca   :  { %v747_v14 = vadd.f32 %v7985_v60, %v744_v12 }
 0x6cb   :  { %v735_v15 = vpop.f32.mrb[20].mxu1 }
 0x6cc   :  { %v745_v17 = vmul.f32 0.35355338, %v735_v15  ;;  %v6375_v18 = vpop.f32.mrb[21].mxu1  ;;  %v750_v19 = vsel %vm508_vm5, %v747_v14, -inf }
 0x6cd   :  { %751 = vmax.xlane.f32.xlu1 %v750_v19 }
 0x6ce   :  { %v748_v20 = vadd.f32 %v7985_v60, %v745_v17 }
 0x6cf   :  { %v740_v21 = vpop.f32.mrb[22].mxu1 }
 0x6d0   :  { %v746_v16 = vmul.f32 0.35355338, %v740_v21  ;;  %v6378_v23 = vpop.f32.mrb[23].mxu1  ;;  %v753_v24 = vsel %vm508_vm5, %v748_v20, -inf }
 0x6d1   :  { %754 = vmax.xlane.f32.xlu0 %v753_v24 }
 0x6d2   :  { %v749_v25 = vadd.f32 %v7985_v60, %v746_v16 }
 0x6d4   :  { %v756_v27 = vsel %vm508_vm5, %v749_v25, -inf }
 0x6d5   :  { %757 = vmax.xlane.f32.xlu0 %v756_v27 }
 0x6de   :  { %7232 = vrot.lane.b32.xlu1 %v7940_v44, %s7675_s0 }
 0x6e2   :  { %7237 = vrot.lane.b32.xlu1 %v7940_v44, %s7676_s7 }
 0x6e6   :  { %891 = vrot.lane.b32.xlu1 %v7951_v48, %s7676_s7 }
 0x75a   :  { %v752_v28 = vpop.xlane.xlu1 %751 }
 0x75b   :  { %v759_v30 = vsub.f32 %v747_v14, %v752_v28 }
 0x75d   :  { %v762_v22 = vmul.f32 1.442695, %v759_v30 }
 0x75e   :  { %v7233_v32 = vpop.permute.xlu1 %7232  ;;  %v755_v33 = vpop.xlane.xlu0 %754 }
 0x75f   :  { %7400 = vpow2.f32 %v762_v22  ;;  %v7235_v34 = vunpack.i.h.bf16 %v7233_v32  ;;  %v7234_v35 = vunpack.i.l.bf16 %v7233_v32  ;;  %v760_v36 = vsub.f32 %v748_v20, %v755_v33 }
 0x761   :  { %v7016_v29 = vpack.c.bf16 %v7235_v34, %v7234_v35  ;;  %v764_v37 = vmul.f32 1.442695, %v760_v36 }
 0x762   :  { %v758_v49 = vpop.xlane.xlu0 %757  ;;  %v7238_v39 = vpop.permute.xlu1 %7237 }
 0x763   :  { %7402 = vpow2.f32 %v764_v37  ;;  %7017 = vmatpush3.bf16.msra.mxu1 %v7016_v29  ;;  %v761_v50 = vsub.f32 %v749_v25, %v758_v49  ;;  %v7240_v1 = vunpack.i.h.bf16 %v7238_v39  ;;  %v7239_v4 = vunpack.i.l.bf16 %v7238_v39 }
 0x764   :  { %6383 = vmatprep.subr.mxu1 %v7671_v45 }
 0x765   :  { %v766_v54 = vmul.f32 1.442695, %v761_v50  ;;  %v7019_v8 = vpack.c.bf16 %v7240_v1, %v7239_v4 }
 0x767   :  { %7404 = vpow2.f32 %v766_v54 }
 0x769   :  { %v8054_v38 = vpop.eup %7400 }
 0x76a   :  { %v768_v40 = vsel %vm508_vm5, %v8054_v38, 0.0 }
 0x76b   :  { %769 = vadd.xlane.f32.xlu0 %v768_v40 }
 0x76d   :  { %v8058_v42 = vpop.eup %7402 }
 0x76e   :  { %v771_v47 = vsel %vm508_vm5, %v8058_v42, 0.0 }
 0x76f   :  { %772 = vadd.xlane.f32.xlu1 %v771_v47 }
 0x771   :  { %v8090_v58 = vpop.eup %7404 }
 0x772   :  { %v774_v62 = vsel %vm508_vm5, %v8090_v58, 0.0 }
 0x780   :  { %7242 = vrot.lane.b32.xlu1 %v7940_v44, %s7677_s8 }
 0x781   :  { %787 = vrot.lane.b32.xlu0 %v7951_v48, %s7675_s0 }
 0x784   :  { %883 = vrot.lane.b32.xlu1 %v7933_v41, %s7678_s9 }
 0x788   :  { %1132 = vrot.lane.b32.xlu1 %v7951_v48, %s7677_s8 }
 0x78c   :  { %1122 = vrot.lane.b32.xlu1 %v7936_v43, %s7679_s10 }
 0x790   :  { %1126 = vrot.lane.b32.xlu1 %v7951_v48, %s7679_s10 }
 0x794   :  { %7252 = vrot.lane.b32.xlu1 %v8084_v59, %s7673_s5 }
 0x798   :  { %7257 = vrot.lane.b32.xlu1 %v8084_v59, %s7676_s7 }
 0x79c   :  { %1649 = vrot.lane.b32.xlu1 %v8074_v52, %s7674_s6 }
 0x7a0   :  { %1898 = vrot.lane.b32.xlu1 %v8096_v46, %s7676_s7  ;;  %775 = vadd.xlane.f32.xlu0 %v774_v62 }
 0x7a4   :  { %1888 = vrot.lane.b32.xlu1 %v8078_v55, %s7678_s9 }
 0x7a8   :  { %1892 = vrot.lane.b32.xlu1 %v8096_v46, %s7678_s9 }
 0x7ac   :  { %2129 = vrot.lane.b32.xlu1 %v8078_v55, %s7679_s10 }
 0x7b0   :  { %2133 = vrot.lane.b32.xlu1 %v8096_v46, %s7679_s10 }
 0x7b4   :  { %7267 = vrot.lane.b32.xlu1 %v7940_v44, %s7680_s11 }
 0x7b6   :  { %881 = vrot.lane.b32.xlu0 %v7936_v43, %s7678_s9 }
 0x7b8   :  { %1269 = vrot.lane.b32.xlu1 %v7951_v48, %s7681_s12 }
 0x7ba   :  { %885 = vrot.lane.b32.xlu0 %v7951_v48, %s7678_s9 }
 0x7be   :  { %7247 = vrot.lane.b32.xlu0 %v8084_v59, %s7669_s28 }
 0x7c2   :  { %1124 = vrot.lane.b32.xlu0 %v7933_v41, %s7679_s10  ;;  %v892_v41 = vpop.permute.xlu1 %891 }
 0x7c6   :  { %1416 = vrot.lane.b32.xlu0 %v8096_v46, %s7669_s28 }
 0x7ca   :  { %1657 = vrot.lane.b32.xlu0 %v8096_v46, %s7673_s5 }
 0x7ce   :  { %1647 = vrot.lane.b32.xlu0 %v8078_v55, %s7674_s6 }
 0x7d2   :  { %1651 = vrot.lane.b32.xlu0 %v8096_v46, %s7674_s6 }
 0x7d6   :  { %7262 = vrot.lane.b32.xlu0 %v8084_v59, %s7677_s8 }
 0x7da   :  { %1890 = vrot.lane.b32.xlu0 %v8074_v52, %s7678_s9 }
 0x7de   :  { %2139 = vrot.lane.b32.xlu0 %v8096_v46, %s7677_s8 }
 0x7e2   :  { %2131 = vrot.lane.b32.xlu0 %v8074_v52, %s7679_s10 }
 0x7e6   :  { %1028 = vrot.lane.b32.xlu0 %v7951_v48, %s7680_s11 }
 0x7ea   :  { %7272 = vrot.lane.b32.xlu0 %v7940_v44, %s7681_s12 }
 0x7ee   :  { %7277 = vrot.lane.b32.xlu0 %v8084_v59, %s7672_s4 }
 0x7f8   :  { %v770_v43 = vpop.xlane.xlu0 %769 }
 0x7f9   :  { %7406 = vrcp.f32 %v770_v43 }
 0x7fc   :  { %v773_v57 = vpop.xlane.xlu1 %772  ;;  %v788_v63 = vpop.permute.xlu0 %787 }
 0x7fd   :  { %7408 = vrcp.f32 %v773_v57  ;;  %6384 = vmatpush3.msra.mxu1 %v788_v63 }
 0x7fe   :  { %7018 = vmatprep.subr.bf16.mxu1 %v7668_v3 }
 0x800   :  { %v7243_v0 = vpop.permute.xlu1 %7242 }
 0x801   :  { %v7245_v36 = vunpack.i.h.bf16 %v7243_v0  ;;  %v7244_v29 = vunpack.i.l.bf16 %v7243_v0 }
 0x803   :  { %v7407_v48 = vpop.eup %7406 }
 0x804   :  { %v778_v6 = vmul.f32 %v7407_v48, %v8054_v38  ;;  %v884_v44 = vpop.permute.xlu1 %883  ;;  %v7026_v38 = vpack.c.bf16 %v7245_v36, %v7244_v29 }
 0x806   :  { %6386 = vmatmul.mubr.msk.f32.vlgmr.msra.gmra.mrb[24].mxu1 %vm508_vm5, %v778_v6 }
 0x807   :  { %v7409_v10 = vpop.eup %7408  ;;  %7021 = vmatpush3.bf16.xpose.msk.msra.mxu1 %vm7957_vm4, %v7019_v8  ;;  %6388 = vmatprep.mubr.msk.f32.mxu1 %vm7670_vm2, %v7671_v45 }
 0x808   :  { %v1133_v11 = vpop.permute.xlu1 %1132  ;;  %v780_v12 = vmul.f32 %v7409_v10, %v8058_v42  ;;  %6398 = vmatprep.subr.mxu1 %v7671_v45 }
 0x80a   :  { %6389 = vmatmul.mubr.msk.f32.gmra.mrb[26].mxu1 %vm508_vm5, %v780_v12 }
 0x80b   :  { %6391 = vmatprep.mubr.msk.f32.mxu1 %vm7670_vm2, %v7671_v45 }
 0x80c   :  { %v1123_v13 = vpop.permute.xlu1 %1122 }
 0x80f   :  { %6399 = vmatpush3.xpose.msk.msra.mxu1 %vm405_vm3, %v892_v41 }
 0x810   :  { %v1127_v14 = vpop.permute.xlu1 %1126  ;;  %7025 = vmatprep.subr.bf16.mxu1 %v7668_v3 }
 0x814   :  { %v7253_v15 = vpop.permute.xlu1 %7252 }
 0x815   :  { %v7255_v39 = vunpack.i.h.bf16 %v7253_v15  ;;  %v7254_v41 = vunpack.i.l.bf16 %v7253_v15 }
 0x817   :  { %v7040_v57 = vpack.c.bf16 %v7255_v39, %v7254_v41 }
 0x818   :  { %v8158_v17 = vpop.permute.xlu1 %7257 }
 0x819   :  { %v7260_v1 = vunpack.i.h.bf16 %v8158_v17 }
 0x81c   :  { %v8160_v18 = vpop.permute.xlu1 %1649 }
 0x820   :  { %v8162_v19 = vpop.permute.xlu1 %1898 }
 0x824   :  { %v8164_v20 = vpop.permute.xlu1 %1888 }
 0x828   :  { %v8166_v21 = vpop.permute.xlu1 %1892 }
 0x82c   :  { %v8168_v16 = vpop.permute.xlu1 %2129 }
 0x82d   :  { %v776_v23 = vpop.xlane.xlu0 %775 }
 0x82e   :  { %7410 = vrcp.f32 %v776_v23 }
 0x830   :  { %v8170_v24 = vpop.permute.xlu1 %2133 }
 0x831   :  { %v882_v25 = vpop.permute.xlu0 %881 }
 0x834   :  { %v7268_v27 = vpop.permute.xlu1 %7267 }
 0x835   :  { %v7270_v28 = vunpack.i.h.bf16 %v7268_v27  ;;  %v7269_v30 = vunpack.i.l.bf16 %v7268_v27  ;;  %v886_v22 = vpop.permute.xlu0 %885 }
 0x837   :  { %v7023_v32 = vpack.c.bf16 %v7270_v28, %v7269_v30 }
 0x838   :  { %v7411_v33 = vpop.eup %7410 }
 0x839   :  { %7024 = vmatpush3.bf16.msra.mxu0 %v7023_v32  ;;  %v7248_v34 = vpop.permute.xlu0 %7247  ;;  %v782_v35 = vmul.f32 %v7411_v33, %v8090_v58 }
 0x83a   :  { %6413 = vmatprep.subr.mxu0 %v7671_v45  ;;  %v7250_v47 = vunpack.i.h.bf16 %v7248_v34  ;;  %v7249_v49 = vunpack.i.l.bf16 %v7248_v34 }
 0x83b   :  { %6392 = vmatmul.mubr.msk.f32.gmra.mrb[28].mxu1 %vm508_vm5, %v782_v35 }
 0x83c   :  { %6400 = vmatprep.mubr.msk.f32.mxu1 %vm7670_vm2, %v7671_v45  ;;  %v7033_v54 = vpack.c.bf16 %v7250_v47, %v7249_v49 }
 0x83d   :  { %v1125_v37 = vpop.permute.xlu0 %1124 }
 0x83f   :  { %6401 = vmatmul.mubr.msk.f32.vlgmr.msra.gmra.mrb[30].mxu1 %vm405_vm3, %v882_v25 }
 0x840   :  { %7028 = vmatpush3.bf16.xpose.msk.msra.mxu1 %vm7957_vm4, %v7026_v38  ;;  %6403 = vmatprep.mubr.msk.f32.mxu1 %vm7670_vm2, %v7671_v45 }
 0x841   :  { %v1417_v40 = vpop.permute.xlu0 %1416  ;;  %6428 = vmatprep.subr.mxu1 %v7671_v45 }
 0x843   :  { %6404 = vmatmul.mubr.msk.f32.gmra.mrb[32].mxu1 %vm405_vm3, %v884_v44 }
 0x844   :  { %6406 = vmatprep.mubr.msk.f32.mxu1 %vm7670_vm2, %v7671_v45 }
 0x845   :  { %v1658_v42 = vpop.permute.xlu0 %1657 }
 0x847   :  { %6407 = vmatmul.mubr.msk.f32.gmra.mrb[34].mxu1 %vm405_vm3, %v886_v22 }
 0x848   :  { %6429 = vmatpush3.xpose.msk.msra.mxu1 %vm405_vm3, %v1133_v11  ;;  %6430 = vmatprep.mubr.msk.f32.mxu1 %vm7670_vm2, %v7671_v45 }
 0x849   :  { %v1648_v50 = vpop.permute.xlu0 %1647  ;;  %7032 = vmatprep.subr.bf16.mxu1 %v7668_v3 }
 0x84b   :  { %6431 = vmatmul.mubr.msk.f32.vlgmr.msra.gmra.mrb[36].mxu1 %vm405_vm3, %v1123_v13 }
 0x84c   :  { %7035 = vmatpush3.bf16.xpose.msk.msra.mxu1 %vm7957_vm4, %v7033_v54  ;;  %6433 = vmatprep.mubr.msk.f32.mxu1 %vm7670_vm2, %v7671_v45 }
 0x84d   :  { %v1652_v58 = vpop.permute.xlu0 %1651  ;;  %6458 = vmatprep.subr.mxu1 %v7671_v45 }
 0x84f   :  { %6434 = vmatmul.mubr.msk.f32.gmra.mrb[38].mxu1 %vm405_vm3, %v1125_v37 }
 0x850   :  { %6436 = vmatprep.mubr.msk.f32.mxu1 %vm7670_vm2, %v7671_v45 }
 0x851   :  { %v7263_v62 = vpop.permute.xlu0 %7262 }
 0x852   :  { %v7265_v48 = vunpack.i.h.bf16 %v7263_v62  ;;  %v7264_v6 = vunpack.i.l.bf16 %v7263_v62 }
 0x853   :  { %6437 = vmatmul.mubr.msk.f32.gmra.mrb[40].mxu1 %vm405_vm3, %v1127_v14 }
 0x854   :  { %6459 = vmatpush3.xpose.msk.msra.mxu1 %vm405_vm3, %v1417_v40  ;;  %6460 = vmatprep.mubr.msk.f32.mxu1 %vm7670_vm2, %v7671_v45  ;;  %v7054_v44 = vpack.c.bf16 %v7265_v48, %v7264_v6 }
 0x855   :  { %v1891_v43 = vpop.permute.xlu0 %1890  ;;  %7039 = vmatprep.subr.bf16.mxu1 %v7668_v3 }
 0x857   :  { %6461 = vmatmul.mubr.msk.f32.vlgmr.msra.gmra.mrb[42].mxu1 %vm405_vm3, %v8078_v55  ;;  %v7259_v55 = vunpack.i.l.bf16 %v8158_v17 }
 0x858   :  { %7042 = vmatpush3.bf16.xpose.msk.msra.mxu1 %vm7957_vm4, %v7040_v57  ;;  %6463 = vmatprep.mubr.msk.f32.mxu1 %vm7670_vm2, %v7671_v45 }
 0x859   :  { %v2140_v63 = vpop.permute.xlu0 %2139  ;;  %6488 = vmatprep.subr.mxu1 %v7671_v45 }
 0x85b   :  { %6464 = vmatmul.mubr.msk.f32.gmra.mrb[44].mxu1 %vm405_vm3, %v8074_v52  ;;  %v7047_v52 = vpack.c.bf16 %v7260_v1, %v7259_v55 }
 0x85c   :  { %6466 = vmatprep.mubr.msk.f32.mxu1 %vm7670_vm2, %v7671_v45 }
 0x85d   :  { %v2132_v0 = vpop.permute.xlu0 %2131 }
 0x85f   :  { %6467 = vmatmul.mubr.msk.f32.gmra.mrb[46].mxu1 %vm405_vm3, %v8096_v46 }
 0x860   :  { %6489 = vmatpush3.xpose.msk.msra.mxu1 %vm405_vm3, %v1658_v42  ;;  %6490 = vmatprep.mubr.msk.f32.mxu1 %vm7670_vm2, %v7671_v45 }
 0x861   :  { %v1029_v4 = vpop.permute.xlu0 %1028  ;;  %7046 = vmatprep.subr.bf16.mxu1 %v7668_v3 }
 0x862   :  { %6414 = vmatpush3.msra.mxu0 %v1029_v4 }
 0x863   :  { %6491 = vmatmul.mubr.msk.f32.vlgmr.msra.gmra.mrb[48].mxu1 %vm405_vm3, %v1648_v50  ;;  %7029 = vmatprep.subr.bf16.mxu0 %v7668_v3 }
 0x864   :  { %7049 = vmatpush3.bf16.xpose.msk.msra.mxu1 %vm7957_vm4, %v7047_v52  ;;  %6493 = vmatprep.mubr.msk.f32.mxu1 %vm7670_vm2, %v7671_v45 }
 0x865   :  { %6518 = vmatprep.subr.mxu1 %v7671_v45 }
 0x867   :  { %6494 = vmatmul.mubr.msk.f32.gmra.mrb[50].mxu1 %vm405_vm3, %v8160_v18 }
 0x868   :  { %6496 = vmatprep.mubr.msk.f32.mxu1 %vm7670_vm2, %v7671_v45 }
 0x86b   :  { %6497 = vmatmul.mubr.msk.f32.gmra.mrb[52].mxu1 %vm405_vm3, %v1652_v58 }
 0x86c   :  { %6519 = vmatpush3.xpose.msk.msra.mxu1 %vm405_vm3, %v8162_v19  ;;  %6520 = vmatprep.mubr.msk.f32.mxu1 %vm7670_vm2, %v7671_v45 }
 0x86d   :  { %7053 = vmatprep.subr.bf16.mxu1 %v7668_v3 }
 0x86f   :  { %6521 = vmatmul.mubr.msk.f32.vlgmr.msra.gmra.mrb[54].mxu1 %vm405_vm3, %v8164_v20 }
 0x870   :  { %7056 = vmatpush3.bf16.xpose.msk.msra.mxu1 %vm7957_vm4, %v7054_v44  ;;  %6523 = vmatprep.mubr.msk.f32.mxu1 %vm7670_vm2, %v7671_v45 }
 0x871   :  { %6548 = vmatprep.subr.mxu1 %v7671_v45 }
 0x873   :  { %6524 = vmatmul.mubr.msk.f32.gmra.mrb[56].mxu1 %vm405_vm3, %v1891_v43 }
 0x874   :  { %6526 = vmatprep.mubr.msk.f32.mxu1 %vm7670_vm2, %v7671_v45 }
 0x877   :  { %6527 = vmatmul.mubr.msk.f32.gmra.mrb[58].mxu1 %vm405_vm3, %v8166_v21 }
 0x878   :  { %6549 = vmatpush3.xpose.msk.msra.mxu1 %vm405_vm3, %v2140_v63  ;;  %6550 = vmatprep.mubr.msk.f32.mxu1 %vm7670_vm2, %v7671_v45 }
 0x879   :  { %7194 = vmatprep.subr.bf16.mxu1 %v7668_v3 }
 0x87b   :  { %6551 = vmatmul.mubr.msk.f32.vlgmr.msra.gmra.mrb[60].mxu1 %vm405_vm3, %v8168_v16 }
 0x87c   :  { %6553 = vmatprep.mubr.msk.f32.mxu1 %vm7670_vm2, %v7671_v45 }
 0x87f   :  { %6554 = vmatmul.mubr.msk.f32.gmra.mrb[62].mxu1 %vm405_vm3, %v2132_v0 }
 0x880   :  { %6556 = vmatprep.mubr.msk.f32.mxu1 %vm7670_vm2, %v7671_v45 }
 0x883   :  { %6557 = vmatmul.mubr.msk.f32.gmra.mrb[64].mxu1 %vm405_vm3, %v8170_v24 }
 0x884   :  { %6571 = vmatprep.mubr.msk.f32.mxu1 %vm7670_vm2, %v7671_v45 }
 0x8d9   :  { %v8268_v8 = vpop.f32.mrb[24].mxu1 }
 0x8da   :  { %v6387_v10 = vpop.f32.mrb[25].mxu1 }
 0x8dd   :  { %v8270_v11 = vpop.f32.mrb[26].mxu1 }
 0x8de   :  { %v6390_v12 = vpop.f32.mrb[27].mxu1 }
 0x90e   :  { %v8272_v13 = vpop.f32.mrb[28].mxu1 }
 0x90f   :  { %v6393_v14 = vpop.f32.mrb[29].mxu1 }
 0x912   :  { %v971_v15 = vpop.f32.mrb[30].mxu1 }
 0x913   :  { %v985_v17 = vmul.f32 0.35355338, %v971_v15  ;;  %v6402_v18 = vpop.f32.mrb[31].mxu1 }
 0x915   :  { %v8275_v19 = vadd.f32 %v7985_v60, %v985_v17 }
 0x916   :  { %v976_v20 = vpop.f32.mrb[32].mxu1 }
 0x917   :  { %v986_v21 = vmul.f32 0.35355338, %v976_v20  ;;  %v6405_v16 = vpop.f32.mrb[33].mxu1  ;;  %v991_v23 = vsel %vm508_vm5, %v8275_v19, -inf }
 0x918   :  { %992 = vmax.xlane.f32.xlu0 %v991_v23 }
 0x919   :  { %v8280_v24 = vadd.f32 %v7985_v60, %v986_v21 }
 0x91a   :  { %v981_v25 = vpop.f32.mrb[34].mxu1 }
 0x91b   :  { %v987_v27 = vmul.f32 0.35355338, %v981_v25  ;;  %v6408_v28 = vpop.f32.mrb[35].mxu1  ;;  %v994_v30 = vsel %vm508_vm5, %v8280_v24, -inf }
 0x91c   :  { %995 = vmax.xlane.f32.xlu1 %v994_v30 }
 0x91d   :  { %v8285_v22 = vadd.f32 %v7985_v60, %v987_v27 }
 0x91e   :  { %v1212_v32 = vpop.f32.mrb[36].mxu1 }
 0x91f   :  { %v1226_v33 = vmul.f32 0.35355338, %v1212_v32  ;;  %v6432_v34 = vpop.f32.mrb[37].mxu1  ;;  %v997_v35 = vsel %vm508_vm5, %v8285_v22, -inf }
 0x920   :  { %998 = vmax.xlane.f32.xlu0 %v997_v35 }
 0x921   :  { %v8290_v36 = vadd.f32 %v7985_v60, %v1226_v33 }
 0x922   :  { %v1217_v29 = vpop.f32.mrb[38].mxu1 }
 0x923   :  { %v1227_v37 = vmul.f32 0.35355338, %v1217_v29  ;;  %v6435_v38 = vpop.f32.mrb[39].mxu1  ;;  %v1232_v40 = vsel %vm508_vm5, %v8290_v36, -inf }
 0x924   :  { %1233 = vmax.xlane.f32.xlu0 %v1232_v40 }
 0x925   :  { %v8295_v42 = vadd.f32 %v7985_v60, %v1227_v37 }
 0x926   :  { %v1222_v47 = vpop.f32.mrb[40].mxu1 }
 0x927   :  { %v1228_v49 = vmul.f32 0.35355338, %v1222_v47  ;;  %v6438_v50 = vpop.f32.mrb[41].mxu1  ;;  %v1235_v54 = vsel %vm508_vm5, %v8295_v42, -inf }
 0x928   :  { %1236 = vmax.xlane.f32.xlu0 %v1235_v54 }
 0x929   :  { %v8300_v58 = vadd.f32 %v7985_v60, %v1228_v49 }
 0x92a   :  { %v1496_v62 = vpop.f32.mrb[42].mxu1 }
 0x92b   :  { %v1510_v39 = vmul.f32 0.35355338, %v1496_v62  ;;  %v6462_v41 = vpop.f32.mrb[43].mxu1  ;;  %v1238_v43 = vsel %vm508_vm5, %v8300_v58, -inf }
 0x92c   :  { %1239 = vmax.xlane.f32.xlu1 %v1238_v43 }
 0x92d   :  { %v8305_v57 = vadd.f32 %v7985_v60, %v1510_v39 }
 0x92e   :  { %v1501_v63 = vpop.f32.mrb[44].mxu1 }
 0x92f   :  { %v1511_v0 = vmul.f32 0.35355338, %v1501_v63  ;;  %v6465_v1 = vpop.f32.mrb[45].mxu1  ;;  %v1516_v55 = vsel %vm508_vm5, %v8305_v57, -inf }
 0x930   :  { %1517 = vmax.xlane.f32.xlu0 %v1516_v55 }
 0x931   :  { %v8310_v4 = vadd.f32 %v7985_v60, %v1511_v0 }
 0x932   :  { %v1506_v52 = vpop.f32.mrb[46].mxu1 }
 0x933   :  { %v1512_v48 = vmul.f32 0.35355338, %v1506_v52  ;;  %v6468_v6 = vpop.f32.mrb[47].mxu1  ;;  %v1519_v44 = vsel %vm508_vm5, %v8310_v4, -inf }
 0x934   :  { %1520 = vmax.xlane.f32.xlu1 %v1519_v44 }
 0x935   :  { %v8315_v10 = vadd.f32 %v7985_v60, %v1512_v48 }
 0x936   :  { %v1737_v12 = vpop.f32.mrb[48].mxu1 }
 0x937   :  { %v1751_v14 = vmul.f32 0.35355338, %v1737_v12  ;;  %v6492_v15 = vpop.f32.mrb[49].mxu1  ;;  %v1522_v17 = vsel %vm508_vm5, %v8315_v10, -inf }
 0x938   :  { %1523 = vmax.xlane.f32.xlu0 %v1522_v17 }
 0x939   :  { %v8320_v18 = vadd.f32 %v7985_v60, %v1751_v14 }
 0x93a   :  { %v1742_v20 = vpop.f32.mrb[50].mxu1 }
 0x93b   :  { %v1752_v21 = vmul.f32 0.35355338, %v1742_v20  ;;  %v6495_v16 = vpop.f32.mrb[51].mxu1  ;;  %v1757_v23 = vsel %vm508_vm5, %v8320_v18, -inf }
 0x93c   :  { %1758 = vmax.xlane.f32.xlu1 %v1757_v23 }
 0x93d   :  { %v8325_v25 = vadd.f32 %v7985_v60, %v1752_v21 }
 0x93e   :  { %v1747_v27 = vpop.f32.mrb[52].mxu1 }
 0x93f   :  { %v1753_v28 = vmul.f32 0.35355338, %v1747_v27  ;;  %v6498_v30 = vpop.f32.mrb[53].mxu1  ;;  %v1760_v32 = vsel %vm508_vm5, %v8325_v25, -inf }
 0x940   :  { %1761 = vmax.xlane.f32.xlu0 %v1760_v32  ;;  %v8370_v32 = vpop.permute.xlu1 %1269 }
 0x941   :  { %v8330_v33 = vadd.f32 %v7985_v60, %v1753_v28  ;;  %v8366_v28 = vpop.permute.xlu0 %7272 }
 0x942   :  { %v1978_v34 = vpop.f32.mrb[54].mxu1 }
 0x943   :  { %v1992_v35 = vmul.f32 0.35355338, %v1978_v34  ;;  %v6522_v29 = vpop.f32.mrb[55].mxu1  ;;  %v1763_v37 = vsel %vm508_vm5, %v8330_v33, -inf }
 0x944   :  { %1764 = vmax.xlane.f32.xlu1 %v1763_v37 }
 0x945   :  { %v8335_v38 = vadd.f32 %v7985_v60, %v1992_v35  ;;  %v8368_v30 = vpop.permute.xlu0 %7277 }
 0x946   :  { %v1983_v40 = vpop.f32.mrb[56].mxu1 }
 0x947   :  { %v6525_v47 = vpop.f32.mrb[57].mxu1  ;;  %v1998_v49 = vsel %vm508_vm5, %v8335_v38, -inf  ;;  %v1993_v12 = vmul.f32 0.35355338, %v1983_v40 }
 0x948   :  { %1999 = vmax.xlane.f32.xlu0 %v1998_v49 }
 0x949   :  { %v8352_v15 = vadd.f32 %v7985_v60, %v1993_v12 }
 0x94a   :  { %v1988_v50 = vpop.f32.mrb[58].mxu1 }
 0x94b   :  { %v1994_v54 = vmul.f32 0.35355338, %v1988_v50  ;;  %v6528_v62 = vpop.f32.mrb[59].mxu1  ;;  %v2001_v20 = vsel %vm508_vm5, %v8352_v15, -inf }
 0x94d   :  { %v8340_v39 = vadd.f32 %v7985_v60, %v1994_v54 }
 0x94e   :  { %v2219_v41 = vpop.f32.mrb[60].mxu1 }
 0x94f   :  { %v6552_v43 = vpop.f32.mrb[61].mxu1  ;;  %v2004_v63 = vsel %vm508_vm5, %v8340_v39, -inf  ;;  %v2233_v14 = vmul.f32 0.35355338, %v2219_v41 }
 0x950   :  { %2005 = vmax.xlane.f32.xlu0 %v2004_v63 }
 0x951   :  { %v8357_v21 = vadd.f32 %v7985_v60, %v2233_v14 }
 0x952   :  { %v2224_v0 = vpop.f32.mrb[62].mxu1 }
 0x953   :  { %v6555_v1 = vpop.f32.mrb[63].mxu1  ;;  %v2234_v17 = vmul.f32 0.35355338, %v2224_v0  ;;  %v2239_v16 = vsel %vm508_vm5, %v8357_v21, -inf }
 0x955   :  { %1553 = vrot.lane.b32.xlu1 %v8096_v46, %s7672_s4  ;;  %v8362_v23 = vadd.f32 %v7985_v60, %v2234_v17 }
 0x956   :  { %v2229_v55 = vpop.f32.mrb[64].mxu1 }
 0x957   :  { %v2235_v52 = vmul.f32 0.35355338, %v2229_v55  ;;  %v6558_v48 = vpop.f32.mrb[65].mxu1  ;;  %v2242_v27 = vsel %vm508_vm5, %v8362_v23, -inf }
 0x959   :  { %v8347_v6 = vadd.f32 %v7985_v60, %v2235_v52 }
 0x95b   :  { %v2245_v44 = vsel %vm508_vm5, %v8347_v6, -inf }
 0x95c   :  { %2246 = vmax.xlane.f32.xlu0 %v2245_v44 }
 0x979   :  { %2002 = vmax.xlane.f32.xlu1 %v2001_v20 }
 0x97d   :  { %2240 = vmax.xlane.f32.xlu1 %v2239_v16 }
 0x981   :  { %2243 = vmax.xlane.f32.xlu1 %v2242_v27 }
 0x9a5   :  { %v993_v34 = vpop.xlane.xlu0 %992 }
 0x9a6   :  { %v1000_v35 = vsub.f32 %v8275_v19, %v993_v34 }
 0x9a8   :  { %v1003_v29 = vmul.f32 1.442695, %v1000_v35 }
 0x9a9   :  { %v996_v37 = vpop.xlane.xlu1 %995 }
 0x9aa   :  { %7412 = vpow2.f32 %v1003_v29  ;;  %v1001_v60 = vsub.f32 %v8280_v24, %v996_v37 }
 0x9ac   :  { %v1005_v40 = vmul.f32 1.442695, %v1001_v60 }
 0x9ad   :  { %v999_v47 = vpop.xlane.xlu0 %998 }
 0x9ae   :  { %7414 = vpow2.f32 %v1005_v40  ;;  %v1002_v49 = vsub.f32 %v8285_v22, %v999_v47 }
 0x9b0   :  { %v1007_v50 = vmul.f32 1.442695, %v1002_v49 }
 0x9b1   :  { %v1234_v54 = vpop.xlane.xlu0 %1233 }
 0x9b2   :  { %7416 = vpow2.f32 %v1007_v50  ;;  %v1241_v62 = vsub.f32 %v8290_v36, %v1234_v54 }
 0x9b4   :  { %v8376_v41 = vpop.eup %7412  ;;  %v1244_v43 = vmul.f32 1.442695, %v1241_v62 }
 0x9b5   :  { %v1237_v63 = vpop.xlane.xlu0 %1236  ;;  %v1009_v19 = vsel %vm508_vm5, %v8376_v41, 0.0 }
 0x9b6   :  { %7418 = vpow2.f32 %v1244_v43  ;;  %v1242_v24 = vsub.f32 %v8295_v42, %v1237_v63  ;;  %1010 = vadd.xlane.f32.xlu0 %v1009_v19 }
 0x9b8   :  { %v8381_v0 = vpop.eup %7414  ;;  %v1246_v1 = vmul.f32 1.442695, %v1242_v24 }
 0x9b9   :  { %v1240_v22 = vpop.xlane.xlu1 %1239  ;;  %v1012_v55 = vsel %vm508_vm5, %v8381_v0, 0.0 }
 0x9ba   :  { %7420 = vpow2.f32 %v1246_v1  ;;  %v1243_v36 = vsub.f32 %v8300_v58, %v1240_v22  ;;  %1013 = vadd.xlane.f32.xlu1 %v1012_v55 }
 0x9bc   :  { %v8386_v52 = vpop.eup %7416  ;;  %v1248_v48 = vmul.f32 1.442695, %v1243_v36 }
 0x9bd   :  { %v1518_v44 = vpop.xlane.xlu0 %1517  ;;  %v1015_v12 = vsel %vm508_vm5, %v8386_v52, 0.0 }
 0x9be   :  { %7422 = vpow2.f32 %v1248_v48  ;;  %v1525_v42 = vsub.f32 %v8305_v57, %v1518_v44  ;;  %1016 = vadd.xlane.f32.xlu0 %v1015_v12 }
 0x9c0   :  { %v8391_v14 = vpop.eup %7418  ;;  %v1528_v17 = vmul.f32 1.442695, %v1525_v42 }
 0x9c1   :  { %v1521_v20 = vpop.xlane.xlu1 %1520  ;;  %v1250_v16 = vsel %vm508_vm5, %v8391_v14, 0.0 }
 0x9c2   :  { %7424 = vpow2.f32 %v1528_v17  ;;  %v1526_v58 = vsub.f32 %v8310_v4, %v1521_v20  ;;  %1251 = vadd.xlane.f32.xlu1 %v1250_v16 }
 0x9c4   :  { %v8396_v27 = vpop.eup %7420  ;;  %v1530_v34 = vmul.f32 1.442695, %v1526_v58 }
 0x9c5   :  { %v1524_v35 = vpop.xlane.xlu0 %1523  ;;  %v1253_v29 = vsel %vm508_vm5, %v8396_v27, 0.0 }
 0x9c6   :  { %7426 = vpow2.f32 %v1530_v34  ;;  %v1527_v57 = vsub.f32 %v8315_v10, %v1524_v35  ;;  %1254 = vadd.xlane.f32.xlu0 %v1253_v29 }
 0x9c8   :  { %v8401_v37 = vpop.eup %7422  ;;  %v1532_v60 = vmul.f32 1.442695, %v1527_v57 }
 0x9c9   :  { %v1759_v40 = vpop.xlane.xlu1 %1758  ;;  %v1256_v47 = vsel %vm508_vm5, %v8401_v37, 0.0 }
 0x9ca   :  { %7428 = vpow2.f32 %v1532_v60  ;;  %v1766_v4 = vsub.f32 %v8320_v18, %v1759_v40  ;;  %1257 = vadd.xlane.f32.xlu0 %v1256_v47 }
 0x9cc   :  { %v8406_v49 = vpop.eup %7424  ;;  %v1769_v50 = vmul.f32 1.442695, %v1766_v4 }
 0x9cd   :  { %v1534_v54 = vsel %vm508_vm5, %v8406_v49, 0.0  ;;  %v1762_v22 = vpop.xlane.xlu0 %1761 }
 0x9ce   :  { %7430 = vpow2.f32 %v1769_v50  ;;  %1535 = vadd.xlane.f32.xlu0 %v1534_v54  ;;  %v1767_v55 = vsub.f32 %v8325_v25, %v1762_v22 }
 0x9d0   :  { %v8410_v10 = vpop.eup %7426  ;;  %v1771_v44 = vmul.f32 1.442695, %v1767_v55 }
 0x9d1   :  { %v1537_v62 = vsel %vm508_vm5, %v8410_v10, 0.0  ;;  %v1765_v24 = vpop.xlane.xlu1 %1764 }
 0x9d2   :  { %1538 = vadd.xlane.f32.xlu1 %v1537_v62  ;;  %v1768_v1 = vsub.f32 %v8330_v33, %v1765_v24 }
 0x9d4   :  { %v8414_v43 = vpop.eup %7428  ;;  %v1773_v36 = vmul.f32 1.442695, %v1768_v1 }
 0x9d5   :  { %v1540_v18 = vsel %vm508_vm5, %v8414_v43, 0.0  ;;  %v2000_v48 = vpop.xlane.xlu0 %1999  ;;  %v8433_v42 = vpop.permute.xlu1 %1553 }
 0x9d6   :  { %1541 = vadd.xlane.f32.xlu0 %v1540_v18  ;;  %7432 = vpow2.f32 %v1773_v36  ;;  %v2007_v12 = vsub.f32 %v8335_v38, %v2000_v48 }
 0x9d7   :  { %7434 = vpow2.f32 %v1771_v44 }
 0x9d8   :  { %v8418_v63 = vpop.eup %7430  ;;  %v2010_v17 = vmul.f32 1.442695, %v2007_v12 }
 0x9d9   :  { %v1775_v19 = vsel %vm508_vm5, %v8418_v63, 0.0 }
 0x9da   :  { %1776 = vadd.xlane.f32.xlu1 %v1775_v19  ;;  %7436 = vpow2.f32 %v2010_v17 }
 0x9dd   :  { %v2006_v20 = vpop.xlane.xlu0 %2005 }
 0x9de   :  { %v2009_v33 = vsub.f32 %v8340_v39, %v2006_v20 }
 0x9e0   :  { %v8437_v25 = vpop.eup %7432  ;;  %v2014_v57 = vmul.f32 1.442695, %v2009_v33 }
 0x9e1   :  { %v1781_v60 = vsel %vm508_vm5, %v8437_v25, 0.0  ;;  %v8442_v40 = vpop.eup %7434 }
 0x9e2   :  { %v1778_v39 = vsel %vm508_vm5, %v8442_v40, 0.0 }
 0x9e9   :  { %v2247_v19 = vpop.xlane.xlu0 %2246 }
 0x9ea   :  { %v2250_v24 = vsub.f32 %v8347_v6, %v2247_v19 }
 0x9eb   :  { %7282 = vrot.lane.b32.xlu1 %v8084_v59, %s7675_s0 }
 0x9ec   :  { %1794 = vrot.lane.b32.xlu0 %v8096_v46, %s7675_s0  ;;  %v2255_v22 = vmul.f32 1.442695, %v2250_v24 }
 0x9f0   :  { %7287 = vrot.lane.b32.xlu0 %v8084_v59, %s7680_s11 }
 0x9f4   :  { %2035 = vrot.lane.b32.xlu0 %v8096_v46, %s7680_s11 }
 0xa06   :  { %v2003_v16 = vpop.xlane.xlu1 %2002 }
 0xa07   :  { %v2008_v58 = vsub.f32 %v8352_v15, %v2003_v16  ;;  %v8446_v15 = vpop.eup %7436 }
 0xa09   :  { %v2012_v34 = vmul.f32 1.442695, %v2008_v58 }
 0xa0a   :  { %v2241_v35 = vpop.xlane.xlu1 %2240 }
 0xa0b   :  { %v2248_v29 = vsub.f32 %v8357_v21, %v2241_v35  ;;  %7438 = vpow2.f32 %v2012_v34  ;;  %v2016_v21 = vsel %vm508_vm5, %v8446_v15, 0.0 }
 0xa0d   :  { %v2251_v38 = vmul.f32 1.442695, %v2248_v29 }
 0xa0e   :  { %v2244_v1 = vpop.xlane.xlu1 %2243 }
 0xa0f   :  { %7440 = vpow2.f32 %v2251_v38  ;;  %1782 = vadd.xlane.f32.xlu1 %v1781_v60  ;;  %v2249_v55 = vsub.f32 %v8362_v23, %v2244_v1  ;;  %v7280_v60 = vunpack.i.h.bf16 %v8368_v30 }
 0xa10   :  { %7442 = vpow2.f32 %v2014_v57 }
 0xa11   :  { %7444 = vpow2.f32 %v2255_v22  ;;  %v2253_v36 = vmul.f32 1.442695, %v2249_v55 }
 0xa13   :  { %1779 = vadd.xlane.f32.xlu0 %v1778_v39  ;;  %v7279_v39 = vunpack.i.l.bf16 %v8368_v30 }
 0xa15   :  { %v8450_v47 = vpop.eup %7438 }
 0xa16   :  { %v2019_v54 = vsel %vm508_vm5, %v8450_v47, 0.0 }
 0xa17   :  { %2017 = vadd.xlane.f32.xlu0 %v2016_v21 }
 0xa19   :  { %v8452_v4 = vpop.eup %7440 }
 0xa1a   :  { %v2257_v50 = vsel %vm508_vm5, %v8452_v4, 0.0  ;;  %v8458_v62 = vpop.eup %7442 }
 0xa1b   :  { %2258 = vadd.xlane.f32.xlu1 %v2257_v50  ;;  %2020 = vadd.xlane.f32.xlu0 %v2019_v54  ;;  %v2022_v18 = vsel %vm508_vm5, %v8458_v62, 0.0  ;;  %v8468_v17 = vpop.eup %7444  ;;  %v7037_v50 = vpack.c.bf16 %v7280_v60, %v7279_v39 }
 0xa1c   :  { %v2263_v23 = vsel %vm508_vm5, %v8468_v17, 0.0 }
 0xa1f   :  { %2023 = vadd.xlane.f32.xlu0 %v2022_v18 }
 0xa2c   :  { %2276 = vrot.lane.b32.xlu1 %v8096_v46, %s7681_s12  ;;  %v7275_v46 = vunpack.i.h.bf16 %v8366_v28 }
 0xa35   :  { %7292 = vrot.lane.b32.xlu0 %v8084_v59, %s7681_s12  ;;  %v7274_v59 = vunpack.i.l.bf16 %v8366_v28 }
 0xa37   :  { %v7030_v33 = vpack.c.bf16 %v7275_v46, %v7274_v59 }
 0xa43   :  { %v1011_v48 = vpop.xlane.xlu0 %1010 }
 0xa44   :  { %7446 = vrcp.f32 %v1011_v48 }
 0xa45   :  { %7448 = vpow2.f32 %v2253_v36 }
 0xa47   :  { %v1014_v44 = vpop.xlane.xlu1 %1013 }
 0xa48   :  { %7450 = vrcp.f32 %v1014_v44 }
 0xa4b   :  { %v1017_v12 = vpop.xlane.xlu0 %1016 }
 0xa4c   :  { %7452 = vrcp.f32 %v1017_v12 }
 0xa4e   :  { %v7447_v6 = vpop.eup %7446 }
 0xa4f   :  { %v1019_v20 = vmul.f32 %v7447_v6, %v8376_v41  ;;  %v1252_v16 = vpop.xlane.xlu1 %1251  ;;  %v8475_v58 = vpop.eup %7448 }
 0xa50   :  { %7454 = vrcp.f32 %v1252_v16  ;;  %2264 = vadd.xlane.f32.xlu1 %v2263_v23  ;;  %v2260_v41 = vsel %vm508_vm5, %v8475_v58, 0.0 }
 0xa51   :  { %6416 = vmatmul.mubr.msk.f32.vlgmr.msra.gmra.mrb[12].mxu0 %vm508_vm5, %v1019_v20 }
 0xa52   :  { %v7451_v34 = vpop.eup %7450  ;;  %7031 = vmatpush3.bf16.msra.mxu0 %v7030_v33  ;;  %6418 = vmatprep.mubr.msk.f32.mxu0 %vm7670_vm2, %v7671_v45 }
 0xa53   :  { %v1255_v28 = vpop.xlane.xlu0 %1254  ;;  %6443 = vmatprep.subr.mxu0 %v7671_v45  ;;  %v1021_v35 = vmul.f32 %v7451_v34, %v8381_v0 }
 0xa54   :  { %7456 = vrcp.f32 %v1255_v28  ;;  %2261 = vadd.xlane.f32.xlu0 %v2260_v41 }
 0xa55   :  { %6419 = vmatmul.mubr.msk.f32.gmra.mrb[14].mxu0 %vm508_vm5, %v1021_v35 }
 0xa56   :  { %v7453_v29 = vpop.eup %7452  ;;  %6444 = vmatpush3.msra.mxu0 %v8370_v32  ;;  %6421 = vmatprep.mubr.msk.f32.mxu0 %vm7670_vm2, %v7671_v45 }
 0xa57   :  { %v1258_v57 = vpop.xlane.xlu0 %1257  ;;  %v1023_v38 = vmul.f32 %v7453_v29, %v8386_v52  ;;  %7036 = vmatprep.subr.bf16.mxu0 %v7668_v3 }
 0xa58   :  { %7458 = vrcp.f32 %v1258_v57 }
 0xa59   :  { %6422 = vmatmul.mubr.msk.f32.gmra.mrb[16].mxu0 %vm508_vm5, %v1023_v38 }
 0xa5a   :  { %v7455_v0 = vpop.eup %7454  ;;  %6445 = vmatprep.mubr.msk.f32.mxu0 %vm7670_vm2, %v7671_v45 }
 0xa5b   :  { %v1260_v32 = vmul.f32 %v7455_v0, %v8391_v14  ;;  %v1536_v21 = vpop.xlane.xlu0 %1535 }
 0xa5c   :  { %7460 = vrcp.f32 %v1536_v21 }
 0xa5d   :  { %6446 = vmatmul.mubr.msk.f32.vlgmr.msra.gmra.mrb[18].mxu0 %vm508_vm5, %v1260_v32 }
 0xa5e   :  { %v7457_v52 = vpop.eup %7456  ;;  %7038 = vmatpush3.bf16.msra.mxu0 %v7037_v50  ;;  %6448 = vmatprep.mubr.msk.f32.mxu0 %vm7670_vm2, %v7671_v45 }
 0xa5f   :  { %v1539_v30 = vpop.xlane.xlu1 %1538  ;;  %6473 = vmatprep.subr.mxu0 %v7671_v45  ;;  %v1262_v54 = vmul.f32 %v7457_v52, %v8396_v27 }
 0xa60   :  { %7462 = vrcp.f32 %v1539_v30 }
 0xa61   :  { %1368 = vrot.lane.b32.xlu1 %v8270_v11, %s7682_s13  ;;  %6449 = vmatmul.mubr.msk.f32.gmra.mrb[20].mxu0 %vm508_vm5, %v1262_v54 }
 0xa62   :  { %v7459_v14 = vpop.eup %7458  ;;  %6474 = vmatpush3.msra.mxu0 %v8433_v42  ;;  %6451 = vmatprep.mubr.msk.f32.mxu0 %vm7670_vm2, %v7671_v45 }
 0xa63   :  { %v1542_v18 = vpop.xlane.xlu0 %1541  ;;  %v1264_v19 = vmul.f32 %v7459_v14, %v8401_v37  ;;  %7043 = vmatprep.subr.bf16.mxu0 %v7668_v3 }
 0xa64   :  { %7464 = vrcp.f32 %v1542_v18 }
 0xa65   :  { %6452 = vmatmul.mubr.msk.f32.gmra.mrb[22].mxu0 %vm508_vm5, %v1264_v19 }
 0xa66   :  { %v7461_v27 = vpop.eup %7460  ;;  %6475 = vmatprep.mubr.msk.f32.mxu0 %vm7670_vm2, %v7671_v45 }
 0xa67   :  { %v1544_v11 = vmul.f32 %v7461_v27, %v8406_v49  ;;  %v1777_v24 = vpop.xlane.xlu1 %1776  ;;  %v1795_v1 = vpop.permute.xlu0 %1794  ;;  %v2416_v27 = vld [vmem:[%s9661_s1 + $0xe8] sm:$0xff] }
 0xa68   :  { %7466 = vrcp.f32 %v1777_v24 }
 0xa69   :  { %6476 = vmatmul.mubr.msk.f32.vlgmr.msra.gmra.mrb[24].mxu0 %vm508_vm5, %v1544_v11 }
 0xa6a   :  { %v7463_v42 = vpop.eup %7462  ;;  %1366 = vrot.lane.b32.xlu0 %v8268_v8, %s7682_s13  ;;  %6478 = vmatprep.mubr.msk.f32.mxu0 %vm7670_vm2, %v7671_v45 }
 0xa6b   :  { %v7283_v37 = vpop.permute.xlu1 %7282  ;;  %v1546_v22 = vmul.f32 %v7463_v42, %v8410_v10  ;;  %v7288_v48 = vpop.permute.xlu0 %7287 }
 0xa6c   :  { %v7285_v55 = vunpack.i.h.bf16 %v7283_v37  ;;  %v7284_v36 = vunpack.i.l.bf16 %v7283_v37  ;;  %v7290_v46 = vunpack.i.h.bf16 %v7288_v48  ;;  %v7289_v8 = vunpack.i.l.bf16 %v7288_v48 }
 0xa6d   :  { %6479 = vmatmul.mubr.msk.f32.gmra.mrb[26].mxu0 %vm508_vm5, %v1546_v22 }
 0xa6e   :  { %v7465_v49 = vpop.eup %7464  ;;  %v7044_v44 = vpack.c.bf16 %v7285_v55, %v7284_v36  ;;  %6481 = vmatprep.mubr.msk.f32.mxu0 %vm7670_vm2, %v7671_v45  ;;  %v7051_v6 = vpack.c.bf16 %v7290_v46, %v7289_v8 }
 0xa6f   :  { %v1548_v12 = vmul.f32 %v7465_v49, %v8414_v43  ;;  %v2036_v43 = vpop.permute.xlu0 %2035 }
 0xa70   :  { %7045 = vmatpush3.bf16.msra.mxu0 %v7044_v44 }
 0xa71   :  { %6482 = vmatmul.mubr.msk.f32.gmra.mrb[28].mxu0 %vm508_vm5, %v1548_v12  ;;  %6503 = vmatprep.subr.mxu0 %v7671_v45 }
 0xa72   :  { %v7467_v10 = vpop.eup %7466  ;;  %6505 = vmatprep.mubr.msk.f32.mxu0 %vm7670_vm2, %v7671_v45 }
 0xa73   :  { %v1785_v59 = vmul.f32 %v7467_v10, %v8418_v63 }
 0xa74   :  { %6504 = vmatpush3.msra.mxu0 %v1795_v1 }
 0xa75   :  { %6506 = vmatmul.mubr.msk.f32.vlgmr.msra.gmra.mrb[30].mxu0 %vm508_vm5, %v1785_v59  ;;  %7050 = vmatprep.subr.bf16.mxu0 %v7668_v3 }
 0xa76   :  { %7052 = vmatpush3.bf16.msra.mxu0 %v7051_v6  ;;  %6508 = vmatprep.mubr.msk.f32.mxu0 %vm7670_vm2, %v7671_v45 }
 0xa77   :  { %6533 = vmatprep.subr.mxu0 %v7671_v45 }
 0xa7a   :  { %6534 = vmatpush3.msra.mxu0 %v2036_v43 }
 0xa7b   :  { %7057 = vmatprep.subr.bf16.mxu0 %v7668_v3 }
 0xa9c   :  { %v1783_v20 = vpop.xlane.xlu1 %1782 }
 0xaa0   :  { %v1780_v16 = vpop.xlane.xlu0 %1779 }
 0xaa1   :  { %7468 = vrcp.f32 %v1780_v16 }
 0xaa2   :  { %7470 = vrcp.f32 %v1783_v20 }
 0xaa4   :  { %v2018_v63 = vpop.xlane.xlu0 %2017 }
 0xaa5   :  { %7472 = vrcp.f32 %v2018_v63 }
 0xaa8   :  { %v2021_v23 = vpop.xlane.xlu0 %2020  ;;  %v2259_v35 = vpop.xlane.xlu1 %2258 }
 0xaa9   :  { %7474 = vrcp.f32 %v2021_v23 }
 0xaab   :  { %v7469_v33 = vpop.eup %7468 }
 0xaac   :  { %v2024_v34 = vpop.xlane.xlu0 %2023  ;;  %v1787_v28 = vmul.f32 %v7469_v33, %v8442_v40  ;;  %v7471_v41 = vpop.eup %7470 }
 0xaad   :  { %7476 = vrcp.f32 %v2024_v34  ;;  %v1789_v57 = vmul.f32 %v7471_v41, %v8437_v25  ;;  %v2277_v25 = vpop.permute.xlu1 %2276 }
 0xaae   :  { %6509 = vmatmul.mubr.msk.f32.gmra.mrb[32].mxu0 %vm508_vm5, %v1787_v28  ;;  %7478 = vrcp.f32 %v2259_v35 }
 0xaaf   :  { %6511 = vmatprep.mubr.msk.f32.mxu0 %vm7670_vm2, %v7671_v45  ;;  %v7473_v38 = vpop.eup %7472 }
 0xab0   :  { %v7293_v29 = vpop.permute.xlu0 %7292  ;;  %v2026_v40 = vmul.f32 %v7473_v38, %v8446_v15 }
 0xab1   :  { %v7295_v60 = vunpack.i.h.bf16 %v7293_v29  ;;  %v7294_v39 = vunpack.i.l.bf16 %v7293_v29 }
 0xab2   :  { %6512 = vmatmul.mubr.msk.f32.gmra.mrb[34].mxu0 %vm508_vm5, %v1789_v57 }
 0xab3   :  { %v7058_v0 = vpack.c.bf16 %v7295_v60, %v7294_v39  ;;  %6535 = vmatprep.mubr.msk.f32.mxu0 %vm7670_vm2, %v7671_v45  ;;  %v7475_v32 = vpop.eup %7474 }
 0xab4   :  { %v2028_v21 = vmul.f32 %v7475_v32, %v8450_v47 }
 0xab5   :  { %7196 = vmatpush3.bf16.msra.mxu1 %v7058_v0 }
 0xab6   :  { %6536 = vmatmul.mubr.msk.f32.vlgmr.msra.gmra.mrb[36].mxu0 %vm508_vm5, %v2026_v40  ;;  %7195 = vmatprep.subr.mxu1 %v7671_v45 }
 0xab7   :  { %7059 = vmatpush3.bf16.msra.mxu0 %v7058_v0  ;;  %6538 = vmatprep.mubr.msk.f32.mxu0 %vm7670_vm2, %v7671_v45  ;;  %v7477_v50 = vpop.eup %7476 }
 0xab8   :  { %6563 = vmatprep.subr.mxu0 %v7671_v45  ;;  %v2030_v15 = vmul.f32 %v7477_v50, %v8458_v62  ;;  %v7479_v52 = vpop.eup %7478 }
 0xab9   :  { %7197 = vmatpush3.msra.mxu1 %v2277_v25  ;;  %v2267_v30 = vmul.f32 %v7479_v52, %v8452_v4  ;;  %v2415_v4 = vld [vmem:[%s9661_s1 + $0xe0] sm:$0xff] }
 0xaba   :  { %6539 = vmatmul.mubr.msk.f32.gmra.mrb[38].mxu0 %vm508_vm5, %v2028_v21  ;;  %v7060_v11 = vpack.c.bf16 %v2416_v27, %v2415_v4 }
 0xabb   :  { %6564 = vmatpush3.msra.mxu0 %v2277_v25  ;;  %6541 = vmatprep.mubr.msk.f32.mxu0 %vm7670_vm2, %v7671_v45 }
 0xabc   :  { %7061 = vmatprep.subr.bf16.mxu1 %v7060_v11 }
 0xabe   :  { %6542 = vmatmul.mubr.msk.f32.gmra.mrb[40].mxu0 %vm508_vm5, %v2030_v15 }
 0xabf   :  { %6565 = vmatprep.mubr.msk.f32.mxu0 %vm7670_vm2, %v7671_v45 }
 0xac2   :  { %6566 = vmatmul.mubr.msk.f32.vlgmr.msra.gmra.mrb[42].mxu0 %vm508_vm5, %v2267_v30 }
 0xac3   :  { %6568 = vmatprep.mubr.msk.f32.mxu0 %vm7670_vm2, %v7671_v45 }
 0xadd   :  { %v2265_v47 = vpop.xlane.xlu1 %2264 }
 0xade   :  { %7480 = vrcp.f32 %v2265_v47 }
 0xae1   :  { %v2262_v54 = vpop.xlane.xlu0 %2261  ;;  %v1369_v50 = vpop.permute.xlu1 %1368 }
 0xae2   :  { %7482 = vrcp.f32 %v2262_v54  ;;  %v1400_v47 = vsel %vm405_vm3, %v8037_v7, %v1369_v50 }
 0xae5   :  { %v1367_v39 = vpop.permute.xlu0 %1366 }
 0xae6   :  { %v1399_v21 = vsel %vm405_vm3, %v8035_v5, %v1367_v39 }
 0xae8   :  { %v7481_v14 = vpop.eup %7480 }
 0xae9   :  { %v2271_v62 = vmul.f32 %v7481_v14, %v8468_v17  ;;  %v2417_v17 = vld [vmem:[%s9661_s1 + $0xf0] sm:$0xff] }
 0xaeb   :  { %6572 = vmatmul.mubr.msk.f32.vlgmr.msra.gmra.mrb[66].mxu1 %vm508_vm5, %v2271_v62 }
 0xaec   :  { %v7483_v18 = vpop.eup %7482  ;;  %7063 = vmatpush3.bf16.msra.mxu1 %v7060_v11 }
 0xaed   :  { %v2269_v19 = vmul.f32 %v7483_v18, %v8475_v58  ;;  %v2418_v58 = vld [vmem:[%s9661_s1 + $0xf8] sm:$0xff] }
 0xaee   :  { %v7064_v42 = vpack.c.bf16 %v2418_v58, %v2417_v17 }
 0xaef   :  { %6569 = vmatmul.mubr.msk.f32.gmra.mrb[44].mxu0 %vm508_vm5, %v2269_v19 }
 0xaf0   :  { %7065 = vmatprep.subr.bf16.mxu1 %v7064_v42 }
 0xaf1   :  { %7067 = vmatpush3.bf16.msra.mxu1 %v7064_v42 }
 0xb24   :  { %v1108_v24 = vpop.f32.mrb[12].mxu0 }
 0xb25   :  { %1378 = vrot.lane.b32.xlu0 %v1108_v24, %s7683_s22  ;;  %v6417_v1 = vpop.f32.mrb[13].mxu0 }
 0xb28   :  { %v1113_v37 = vpop.f32.mrb[14].mxu0 }
 0xb29   :  { %1380 = vrot.lane.b32.xlu0 %v1113_v37, %s7683_s22  ;;  %v6420_v22 = vpop.f32.mrb[15].mxu0 }
 0xb2c   :  { %v1118_v55 = vpop.f32.mrb[16].mxu0 }
 0xb2d   :  { %1382 = vrot.lane.b32.xlu1 %v1118_v55, %s7683_s22  ;;  %v6423_v36 = vpop.f32.mrb[17].mxu0 }
 0xb30   :  { %v1349_v48 = vpop.f32.mrb[18].mxu0 }
 0xb31   :  { %1390 = vrot.lane.b32.xlu0 %v1349_v48, %s7684_s23  ;;  %v6447_v49 = vpop.f32.mrb[19].mxu0 }
 0xb34   :  { %v1354_v44 = vpop.f32.mrb[20].mxu0 }
 0xb35   :  { %1392 = vrot.lane.b32.xlu0 %v1354_v44, %s7684_s23  ;;  %v6450_v12 = vpop.f32.mrb[21].mxu0 }
 0xb38   :  { %v1359_v46 = vpop.f32.mrb[22].mxu0 }
 0xb39   :  { %1370 = vrot.lane.b32.xlu0 %v8272_v13, %s7682_s13  ;;  %1394 = vrot.lane.b32.xlu1 %v1359_v46, %s7684_s23  ;;  %v6453_v8 = vpop.f32.mrb[23].mxu0 }
 0xb3c   :  { %v1633_v10 = vpop.f32.mrb[24].mxu0 }
 0xb3d   :  { %v6477_v59 = vpop.f32.mrb[25].mxu0 }
 0xb40   :  { %v8584_v6 = vpop.f32.mrb[26].mxu0 }
 0xb41   :  { %v6480_v43 = vpop.f32.mrb[27].mxu0 }
 0xb44   :  { %v8586_v20 = vpop.f32.mrb[28].mxu0 }
 0xb45   :  { %v6483_v16 = vpop.f32.mrb[29].mxu0 }
 0xb48   :  { %v1874_v63 = vpop.f32.mrb[30].mxu0 }
 0xb49   :  { %2373 = vrot.lane.b32.xlu0 %v1874_v63, %s7682_s13  ;;  %v6507_v23 = vpop.f32.mrb[31].mxu0 }
 0xb81   :  { %v1879_v33 = vpop.f32.mrb[32].mxu0 }
 0xb82   :  { %v6510_v34 = vpop.f32.mrb[33].mxu0 }
 0xb85   :  { %v1884_v28 = vpop.f32.mrb[34].mxu0 }
 0xb86   :  { %v6513_v41 = vpop.f32.mrb[35].mxu0 }
 0xb89   :  { %v2115_v13 = vpop.f32.mrb[36].mxu0 }
 0xb8a   :  { %2385 = vrot.lane.b32.xlu0 %v2115_v13, %s7683_s22  ;;  %v6537_v35 = vpop.f32.mrb[37].mxu0 }
 0xb8d   :  { %v2120_v29 = vpop.f32.mrb[38].mxu0 }
 0xb8e   :  { %2375 = vrot.lane.b32.xlu0 %v1879_v33, %s7682_s13  ;;  %v6540_v57 = vpop.f32.mrb[39].mxu0 }
 0xb91   :  { %v2125_v38 = vpop.f32.mrb[40].mxu0 }
 0xb92   :  { %2387 = vrot.lane.b32.xlu0 %v2120_v29, %s7683_s22  ;;  %v6543_v60 = vpop.f32.mrb[41].mxu0 }
 0xb95   :  { %v2356_v0 = vpop.f32.mrb[42].mxu0 }
 0xb96   :  { %2397 = vrot.lane.b32.xlu1 %v2356_v0, %s7684_s23  ;;  %v6567_v40 = vpop.f32.mrb[43].mxu0 }
 0xb97   :  { %v1379_v32 = vpop.permute.xlu0 %1378 }
 0xb98   :  { %v1403_v15 = vsel %vm1402_vm6, %v1399_v21, %v1379_v32 }
 0xb9a   :  { %2377 = vrot.lane.b32.xlu1 %v1884_v28, %s7682_s13 }
 0xb9b   :  { %v1381_v25 = vpop.permute.xlu0 %1380 }
 0xb9c   :  { %v1404_v54 = vsel %vm1402_vm6, %v1400_v47, %v1381_v25 }
 0xb9e   :  { %2389 = vrot.lane.b32.xlu1 %v2125_v38, %s7683_s22 }
 0xb9f   :  { %v1383_v18 = vpop.permute.xlu1 %1382 }
 0xba3   :  { %v1391_v52 = vpop.permute.xlu0 %1390 }
 0xba4   :  { %v1406_v30 = vsel %vm508_vm5, %v1403_v15, %v1391_v52 }
 0xba5   :  { %6582 = vmatprep.mubr.msk.f32.mxu1 %vm174_vm1, %v1406_v30 }
 0xba7   :  { %v1393_v14 = vpop.permute.xlu0 %1392 }
 0xba8   :  { %v1407_v62 = vsel %vm508_vm5, %v1404_v54, %v1393_v14 }
 0xba9   :  { %6583 = vmatmul.mubr.msk.f32.vlgmr.msra.gmra.mrb[68].mxu1 %vm174_vm1, %v1407_v62 }
 0xbab   :  { %v1371_v5 = vpop.permute.xlu0 %1370  ;;  %v1395_v4 = vpop.permute.xlu1 %1394 }
 0xbac   :  { %v1401_v19 = vsel %vm405_vm3, %v8039_v9, %v1371_v5 }
 0xbad   :  { %v1405_v27 = vsel %vm1402_vm6, %v1401_v19, %v1383_v18  ;;  %v2649_v19 = vld [vmem:[%s9661_s1 + $0x100] sm:$0xff] }
 0xbae   :  { %v1408_v11 = vsel %vm508_vm5, %v1405_v27, %v1395_v4  ;;  %v2650_v4 = vld [vmem:[%s9661_s1 + $0x108] sm:$0xff] }
 0xbaf   :  { %6585 = vmatprep.mubr.msk.f32.mxu1 %vm174_vm1, %v1408_v11  ;;  %v7068_v27 = vpack.c.bf16 %v2650_v4, %v2649_v19  ;;  %v2651_v11 = vld [vmem:[%s9661_s1 + $0x110] sm:$0xff]  ;;  %v2804_v19 = vld [vmem:[%s9661_s1 + $0x138] sm:$0xff] }
 0xbb1   :  { %7069 = vmatprep.subr.bf16.mxu0 %v7068_v27 }
 0xbb2   :  { %7071 = vmatpush3.bf16.msra.mxu0 %v7068_v27 }
 0xbbb   :  { %v2374_v1 = vpop.permute.xlu0 %2373 }
 0xbbc   :  { %v2406_v37 = vsel %vm405_vm3, %v1633_v10, %v2374_v1 }
 0xbbe   :  { %v2366_v7 = vpop.f32.mrb[66].mxu1 }
 0xbbf   :  { %2401 = vrot.lane.b32.xlu1 %v2366_v7, %s7684_s23  ;;  %v6573_v24 = vpop.f32.mrb[67].mxu1  ;;  %v2652_v7 = vld [vmem:[%s9661_s1 + $0x118] sm:$0xff] }
 0xbc0   :  { %v7072_v24 = vpack.c.bf16 %v2652_v7, %v2651_v11 }
 0xbc2   :  { %v2361_v17 = vpop.f32.mrb[44].mxu0  ;;  %7073 = vmatprep.subr.bf16.mxu0 %v7072_v24 }
 0xbc3   :  { %2399 = vrot.lane.b32.xlu0 %v2361_v17, %s7684_s23  ;;  %v6570_v58 = vpop.f32.mrb[45].mxu0  ;;  %7075 = vmatpush3.bf16.msra.mxu0 %v7072_v24 }
 0xbfc   :  { %v2386_v42 = vpop.permute.xlu0 %2385 }
 0xbfd   :  { %v2409_v9 = vsel %vm1402_vm6, %v2406_v37, %v2386_v42 }
 0xc00   :  { %v2376_v48 = vpop.permute.xlu0 %2375 }
 0xc01   :  { %v2407_v12 = vsel %vm405_vm3, %v8584_v6, %v2376_v48  ;;  %v5907_v6 = vld [vmem:[%s9662_s2 + $0x34] ss:$0 sm:$0xff] }
 0xc04   :  { %v2388_v44 = vpop.permute.xlu0 %2387 }
 0xc05   :  { %v2410_v8 = vsel %vm1402_vm6, %v2407_v12, %v2388_v44 }
 0xc08   :  { %v2398_v22 = vpop.permute.xlu1 %2397 }
 0xc09   :  { %v2412_v55 = vsel %vm508_vm5, %v2409_v9, %v2398_v22 }
 0xc0a   :  { %6586 = vmatmul.mubr.msk.f32.gmra.mrb[70].mxu1 %vm174_vm1, %v2412_v55 }
 0xc0c   :  { %v2378_v36 = vpop.permute.xlu1 %2377 }
 0xc0d   :  { %v2408_v10 = vsel %vm405_vm3, %v8586_v20, %v2378_v36 }
 0xc10   :  { %v2390_v49 = vpop.permute.xlu1 %2389 }
 0xc11   :  { %v2411_v43 = vsel %vm1402_vm6, %v2408_v10, %v2390_v49 }
 0xc31   :  { %v2402_v46 = vpop.permute.xlu1 %2401 }
 0xc32   :  { %v2414_v63 = vsel %vm508_vm5, %v2411_v43, %v2402_v46 }
 0xc35   :  { %v2400_v59 = vpop.permute.xlu0 %2399 }
 0xc36   :  { %v2413_v16 = vsel %vm508_vm5, %v2410_v8, %v2400_v59 }
 0xc37   :  { %6588 = vmatprep.mubr.msk.f32.mxu1 %vm174_vm1, %v2413_v16 }
 0xc38   :  { %6589 = vmatmul.mubr.msk.f32.gmra.mrb[72].mxu1 %vm174_vm1, %v2414_v63 }
 0xc7c   :  { %v6584_v23 = vpop.f32.mrb[68].mxu1 }
 0xc7d   :  { %v2533_v33 = vadd.f32 %v6584_v23, %v7843_v56  ;;  %v2503_v34 = vpop.f32.mrb[69].mxu1 }
 0xc7e   :  { %v2532_v20 = vadd.f32 %v2503_v34, %v7836_v51 }
 0xc7f   :  { %v8631_v28 = vadd.f32 %v5907_v6, %v2533_v33 }
 0xc80   :  { %v8633_v41 = vadd.f32 %v5907_v6, %v2532_v20 }
 0xc81   :  { %v2554_v13 = vsel %vm174_vm1, %v8631_v28, 0.0 }
 0xc82   :  { %2555 = vadd.xlane.f32.xlu1 %v2554_v13  ;;  %v2551_v35 = vsel %vm174_vm1, %v8633_v41, 0.0 }
 0xc83   :  { %2552 = vadd.xlane.f32.xlu0 %v2551_v35 }
 0xcdd   :  { %v6587_v29 = vpop.f32.mrb[70].mxu1 }
 0xcde   :  { %v2513_v57 = vpop.f32.mrb[71].mxu1  ;;  %v2535_v38 = vadd.f32 %v6587_v29, %v7857_v2  ;;  %v8694_v29 = vld [vmem:[%s9662_s2 + $0x35] ss:$0 sm:$0xff] }
 0xcdf   :  { %v2534_v56 = vadd.f32 %v2513_v57, %v7850_v61 }
 0xce0   :  { %v8643_v51 = vadd.f32 %v5907_v6, %v2535_v38 }
 0xce1   :  { %v8641_v60 = vadd.f32 %v5907_v6, %v2534_v56 }
 0xce2   :  { %v2560_v0 = vsel %vm174_vm1, %v8643_v51, 0.0 }
 0xce3   :  { %v2557_v39 = vsel %vm174_vm1, %v8641_v60, 0.0 }
 0xce4   :  { %2558 = vadd.xlane.f32.xlu0 %v2557_v39 }
 0xce8   :  { %2561 = vadd.xlane.f32.xlu0 %v2560_v0  ;;  %v5909_v0 = vld [vmem:[%s9662_s2 + $0x36] ss:$0 sm:$0xff] }
 0xd0b   :  { %v6590_v40 = vpop.f32.mrb[72].mxu1 }
 0xd0c   :  { %v2537_v32 = vadd.f32 %v6590_v40, %v7886_v31  ;;  %v2523_v25 = vpop.f32.mrb[73].mxu1 }
 0xd0d   :  { %v2536_v2 = vadd.f32 %v2523_v25, %v7875_v26 }
 0xd0e   :  { %v8651_v21 = vadd.f32 %v5907_v6, %v2537_v32 }
 0xd0f   :  { %v8653_v61 = vadd.f32 %v5907_v6, %v2536_v2  ;;  %v2556_v50 = vpop.xlane.xlu1 %2555 }
 0xd10   :  { %v2570_v15 = vmul.f32 0.03125, %v2556_v50  ;;  %v2553_v52 = vpop.xlane.xlu0 %2552  ;;  %v2566_v30 = vsel %vm174_vm1, %v8651_v21, 0.0 }
 0xd11   :  { %v2569_v47 = vmul.f32 0.03125, %v2553_v52  ;;  %2567 = vadd.xlane.f32.xlu0 %v2566_v30  ;;  %v2563_v54 = vsel %vm174_vm1, %v8653_v61, 0.0 }
 0xd12   :  { %v2576_v31 = vsub.f32 %v8631_v28, %v2570_v15  ;;  %2564 = vadd.xlane.f32.xlu1 %v2563_v54  ;;  %v2801_v54 = vld [vmem:[%s9661_s1 + $0x120] sm:$0xff] }
 0xd13   :  { %v2575_v26 = vsub.f32 %v8633_v41, %v2569_v47 }
 0xd14   :  { %v2582_v14 = vmul.f32 %v2576_v31, %v2576_v31 }
 0xd15   :  { %v2581_v62 = vmul.f32 %v2575_v26, %v2575_v26 }
 0xd16   :  { %v2590_v18 = vsel %vm174_vm1, %v2582_v14, 0.0 }
 0xd17   :  { %2591 = vadd.xlane.f32.xlu0 %v2590_v18  ;;  %v2587_v5 = vsel %vm174_vm1, %v2581_v62, 0.0 }
 0xd18   :  { %2588 = vadd.xlane.f32.xlu1 %v2587_v5  ;;  %v2803_v5 = vld [vmem:[%s9661_s1 + $0x130] sm:$0xff] }
 0xd19   :  { %v7080_v27 = vpack.c.bf16 %v2804_v19, %v2803_v5 }
 0xd71   :  { %v2559_v17 = vpop.xlane.xlu0 %2558 }
 0xd72   :  { %v2571_v58 = vmul.f32 0.03125, %v2559_v17  ;;  %v2805_v17 = vld [vmem:[%s9661_s1 + $0x140] sm:$0xff] }
 0xd74   :  { %v2577_v1 = vsub.f32 %v8641_v60, %v2571_v58  ;;  %v2806_v58 = vld [vmem:[%s9661_s1 + $0x148] sm:$0xff] }
 0xd75   :  { %v2562_v42 = vpop.xlane.xlu0 %2561 }
 0xd76   :  { %v2572_v37 = vmul.f32 0.03125, %v2562_v42  ;;  %v2583_v9 = vmul.f32 %v2577_v1, %v2577_v1 }
 0xd78   :  { %v2578_v22 = vsub.f32 %v8643_v51, %v2572_v37  ;;  %v2593_v55 = vsel %vm174_vm1, %v2583_v9, 0.0  ;;  %v2807_v37 = vld [vmem:[%s9661_s1 + $0x150] sm:$0xff]  ;;  %v2808_v9 = vld [vmem:[%s9661_s1 + $0x158] sm:$0xff] }
 0xd79   :  { %2594 = vadd.xlane.f32.xlu1 %v2593_v55 }
 0xd7a   :  { %v2584_v36 = vmul.f32 %v2578_v22, %v2578_v22 }
 0xd7c   :  { %v2596_v48 = vsel %vm174_vm1, %v2584_v36, 0.0 }
 0xd7d   :  { %2597 = vadd.xlane.f32.xlu0 %v2596_v48 }
 0xd9e   :  { %v2568_v49 = vpop.xlane.xlu0 %2567 }
 0xd9f   :  { %v2574_v44 = vmul.f32 0.03125, %v2568_v49  ;;  %v2565_v12 = vpop.xlane.xlu1 %2564 }
 0xda0   :  { %v2573_v46 = vmul.f32 0.03125, %v2565_v12 }
 0xda1   :  { %v8680_v8 = vsub.f32 %v8651_v21, %v2574_v44 }
 0xda2   :  { %v8683_v10 = vsub.f32 %v8653_v61, %v2573_v46 }
 0xda3   :  { %v2586_v59 = vmul.f32 %v8680_v8, %v8680_v8 }
 0xda4   :  { %v2592_v43 = vpop.xlane.xlu0 %2591  ;;  %v2585_v16 = vmul.f32 %v8683_v10, %v8683_v10 }
 0xda5   :  { %v2606_v63 = vmul.f32 0.03125, %v2592_v43  ;;  %v2589_v23 = vpop.xlane.xlu1 %2588  ;;  %v2602_v6 = vsel %vm174_vm1, %v2586_v59, 0.0 }
 0xda6   :  { %v2605_v33 = vmul.f32 0.03125, %v2589_v23  ;;  %2603 = vadd.xlane.f32.xlu0 %v2602_v6  ;;  %v2599_v34 = vsel %vm174_vm1, %v2585_v16, 0.0 }
 0xda7   :  { %v2612_v20 = vadd.f32 1e-06, %v2606_v63  ;;  %2600 = vadd.xlane.f32.xlu1 %v2599_v34  ;;  %v5910_v34 = vld [vmem:[%s9662_s2 + $0x37] ss:$0 sm:$0xff] }
 0xda8   :  { %v2611_v13 = vadd.f32 1e-06, %v2605_v33 }
 0xda9   :  { %7484 = vrsqrt.f32 %v2612_v20 }
 0xdaa   :  { %7486 = vrsqrt.f32 %v2611_v13 }
 0xdb3   :  { %v7485_v35 = vpop.eup %7484 }
 0xdb4   :  { %v7487_v57 = vpop.eup %7486  ;;  %v2624_v38 = vmul.f32 %v7485_v35, %v2576_v31  ;;  %v2802_v31 = vld [vmem:[%s9661_s1 + $0x128] sm:$0xff] }
 0xdb5   :  { %v2623_v56 = vmul.f32 %v7487_v57, %v2575_v26  ;;  %v7076_v14 = vpack.c.bf16 %v2802_v31, %v2801_v54 }
 0xdb6   :  { %v2634_v39 = vmul.f32 %v8694_v29, %v2624_v38 }
 0xdb7   :  { %v2633_v40 = vmul.f32 %v8694_v29, %v2623_v56  ;;  %7077 = vmatprep.subr.bf16.mxu1 %v7076_v14 }
 0xdb8   :  { %v2644_v25 = vadd.f32 %v5909_v0, %v2634_v39  ;;  %7079 = vmatpush3.bf16.msra.mxu1 %v7076_v14 }
 0xdb9   :  { %v2643_v32 = vadd.f32 %v5909_v0, %v2633_v40  ;;  %7081 = vmatprep.subr.bf16.mxu1 %v7080_v27 }
 0xdbb   :  { %6599 = vmatprep.mubr.msk.f32.mxu0 %vm174_vm1, %v2643_v32 }
 0xdbc   :  { %6600 = vmatmul.mubr.msk.f32.vlgmr.msra.gmra.mrb[46].mxu0 %vm174_vm1, %v2644_v25  ;;  %7083 = vmatpush3.bf16.msra.mxu1 %v7080_v27 }
 0xe06   :  { %v2595_v2 = vpop.xlane.xlu1 %2594 }
 0xe07   :  { %v2607_v50 = vmul.f32 0.03125, %v2595_v2 }
 0xe09   :  { %v2613_v15 = vadd.f32 1e-06, %v2607_v50 }
 0xe0a   :  { %v2598_v52 = vpop.xlane.xlu0 %2597 }
 0xe0b   :  { %7488 = vrsqrt.f32 %v2613_v15  ;;  %v2608_v30 = vmul.f32 0.03125, %v2598_v52 }
 0xe0d   :  { %v2614_v47 = vadd.f32 1e-06, %v2608_v30 }
 0xe0f   :  { %7490 = vrsqrt.f32 %v2614_v47 }
 0xe15   :  { %v7489_v26 = vpop.eup %7488 }
 0xe16   :  { %v2625_v62 = vmul.f32 %v7489_v26, %v2577_v1  ;;  %v7084_v1 = vpack.c.bf16 %v2806_v58, %v2805_v17 }
 0xe18   :  { %v2635_v18 = vmul.f32 %v8694_v29, %v2625_v62  ;;  %7085 = vmatprep.subr.bf16.mxu1 %v7084_v1 }
 0xe19   :  { %v7491_v4 = vpop.eup %7490  ;;  %7087 = vmatpush3.bf16.msra.mxu1 %v7084_v1 }
 0xe1a   :  { %v2645_v11 = vadd.f32 %v5909_v0, %v2635_v18  ;;  %v2626_v7 = vmul.f32 %v7491_v4, %v2578_v22  ;;  %v7088_v22 = vpack.c.bf16 %v2808_v9, %v2807_v37 }
 0xe1c   :  { %6602 = vmatprep.mubr.msk.f32.mxu0 %vm174_vm1, %v2645_v11  ;;  %v2636_v24 = vmul.f32 %v8694_v29, %v2626_v7  ;;  %7089 = vmatprep.subr.bf16.mxu1 %v7088_v22 }
 0xe1d   :  { %7091 = vmatpush3.bf16.msra.mxu1 %v7088_v22 }
 0xe1e   :  { %v2646_v42 = vadd.f32 %v5909_v0, %v2636_v24  ;;  %7104 = vmatprep.subr.bf16.mxu1 %v7668_v3 }
 0xe20   :  { %6603 = vmatmul.mubr.msk.f32.gmra.mrb[48].mxu0 %vm174_vm1, %v2646_v42 }
 0xe33   :  { %v2604_v55 = vpop.xlane.xlu0 %2603 }
 0xe34   :  { %v2610_v36 = vmul.f32 0.03125, %v2604_v55  ;;  %v2601_v48 = vpop.xlane.xlu1 %2600 }
 0xe35   :  { %v2609_v49 = vmul.f32 0.03125, %v2601_v48 }
 0xe36   :  { %v2616_v44 = vadd.f32 1e-06, %v2610_v36 }
 0xe37   :  { %v2615_v12 = vadd.f32 1e-06, %v2609_v49  ;;  %v5923_v49 = vld [vmem:[%s9662_s2 + $0x38] ss:$0 sm:$0xff] }
 0xe38   :  { %7492 = vrsqrt.f32 %v2616_v44 }
 0xe39   :  { %7494 = vrsqrt.f32 %v2615_v12 }
 0xe42   :  { %v7493_v46 = vpop.eup %7492 }
 0xe43   :  { %v7495_v59 = vpop.eup %7494  ;;  %v2628_v43 = vmul.f32 %v7493_v46, %v8680_v8 }
 0xe44   :  { %v2627_v16 = vmul.f32 %v7495_v59, %v8683_v10 }
 0xe45   :  { %v2638_v63 = vmul.f32 %v8694_v29, %v2628_v43 }
 0xe46   :  { %v2637_v23 = vmul.f32 %v8694_v29, %v2627_v16 }
 0xe47   :  { %v2648_v33 = vadd.f32 %v5909_v0, %v2638_v63 }
 0xe48   :  { %v2647_v6 = vadd.f32 %v5909_v0, %v2637_v23 }
 0xe4a   :  { %6605 = vmatprep.mubr.msk.f32.mxu0 %vm174_vm1, %v2647_v6 }
 0xe4b   :  { %6606 = vmatmul.mubr.msk.f32.gmra.mrb[50].mxu0 %vm174_vm1, %v2648_v33 }
 0xe8f   :  { %v6601_v20 = vpop.f32.mrb[46].mxu0 }
 0xe90   :  { %v2748_v13 = vadd.f32 %v6601_v20, %v5910_v34  ;;  %v2742_v35 = vpop.f32.mrb[47].mxu0 }
 0xe91   :  { %v2743_v8 = vadd.f32 %v5910_v34, %v2742_v35 }
 0xe92   :  { %v2778_v57 = vmul.f32 0.70710677, %v2748_v13  ;;  %v2772_v40 = vmul.f32 0.5, %v2748_v13 }
 0xe93   :  { %v2777_v10 = vmul.f32 0.70710677, %v2743_v8  ;;  %v2771_v39 = vmul.f32 0.5, %v2743_v8 }
 0xe94   :  { %7496 = verf.f32 %v2778_v57 }
 0xe95   :  { %7498 = verf.f32 %v2777_v10 }
 0xe9e   :  { %v7497_v38 = vpop.eup %7496 }
 0xe9f   :  { %v7499_v29 = vpop.eup %7498  ;;  %v2790_v56 = vadd.f32 1.0, %v7497_v38 }
 0xea0   :  { %v2789_v0 = vadd.f32 1.0, %v7499_v29 }
 0xea1   :  { %v2796_v25 = vmul.f32 %v2790_v56, %v2772_v40 }
 0xea2   :  { %v2795_v32 = vmul.f32 %v2789_v0, %v2771_v39 }
 0xea4   :  { %6624 = vmatprep.mubr.msk.f32.mxu1 %vm57_vm0, %v2795_v32 }
 0xea5   :  { %6625 = vmatmul.mubr.msk.f32.vlgmr.msra.gmra.mrb[74].mxu1 %vm57_vm0, %v2796_v25 }
 0xef3   :  { %v6604_v2 = vpop.f32.mrb[48].mxu0 }
 0xef4   :  { %v2758_v50 = vadd.f32 %v6604_v2, %v5910_v34  ;;  %v2752_v15 = vpop.f32.mrb[49].mxu0 }
 0xef5   :  { %v2753_v52 = vadd.f32 %v5910_v34, %v2752_v15  ;;  %v3039_v15 = vld [vmem:[%s9661_s1 + $0x160] sm:$0xff] }
 0xef6   :  { %v2780_v30 = vmul.f32 0.70710677, %v2758_v50  ;;  %v2774_v18 = vmul.f32 0.5, %v2758_v50 }
 0xef7   :  { %v2779_v47 = vmul.f32 0.70710677, %v2753_v52  ;;  %v2773_v14 = vmul.f32 0.5, %v2753_v52  ;;  %v3040_v52 = vld [vmem:[%s9661_s1 + $0x168] sm:$0xff] }
 0xef8   :  { %7500 = verf.f32 %v2780_v30  ;;  %v7092_v30 = vpack.c.bf16 %v3040_v52, %v3039_v15 }
 0xef9   :  { %7502 = verf.f32 %v2779_v47  ;;  %v3041_v47 = vld [vmem:[%s9661_s1 + $0x170] sm:$0xff] }
 0xefa   :  { %7093 = vmatprep.subr.bf16.mxu0 %v7092_v30 }
 0xefb   :  { %7095 = vmatpush3.bf16.msra.mxu0 %v7092_v30 }
 0xf02   :  { %v7501_v54 = vpop.eup %7500 }
 0xf03   :  { %v7503_v31 = vpop.eup %7502  ;;  %v2792_v26 = vadd.f32 1.0, %v7501_v54  ;;  %v3042_v54 = vld [vmem:[%s9661_s1 + $0x178] sm:$0xff] }
 0xf04   :  { %v2791_v62 = vadd.f32 1.0, %v7503_v31  ;;  %v7096_v31 = vpack.c.bf16 %v3042_v54, %v3041_v47 }
 0xf05   :  { %v2798_v19 = vmul.f32 %v2792_v26, %v2774_v18 }
 0xf06   :  { %v2797_v5 = vmul.f32 %v2791_v62, %v2773_v14  ;;  %7097 = vmatprep.subr.bf16.mxu0 %v7096_v31 }
 0xf07   :  { %7099 = vmatpush3.bf16.msra.mxu0 %v7096_v31 }
 0xf08   :  { %6627 = vmatprep.mubr.msk.f32.mxu1 %vm57_vm0, %v2797_v5  ;;  %7100 = vmatprep.subr.bf16.mxu0 %v7668_v3 }
 0xf09   :  { %6628 = vmatmul.mubr.msk.f32.gmra.mrb[76].mxu1 %vm57_vm0, %v2798_v19 }
 0xf1e   :  { %v6607_v4 = vpop.f32.mrb[50].mxu0 }
 0xf1f   :  { %v2768_v27 = vadd.f32 %v6607_v4, %v5910_v34  ;;  %v2762_v11 = vpop.f32.mrb[51].mxu0 }
 0xf20   :  { %v2763_v7 = vadd.f32 %v5910_v34, %v2762_v11 }
 0xf21   :  { %v2782_v24 = vmul.f32 0.70710677, %v2768_v27  ;;  %v2776_v22 = vmul.f32 0.5, %v2768_v27 }
 0xf22   :  { %v2781_v17 = vmul.f32 0.70710677, %v2763_v7  ;;  %v2775_v37 = vmul.f32 0.5, %v2763_v7 }
 0xf23   :  { %7504 = verf.f32 %v2782_v24 }
 0xf24   :  { %7506 = verf.f32 %v2781_v17 }
 0xf2d   :  { %v7505_v58 = vpop.eup %7504 }
 0xf2e   :  { %v7507_v1 = vpop.eup %7506  ;;  %v2794_v42 = vadd.f32 1.0, %v7505_v58 }
 0xf2f   :  { %v2793_v9 = vadd.f32 1.0, %v7507_v1 }
 0xf30   :  { %v2800_v36 = vmul.f32 %v2794_v42, %v2776_v22 }
 0xf31   :  { %v2799_v55 = vmul.f32 %v2793_v9, %v2775_v37 }
 0xf33   :  { %6630 = vmatprep.mubr.msk.f32.mxu1 %vm57_vm0, %v2799_v55 }
 0xf34   :  { %6631 = vmatmul.mubr.msk.f32.gmra.mrb[78].mxu1 %vm57_vm0, %v2800_v36 }
 0xf35   :  { %6671 = vmatprep.mubr.msk.f32.mxu1 %vm7670_vm2, %v7671_v45 }
 0xf78   :  { %v6626_v48 = vpop.f32.mrb[74].mxu1 }
 0xf79   :  { %v2923_v44 = vadd.f32 %v6626_v48, %v8631_v28  ;;  %v2893_v12 = vpop.f32.mrb[75].mxu1 }
 0xf7a   :  { %v2922_v46 = vadd.f32 %v2893_v12, %v8633_v41 }
 0xf7b   :  { %v8754_v59 = vadd.f32 %v5923_v49, %v2923_v44 }
 0xf7c   :  { %v8756_v43 = vadd.f32 %v5923_v49, %v2922_v46 }
 0xf7d   :  { %v2944_v16 = vsel %vm174_vm1, %v8754_v59, 0.0 }
 0xf7e   :  { %2945 = vadd.xlane.f32.xlu0 %v2944_v16  ;;  %v2941_v63 = vsel %vm174_vm1, %v8756_v43, 0.0 }
 0xf7f   :  { %2942 = vadd.xlane.f32.xlu1 %v2941_v63 }
 0xfdc   :  { %v6629_v23 = vpop.f32.mrb[76].mxu1 }
 0xfdd   :  { %v2925_v6 = vadd.f32 %v6629_v23, %v8643_v51  ;;  %v2903_v33 = vpop.f32.mrb[77].mxu1  ;;  %v5924_v23 = vld [vmem:[%s9662_s2 + $0x39] ss:$0 sm:$0xff] }
 0xfde   :  { %v2924_v28 = vadd.f32 %v2903_v33, %v8641_v60 }
 0xfdf   :  { %v8764_v34 = vadd.f32 %v5923_v49, %v2925_v6 }
 0xfe0   :  { %v8766_v41 = vadd.f32 %v5923_v49, %v2924_v28 }
 0xfe1   :  { %v2950_v20 = vsel %vm174_vm1, %v8764_v34, 0.0 }
 0xfe2   :  { %2951 = vadd.xlane.f32.xlu0 %v2950_v20  ;;  %v2947_v13 = vsel %vm174_vm1, %v8766_v41, 0.0 }
 0xfe3   :  { %2948 = vadd.xlane.f32.xlu1 %v2947_v13  ;;  %v5925_v13 = vld [vmem:[%s9662_s2 + $0x3a] ss:$0 sm:$0xff] }
0x1007   :  { %v6632_v35 = vpop.f32.mrb[78].mxu1 }
0x1008   :  { %v2927_v8 = vadd.f32 %v6632_v35, %v8651_v21  ;;  %v2913_v57 = vpop.f32.mrb[79].mxu1 }
0x1009   :  { %v2926_v51 = vadd.f32 %v2913_v57, %v8653_v61 }
0x100a   :  { %v8774_v10 = vadd.f32 %v5923_v49, %v2927_v8 }
0x100b   :  { %v8776_v60 = vadd.f32 %v5923_v49, %v2926_v51  ;;  %v2946_v38 = vpop.xlane.xlu0 %2945 }
0x100c   :  { %v2960_v29 = vmul.f32 0.03125, %v2946_v38  ;;  %v2943_v56 = vpop.xlane.xlu1 %2942  ;;  %v2956_v39 = vsel %vm174_vm1, %v8774_v10, 0.0 }
0x100d   :  { %v2959_v0 = vmul.f32 0.03125, %v2943_v56  ;;  %2957 = vadd.xlane.f32.xlu0 %v2956_v39  ;;  %v2953_v40 = vsel %vm174_vm1, %v8776_v60, 0.0 }
0x100e   :  { %v2966_v21 = vsub.f32 %v8754_v59, %v2960_v29  ;;  %2954 = vadd.xlane.f32.xlu1 %v2953_v40 }
0x100f   :  { %v2965_v61 = vsub.f32 %v8756_v43, %v2959_v0 }
0x1010   :  { %v2972_v32 = vmul.f32 %v2966_v21, %v2966_v21 }
0x1011   :  { %v2971_v25 = vmul.f32 %v2965_v61, %v2965_v61 }
0x1012   :  { %v2980_v2 = vsel %vm174_vm1, %v2972_v32, 0.0 }
0x1013   :  { %2981 = vadd.xlane.f32.xlu0 %v2980_v2  ;;  %v2977_v50 = vsel %vm174_vm1, %v2971_v25, 0.0 }
0x1014   :  { %2978 = vadd.xlane.f32.xlu1 %v2977_v50 }
0x106f   :  { %v2952_v26 = vpop.xlane.xlu0 %2951 }
0x1070   :  { %v2962_v14 = vmul.f32 0.03125, %v2952_v26  ;;  %v2949_v62 = vpop.xlane.xlu1 %2948 }
0x1071   :  { %v2961_v18 = vmul.f32 0.03125, %v2949_v62 }
0x1072   :  { %v2968_v5 = vsub.f32 %v8764_v34, %v2962_v14 }
0x1073   :  { %v2967_v19 = vsub.f32 %v8766_v41, %v2961_v18 }
0x1074   :  { %v2974_v4 = vmul.f32 %v2968_v5, %v2968_v5 }
0x1075   :  { %v2973_v27 = vmul.f32 %v2967_v19, %v2967_v19 }
0x1076   :  { %v2986_v11 = vsel %vm174_vm1, %v2974_v4, 0.0 }
0x1077   :  { %2987 = vadd.xlane.f32.xlu0 %v2986_v11  ;;  %v2983_v7 = vsel %vm174_vm1, %v2973_v27, 0.0 }
0x1078   :  { %2984 = vadd.xlane.f32.xlu1 %v2983_v7  ;;  %v5926_v7 = vld [vmem:[%s9662_s2 + $0x3b] ss:$0 sm:$0xff] }
0x109a   :  { %v2958_v24 = vpop.xlane.xlu0 %2957 }
0x109b   :  { %v2964_v17 = vmul.f32 0.03125, %v2958_v24  ;;  %v2955_v58 = vpop.xlane.xlu1 %2954 }
0x109c   :  { %v2963_v1 = vmul.f32 0.03125, %v2955_v58 }
0x109d   :  { %v2970_v42 = vsub.f32 %v8774_v10, %v2964_v17 }
0x109e   :  { %v2969_v37 = vsub.f32 %v8776_v60, %v2963_v1 }
0x109f   :  { %v2976_v9 = vmul.f32 %v2970_v42, %v2970_v42 }
0x10a0   :  { %v2982_v22 = vpop.xlane.xlu0 %2981  ;;  %v2975_v55 = vmul.f32 %v2969_v37, %v2969_v37 }
0x10a1   :  { %v2996_v36 = vmul.f32 0.03125, %v2982_v22  ;;  %v2979_v48 = vpop.xlane.xlu1 %2978  ;;  %v2992_v49 = vsel %vm174_vm1, %v2976_v9, 0.0 }
0x10a2   :  { %v2995_v44 = vmul.f32 0.03125, %v2979_v48  ;;  %2993 = vadd.xlane.f32.xlu0 %v2992_v49  ;;  %v2989_v12 = vsel %vm174_vm1, %v2975_v55, 0.0 }
0x10a3   :  { %v3002_v46 = vadd.f32 1e-06, %v2996_v36  ;;  %2990 = vadd.xlane.f32.xlu1 %v2989_v12 }
0x10a4   :  { %v3001_v16 = vadd.f32 1e-06, %v2995_v44 }
0x10a5   :  { %7508 = vrsqrt.f32 %v3002_v46 }
0x10a6   :  { %7510 = vrsqrt.f32 %v3001_v16 }
0x10af   :  { %v7509_v63 = vpop.eup %7508 }
0x10b0   :  { %v7511_v6 = vpop.eup %7510  ;;  %v3014_v33 = vmul.f32 %v7509_v63, %v2966_v21 }
0x10b1   :  { %v3013_v28 = vmul.f32 %v7511_v6, %v2965_v61 }
0x10b2   :  { %v3024_v20 = vmul.f32 %v5924_v23, %v3014_v33 }
0x10b3   :  { %v3023_v35 = vmul.f32 %v5924_v23, %v3013_v28 }
0x10b4   :  { %v3034_v57 = vadd.f32 %v5925_v13, %v3024_v20 }
0x10b5   :  { %v3033_v8 = vadd.f32 %v5925_v13, %v3023_v35 }
0x10b7   :  { %6641 = vmatprep.mubr.msk.f32.mxu0 %vm174_vm1, %v3033_v8 }
0x10b8   :  { %6642 = vmatmul.mubr.msk.f32.vlgmr.msra.gmra.mrb[52].mxu0 %vm174_vm1, %v3034_v57 }
0x1104   :  { %v2988_v51 = vpop.xlane.xlu0 %2987 }
0x1105   :  { %v2998_v38 = vmul.f32 0.03125, %v2988_v51  ;;  %v2985_v29 = vpop.xlane.xlu1 %2984 }
0x1106   :  { %v2997_v56 = vmul.f32 0.03125, %v2985_v29 }
0x1107   :  { %v3004_v39 = vadd.f32 1e-06, %v2998_v38 }
0x1108   :  { %v3003_v0 = vadd.f32 1e-06, %v2997_v56 }
0x1109   :  { %7512 = vrsqrt.f32 %v3004_v39 }
0x110a   :  { %7514 = vrsqrt.f32 %v3003_v0 }
0x1113   :  { %v7513_v40 = vpop.eup %7512 }
0x1114   :  { %v7515_v21 = vpop.eup %7514  ;;  %v3016_v61 = vmul.f32 %v7513_v40, %v2968_v5 }
0x1115   :  { %v3015_v32 = vmul.f32 %v7515_v21, %v2967_v19 }
0x1116   :  { %v3026_v25 = vmul.f32 %v5924_v23, %v3016_v61 }
0x1117   :  { %v3025_v2 = vmul.f32 %v5924_v23, %v3015_v32 }
0x1118   :  { %v3036_v15 = vadd.f32 %v5925_v13, %v3026_v25 }
0x1119   :  { %v3035_v50 = vadd.f32 %v5925_v13, %v3025_v2 }
0x111b   :  { %6644 = vmatprep.mubr.msk.f32.mxu0 %vm174_vm1, %v3035_v50 }
0x111c   :  { %6645 = vmatmul.mubr.msk.f32.gmra.mrb[54].mxu0 %vm174_vm1, %v3036_v15 }
0x112f   :  { %v2994_v52 = vpop.xlane.xlu0 %2993 }
0x1130   :  { %v3000_v30 = vmul.f32 0.03125, %v2994_v52  ;;  %v2991_v47 = vpop.xlane.xlu1 %2990 }
0x1131   :  { %v2999_v54 = vmul.f32 0.03125, %v2991_v47 }
0x1132   :  { %v3006_v31 = vadd.f32 1e-06, %v3000_v30 }
0x1133   :  { %v3005_v26 = vadd.f32 1e-06, %v2999_v54 }
0x1134   :  { %7516 = vrsqrt.f32 %v3006_v31 }
0x1135   :  { %7518 = vrsqrt.f32 %v3005_v26 }
0x113e   :  { %v7517_v14 = vpop.eup %7516 }
0x113f   :  { %v7519_v62 = vpop.eup %7518  ;;  %v3018_v18 = vmul.f32 %v7517_v14, %v2970_v42 }
0x1140   :  { %v3017_v5 = vmul.f32 %v7519_v62, %v2969_v37 }
0x1141   :  { %v3028_v19 = vmul.f32 %v5924_v23, %v3018_v18 }
0x1142   :  { %v3027_v4 = vmul.f32 %v5924_v23, %v3017_v5 }
0x1143   :  { %v3038_v11 = vadd.f32 %v5925_v13, %v3028_v19 }
0x1144   :  { %v3037_v27 = vadd.f32 %v5925_v13, %v3027_v4 }
0x1146   :  { %6647 = vmatprep.mubr.msk.f32.mxu0 %vm174_vm1, %v3037_v27 }
0x1147   :  { %6648 = vmatmul.mubr.msk.f32.gmra.mrb[56].mxu0 %vm174_vm1, %v3038_v11 }
0x1148   :  { %6656 = vmatprep.mubr.msk.f32.mxu0 %vm7670_vm2, %v7671_v45 }
0x118b   :  { %v6643_v24 = vpop.f32.mrb[52].mxu0 }
0x118c   :  { %v8824_v17 = vadd.f32 %v6643_v24, %v5926_v7  ;;  %v3132_v58 = vpop.f32.mrb[53].mxu0 }
0x118d   :  { %v8826_v1 = vadd.f32 %v5926_v7, %v3132_v58 }
0x118f   :  { %v7296_v42 = vpack.i.bf16 %v8824_v17, %v8826_v1 }
0x1191   :  { %7297 = vrot.lane.b32.xlu1 %v7296_v42, %s7669_s28 }
0x1195   :  { %7302 = vrot.lane.b32.xlu1 %v7296_v42, %s7673_s5 }
0x11ef   :  { %v6646_v37 = vpop.f32.mrb[54].mxu0 }
0x11f0   :  { %v3142_v9 = vpop.f32.mrb[55].mxu0  ;;  %v8863_v46 = vadd.f32 %v6646_v37, %v5926_v7 }
0x11f1   :  { %v8832_v22 = vadd.f32 %v5926_v7, %v3142_v9 }
0x11f3   :  { %3409 = vrot.lane.b32.xlu1 %v8832_v22, %s7673_s5  ;;  %3168 = vrot.lane.b32.xlu0 %v8832_v22, %s7669_s28 }
0x11f7   :  { %3399 = vrot.lane.b32.xlu1 %v8826_v1, %s7674_s6  ;;  %7307 = vrot.lane.b32.xlu0 %v7296_v42, %s7676_s7 }
0x11fb   :  { %3403 = vrot.lane.b32.xlu1 %v8832_v22, %s7674_s6  ;;  %3401 = vrot.lane.b32.xlu0 %v8824_v17, %s7674_s6 }
0x11ff   :  { %7312 = vrot.lane.b32.xlu1 %v7296_v42, %s7677_s8  ;;  %3650 = vrot.lane.b32.xlu0 %v8832_v22, %s7676_s7 }
0x1203   :  { %3642 = vrot.lane.b32.xlu1 %v8824_v17, %s7678_s9  ;;  %3640 = vrot.lane.b32.xlu0 %v8826_v1, %s7678_s9  ;;  %v7298_v55 = vpop.permute.xlu1 %7297 }
0x1204   :  { %v7300_v36 = vunpack.i.h.bf16 %v7298_v55  ;;  %v7299_v48 = vunpack.i.l.bf16 %v7298_v55 }
0x1206   :  { %v7101_v49 = vpack.c.bf16 %v7300_v36, %v7299_v48 }
0x1207   :  { %3891 = vrot.lane.b32.xlu1 %v8832_v22, %s7677_s8  ;;  %3644 = vrot.lane.b32.xlu0 %v8832_v22, %s7678_s9  ;;  %v7303_v6 = vpop.permute.xlu1 %7302 }
0x1208   :  { %7103 = vmatpush3.bf16.xpose.msk.msra.mxu0 %vm7957_vm4, %v7101_v49  ;;  %v7305_v33 = vunpack.i.h.bf16 %v7303_v6  ;;  %v7304_v28 = vunpack.i.l.bf16 %v7303_v6 }
0x1209   :  { %6654 = vmatprep.subr.mxu0 %v7671_v45 }
0x120a   :  { %v7108_v35 = vpack.c.bf16 %v7305_v33, %v7304_v28 }
0x120b   :  { %3881 = vrot.lane.b32.xlu1 %v8826_v1, %s7679_s10 }
0x120f   :  { %3885 = vrot.lane.b32.xlu1 %v8832_v22, %s7679_s10 }
0x121a   :  { %v6649_v44 = vpop.f32.mrb[56].mxu0 }
0x121b   :  { %v3152_v12 = vpop.f32.mrb[57].mxu0  ;;  %v8879_v23 = vadd.f32 %v6649_v44, %v5926_v7 }
0x121c   :  { %v8865_v16 = vadd.f32 %v5926_v7, %v3152_v12 }
0x121e   :  { %v8869_v63 = vpack.i.bf16 %v8865_v16, %v8863_v46 }
0x1220   :  { %7322 = vrot.lane.b32.xlu1 %v8869_v63, %s7673_s5  ;;  %7317 = vrot.lane.b32.xlu0 %v8869_v63, %s7669_s28 }
0x1224   :  { %7327 = vrot.lane.b32.xlu1 %v8869_v63, %s7676_s7  ;;  %3883 = vrot.lane.b32.xlu0 %v8824_v17, %s7679_s10 }
0x1228   :  { %4407 = vrot.lane.b32.xlu1 %v8865_v16, %s7674_s6  ;;  %4174 = vrot.lane.b32.xlu0 %v8879_v23, %s7669_s28 }
0x122c   :  { %4656 = vrot.lane.b32.xlu1 %v8879_v23, %s7676_s7  ;;  %4415 = vrot.lane.b32.xlu0 %v8879_v23, %s7673_s5 }
0x1230   :  { %4646 = vrot.lane.b32.xlu1 %v8863_v46, %s7678_s9  ;;  %4405 = vrot.lane.b32.xlu0 %v8863_v46, %s7674_s6 }
0x1234   :  { %4650 = vrot.lane.b32.xlu1 %v8879_v23, %s7678_s9  ;;  %4409 = vrot.lane.b32.xlu0 %v8879_v23, %s7674_s6  ;;  %s7685_s6 = smov [#allocation2]  }
0x1238   :  { %4887 = vrot.lane.b32.xlu1 %v8863_v46, %s7679_s10  ;;  %7332 = vrot.lane.b32.xlu0 %v8869_v63, %s7677_s8 }
0x123c   :  { %3305 = vrot.lane.b32.xlu1 %v8832_v22, %s7672_s4  ;;  %4648 = vrot.lane.b32.xlu0 %v8865_v16, %s7678_s9 }
0x1240   :  { %7342 = vrot.lane.b32.xlu1 %v7296_v42, %s7675_s0  ;;  %4897 = vrot.lane.b32.xlu0 %v8879_v23, %s7677_s8 }
0x1244   :  { %7347 = vrot.lane.b32.xlu1 %v7296_v42, %s7680_s11  ;;  %7337 = vrot.lane.b32.xlu0 %v7296_v42, %s7672_s4 }
0x1248   :  { %7352 = vrot.lane.b32.xlu1 %v7296_v42, %s7681_s12  ;;  %3546 = vrot.lane.b32.xlu0 %v8832_v22, %s7675_s0 }
0x124c   :  { %3787 = vrot.lane.b32.xlu0 %v8832_v22, %s7680_s11 }
0x1250   :  { %4028 = vrot.lane.b32.xlu0 %v8832_v22, %s7681_s12 }
0x1265   :  { %v3169_v20 = vpop.permute.xlu0 %3168  ;;  %v3410_v13 = vpop.permute.xlu1 %3409 }
0x1266   :  { %6655 = vmatpush3.xpose.msk.msra.mxu0 %vm405_vm3, %v3169_v20 }
0x1267   :  { %7107 = vmatprep.subr.bf16.mxu0 %v7668_v3 }
0x1269   :  { %6657 = vmatmul.mubr.msk.f32.vlgmr.msra.gmra.mrb[58].mxu0 %vm405_vm3, %v8826_v1  ;;  %v3400_v8 = vpop.permute.xlu1 %3399  ;;  %v7308_v57 = vpop.permute.xlu0 %7307 }
0x126a   :  { %7110 = vmatpush3.bf16.xpose.msk.msra.mxu0 %vm7957_vm4, %v7108_v35  ;;  %6659 = vmatprep.mubr.msk.f32.mxu0 %vm7670_vm2, %v7671_v45  ;;  %v7310_v51 = vunpack.i.h.bf16 %v7308_v57  ;;  %v7309_v38 = vunpack.i.l.bf16 %v7308_v57  ;;  %v9030_v57 = vld [vmem:[%s9662_s2] ss:$0 sm:$0xff] }
0x126b   :  { %6684 = vmatprep.subr.mxu0 %v7671_v45 }
0x126c   :  { %v7115_v56 = vpack.c.bf16 %v7310_v51, %v7309_v38 }
0x126d   :  { %6660 = vmatmul.mubr.msk.f32.gmra.mrb[60].mxu0 %vm405_vm3, %v8824_v17  ;;  %v3404_v29 = vpop.permute.xlu1 %3403  ;;  %v3402_v39 = vpop.permute.xlu0 %3401 }
0x126e   :  { %6662 = vmatprep.mubr.msk.f32.mxu0 %vm7670_vm2, %v7671_v45 }
0x1271   :  { %6663 = vmatmul.mubr.msk.f32.gmra.mrb[62].mxu0 %vm405_vm3, %v8832_v22  ;;  %v7313_v0 = vpop.permute.xlu1 %7312  ;;  %v3651_v40 = vpop.permute.xlu0 %3650 }
0x1272   :  { %6685 = vmatpush3.xpose.msk.msra.mxu0 %vm405_vm3, %v3410_v13  ;;  %6686 = vmatprep.mubr.msk.f32.mxu0 %vm7670_vm2, %v7671_v45  ;;  %v7315_v21 = vunpack.i.h.bf16 %v7313_v0  ;;  %v7314_v61 = vunpack.i.l.bf16 %v7313_v0 }
0x1273   :  { %7114 = vmatprep.subr.bf16.mxu0 %v7668_v3 }
0x1274   :  { %v7122_v25 = vpack.c.bf16 %v7315_v21, %v7314_v61 }
0x1275   :  { %6687 = vmatmul.mubr.msk.f32.vlgmr.msra.gmra.mrb[64].mxu0 %vm405_vm3, %v3400_v8  ;;  %v3643_v32 = vpop.permute.xlu1 %3642  ;;  %v3641_v2 = vpop.permute.xlu0 %3640 }
0x1276   :  { %7117 = vmatpush3.bf16.xpose.msk.msra.mxu0 %vm7957_vm4, %v7115_v56  ;;  %6689 = vmatprep.mubr.msk.f32.mxu0 %vm7670_vm2, %v7671_v45 }
0x1277   :  { %6714 = vmatprep.subr.mxu0 %v7671_v45 }
0x1279   :  { %6690 = vmatmul.mubr.msk.f32.gmra.mrb[66].mxu0 %vm405_vm3, %v3402_v39  ;;  %v3892_v50 = vpop.permute.xlu1 %3891  ;;  %v3645_v15 = vpop.permute.xlu0 %3644 }
0x127a   :  { %6692 = vmatprep.mubr.msk.f32.mxu0 %vm7670_vm2, %v7671_v45 }
0x127d   :  { %6693 = vmatmul.mubr.msk.f32.gmra.mrb[68].mxu0 %vm405_vm3, %v3404_v29  ;;  %v3882_v52 = vpop.permute.xlu1 %3881 }
0x127e   :  { %6715 = vmatpush3.xpose.msk.msra.mxu0 %vm405_vm3, %v3651_v40  ;;  %6716 = vmatprep.mubr.msk.f32.mxu0 %vm7670_vm2, %v7671_v45 }
0x127f   :  { %7121 = vmatprep.subr.bf16.mxu0 %v7668_v3 }
0x1281   :  { %6717 = vmatmul.mubr.msk.f32.vlgmr.msra.gmra.mrb[70].mxu0 %vm405_vm3, %v3641_v2  ;;  %v3886_v30 = vpop.permute.xlu1 %3885 }
0x1282   :  { %7124 = vmatpush3.bf16.xpose.msk.msra.mxu0 %vm7957_vm4, %v7122_v25  ;;  %6719 = vmatprep.mubr.msk.f32.mxu0 %vm7670_vm2, %v7671_v45 }
0x1283   :  { %6744 = vmatprep.subr.mxu0 %v7671_v45 }
0x1285   :  { %6720 = vmatmul.mubr.msk.f32.gmra.mrb[72].mxu0 %vm405_vm3, %v3643_v32 }
0x1286   :  { %6722 = vmatprep.mubr.msk.f32.mxu0 %vm7670_vm2, %v7671_v45 }
0x1289   :  { %6723 = vmatmul.mubr.msk.f32.gmra.mrb[74].mxu0 %vm405_vm3, %v3645_v15 }
0x128a   :  { %6745 = vmatpush3.xpose.msk.msra.mxu0 %vm405_vm3, %v3892_v50  ;;  %6746 = vmatprep.mubr.msk.f32.mxu0 %vm7670_vm2, %v7671_v45 }
0x128b   :  { %7128 = vmatprep.subr.bf16.mxu0 %v7668_v3 }
0x128d   :  { %6747 = vmatmul.mubr.msk.f32.vlgmr.msra.gmra.mrb[76].mxu0 %vm405_vm3, %v3882_v52 }
0x128e   :  { %6749 = vmatprep.mubr.msk.f32.mxu0 %vm7670_vm2, %v7671_v45 }
0x1292   :  { %v7318_v47 = vpop.permute.xlu0 %7317  ;;  %v7323_v26 = vpop.permute.xlu1 %7322 }
0x1293   :  { %v7320_v54 = vunpack.i.h.bf16 %v7318_v47  ;;  %v7319_v31 = vunpack.i.l.bf16 %v7318_v47  ;;  %v7325_v19 = vunpack.i.h.bf16 %v7323_v26  ;;  %v7324_v4 = vunpack.i.l.bf16 %v7323_v26 }
0x1295   :  { %v7129_v14 = vpack.c.bf16 %v7320_v54, %v7319_v31  ;;  %v7136_v7 = vpack.c.bf16 %v7325_v19, %v7324_v4 }
0x1296   :  { %v3884_v62 = vpop.permute.xlu0 %3883  ;;  %v7328_v18 = vpop.permute.xlu1 %7327 }
0x1297   :  { %6750 = vmatmul.mubr.msk.f32.gmra.mrb[78].mxu0 %vm405_vm3, %v3884_v62  ;;  %v7330_v1 = vunpack.i.h.bf16 %v7328_v18  ;;  %v7329_v42 = vunpack.i.l.bf16 %v7328_v18 }
0x1298   :  { %7131 = vmatpush3.bf16.xpose.msk.msra.mxu0 %vm7957_vm4, %v7129_v14  ;;  %6752 = vmatprep.mubr.msk.f32.mxu0 %vm7670_vm2, %v7671_v45 }
0x1299   :  { %6774 = vmatprep.subr.mxu0 %v7671_v45  ;;  %v7143_v22 = vpack.c.bf16 %v7330_v1, %v7329_v42 }
0x129a   :  { %v4175_v5 = vpop.permute.xlu0 %4174  ;;  %v4408_v11 = vpop.permute.xlu1 %4407 }
0x129b   :  { %6753 = vmatmul.mubr.msk.f32.gmra.mrb[80].mxu0 %vm405_vm3, %v3886_v30 }
0x129c   :  { %6776 = vmatprep.mubr.msk.f32.mxu0 %vm7670_vm2, %v7671_v45 }
0x129e   :  { %v4416_v27 = vpop.permute.xlu0 %4415  ;;  %v4657_v17 = vpop.permute.xlu1 %4656 }
0x12a0   :  { %6775 = vmatpush3.xpose.msk.msra.mxu0 %vm405_vm3, %v4175_v5 }
0x12a1   :  { %7135 = vmatprep.subr.bf16.mxu0 %v7668_v3 }
0x12a2   :  { %v4406_v24 = vpop.permute.xlu0 %4405  ;;  %v4647_v9 = vpop.permute.xlu1 %4646 }
0x12a3   :  { %6777 = vmatmul.mubr.msk.f32.vlgmr.msra.gmra.mrb[82].mxu0 %vm405_vm3, %v8863_v46 }
0x12a4   :  { %7138 = vmatpush3.bf16.xpose.msk.msra.mxu0 %vm7957_vm4, %v7136_v7  ;;  %6779 = vmatprep.mubr.msk.f32.mxu0 %vm7670_vm2, %v7671_v45 }
0x12a5   :  { %6804 = vmatprep.subr.mxu0 %v7671_v45 }
0x12a6   :  { %v4410_v58 = vpop.permute.xlu0 %4409  ;;  %v4651_v36 = vpop.permute.xlu1 %4650 }
0x12a7   :  { %6780 = vmatmul.mubr.msk.f32.gmra.mrb[84].mxu0 %vm405_vm3, %v8865_v16 }
0x12a8   :  { %6782 = vmatprep.mubr.msk.f32.mxu0 %vm7670_vm2, %v7671_v45 }
0x12aa   :  { %v7333_v37 = vpop.permute.xlu0 %7332  ;;  %v4888_v33 = vpop.permute.xlu1 %4887 }
0x12ab   :  { %6783 = vmatmul.mubr.msk.f32.gmra.mrb[86].mxu0 %vm405_vm3, %v8879_v23  ;;  %v7335_v49 = vunpack.i.h.bf16 %v7333_v37  ;;  %v7334_v44 = vunpack.i.l.bf16 %v7333_v37 }
0x12ac   :  { %6805 = vmatpush3.xpose.msk.msra.mxu0 %vm405_vm3, %v4416_v27  ;;  %6806 = vmatprep.mubr.msk.f32.mxu0 %vm7670_vm2, %v7671_v45 }
0x12ad   :  { %7142 = vmatprep.subr.bf16.mxu0 %v7668_v3  ;;  %v7150_v20 = vpack.c.bf16 %v7335_v49, %v7334_v44 }
0x12ae   :  { %v4649_v55 = vpop.permute.xlu0 %4648  ;;  %v3306_v13 = vpop.permute.xlu1 %3305 }
0x12af   :  { %6807 = vmatmul.mubr.msk.f32.vlgmr.msra.gmra.mrb[88].mxu0 %vm405_vm3, %v4406_v24 }
0x12b0   :  { %7145 = vmatpush3.bf16.xpose.msk.msra.mxu0 %vm7957_vm4, %v7143_v22  ;;  %6809 = vmatprep.mubr.msk.f32.mxu0 %vm7670_vm2, %v7671_v45 }
0x12b1   :  { %6834 = vmatprep.subr.mxu0 %v7671_v45 }
0x12b2   :  { %v4898_v48 = vpop.permute.xlu0 %4897 }
0x12b3   :  { %6810 = vmatmul.mubr.msk.f32.gmra.mrb[90].mxu0 %vm405_vm3, %v4408_v11 }
0x12b4   :  { %6812 = vmatprep.mubr.msk.f32.mxu0 %vm7670_vm2, %v7671_v45 }
0x12b6   :  { %v7338_v12 = vpop.permute.xlu0 %7337 }
0x12b7   :  { %v7340_v46 = vunpack.i.h.bf16 %v7338_v12  ;;  %v7339_v6 = vunpack.i.l.bf16 %v7338_v12  ;;  %6813 = vmatmul.mubr.msk.f32.gmra.mrb[92].mxu0 %vm405_vm3, %v4410_v58 }
0x12b8   :  { %6835 = vmatpush3.xpose.msk.msra.mxu0 %vm405_vm3, %v4657_v17  ;;  %6836 = vmatprep.mubr.msk.f32.mxu0 %vm7670_vm2, %v7671_v45 }
0x12b9   :  { %v7105_v28 = vpack.c.bf16 %v7340_v46, %v7339_v6  ;;  %7149 = vmatprep.subr.bf16.mxu0 %v7668_v3 }
0x12bb   :  { %6837 = vmatmul.mubr.msk.f32.vlgmr.msra.gmra.mrb[94].mxu0 %vm405_vm3, %v4647_v9  ;;  %7106 = vmatpush3.bf16.msra.mxu1 %v7105_v28 }
0x12bc   :  { %7152 = vmatpush3.bf16.xpose.msk.msra.mxu0 %vm7957_vm4, %v7150_v20  ;;  %6839 = vmatprep.mubr.msk.f32.mxu0 %vm7670_vm2, %v7671_v45 }
0x12bd   :  { %6669 = vmatprep.subr.mxu1 %v7671_v45  ;;  %6864 = vmatprep.subr.mxu0 %v7671_v45 }
0x12bf   :  { %6840 = vmatmul.mubr.msk.f32.gmra.mrb[96].mxu0 %vm405_vm3, %v4649_v55  ;;  %6670 = vmatpush3.msra.mxu1 %v3306_v13 }
0x12c0   :  { %6842 = vmatprep.mubr.msk.f32.mxu0 %vm7670_vm2, %v7671_v45  ;;  %7111 = vmatprep.subr.bf16.mxu1 %v7668_v3 }
0x12c3   :  { %6843 = vmatmul.mubr.msk.f32.gmra.mrb[98].mxu0 %vm405_vm3, %v4651_v36 }
0x12c4   :  { %6865 = vmatpush3.xpose.msk.msra.mxu0 %vm405_vm3, %v4898_v48  ;;  %6866 = vmatprep.mubr.msk.f32.mxu0 %vm7670_vm2, %v7671_v45 }
0x12c7   :  { %6867 = vmatmul.mubr.msk.f32.vlgmr.msra.gmra.mrb[100].mxu0 %vm405_vm3, %v4888_v33 }
0x12c8   :  { %6869 = vmatprep.mubr.msk.f32.mxu0 %vm7670_vm2, %v7671_v45 }
0x133c   :  { %v3248_v53 = vpop.f32.mrb[58].mxu0 }
0x133d   :  { %v3262_v35 = vmul.f32 0.35355338, %v3248_v53  ;;  %v6658_v8 = vpop.f32.mrb[59].mxu0 }
0x133f   :  { %v9033_v51 = vadd.f32 %v9030_v57, %v3262_v35 }
0x1340   :  { %v3253_v38 = vpop.f32.mrb[60].mxu0 }
0x1341   :  { %v3263_v29 = vmul.f32 0.35355338, %v3253_v38  ;;  %v6661_v56 = vpop.f32.mrb[61].mxu0  ;;  %v3268_v39 = vsel %vm508_vm5, %v9033_v51, -inf }
0x1342   :  { %3269 = vmax.xlane.f32.xlu0 %v3268_v39 }
0x1343   :  { %v9038_v0 = vadd.f32 %v9030_v57, %v3263_v29 }
0x1344   :  { %v3258_v40 = vpop.f32.mrb[62].mxu0 }
0x1345   :  { %v3264_v21 = vmul.f32 0.35355338, %v3258_v40  ;;  %v6664_v61 = vpop.f32.mrb[63].mxu0  ;;  %v3271_v32 = vsel %vm508_vm5, %v9038_v0, -inf }
0x1346   :  { %3272 = vmax.xlane.f32.xlu1 %v3271_v32 }
0x1347   :  { %v9043_v25 = vadd.f32 %v9030_v57, %v3264_v21 }
0x1348   :  { %v3489_v2 = vpop.f32.mrb[64].mxu0 }
0x1349   :  { %v3503_v50 = vmul.f32 0.35355338, %v3489_v2  ;;  %v6688_v15 = vpop.f32.mrb[65].mxu0  ;;  %v3274_v52 = vsel %vm508_vm5, %v9043_v25, -inf }
0x134a   :  { %3275 = vmax.xlane.f32.xlu0 %v3274_v52 }
0x134b   :  { %v9048_v30 = vadd.f32 %v9030_v57, %v3503_v50 }
0x134c   :  { %v3494_v47 = vpop.f32.mrb[66].mxu0 }
0x134d   :  { %v6691_v54 = vpop.f32.mrb[67].mxu0  ;;  %v3509_v31 = vsel %vm508_vm5, %v9048_v30, -inf  ;;  %v3504_v6 = vmul.f32 0.35355338, %v3494_v47 }
0x134e   :  { %3510 = vmax.xlane.f32.xlu0 %v3509_v31 }
0x134f   :  { %v9075_v28 = vadd.f32 %v9030_v57, %v3504_v6 }
0x1350   :  { %v3499_v26 = vpop.f32.mrb[68].mxu0 }
0x1351   :  { %v3505_v14 = vmul.f32 0.35355338, %v3499_v26  ;;  %v6694_v62 = vpop.f32.mrb[69].mxu0  ;;  %v3512_v29 = vsel %vm508_vm5, %v9075_v28, -inf }
0x1353   :  { %v9053_v18 = vadd.f32 %v9030_v57, %v3505_v14 }
0x1354   :  { %v3730_v5 = vpop.f32.mrb[70].mxu0 }
0x1355   :  { %v6718_v19 = vpop.f32.mrb[71].mxu0  ;;  %v3515_v4 = vsel %vm508_vm5, %v9053_v18, -inf  ;;  %v3744_v20 = vmul.f32 0.35355338, %v3730_v5 }
0x1356   :  { %3516 = vmax.xlane.f32.xlu0 %v3515_v4 }
0x1357   :  { %7357 = vrot.lane.b32.xlu1 %v8869_v63, %s7672_s4  ;;  %v9078_v35 = vadd.f32 %v9030_v57, %v3744_v20 }
0x1358   :  { %v3735_v27 = vpop.f32.mrb[72].mxu0 }
0x1359   :  { %v3745_v11 = vmul.f32 0.35355338, %v3735_v27  ;;  %v6721_v7 = vpop.f32.mrb[73].mxu0  ;;  %v3750_v2 = vsel %vm508_vm5, %v9078_v35, -inf }
0x135b   :  { %v9060_v24 = vadd.f32 %v9030_v57, %v3745_v11 }
0x135c   :  { %v3740_v17 = vpop.f32.mrb[74].mxu0 }
0x135d   :  { %v6724_v58 = vpop.f32.mrb[75].mxu0  ;;  %v3753_v1 = vsel %vm508_vm5, %v9060_v24, -inf  ;;  %v3746_v8 = vmul.f32 0.35355338, %v3740_v17 }
0x135e   :  { %3754 = vmax.xlane.f32.xlu0 %v3753_v1 }
0x135f   :  { %v9086_v21 = vadd.f32 %v9030_v57, %v3746_v8 }
0x1360   :  { %v3971_v42 = vpop.f32.mrb[76].mxu0 }
0x1361   :  { %v3985_v37 = vmul.f32 0.35355338, %v3971_v42  ;;  %v6748_v9 = vpop.f32.mrb[77].mxu0  ;;  %v3756_v31 = vsel %vm508_vm5, %v9086_v21, -inf }
0x1363   :  { %v9065_v22 = vadd.f32 %v9030_v57, %v3985_v37 }
0x1365   :  { %v3991_v55 = vsel %vm508_vm5, %v9065_v22, -inf }
0x1366   :  { %3992 = vmax.xlane.f32.xlu0 %v3991_v55 }
0x136a   :  { %v3976_v36 = vpop.f32.mrb[78].mxu0 }
0x136b   :  { %v6751_v48 = vpop.f32.mrb[79].mxu0  ;;  %v3986_v61 = vmul.f32 0.35355338, %v3976_v36 }
0x136d   :  { %v9093_v52 = vadd.f32 %v9030_v57, %v3986_v61 }
0x136e   :  { %v3981_v49 = vpop.f32.mrb[80].mxu0 }
0x136f   :  { %v3987_v44 = vmul.f32 0.35355338, %v3981_v49  ;;  %v6754_v12 = vpop.f32.mrb[81].mxu0  ;;  %v3994_v27 = vsel %vm508_vm5, %v9093_v52, -inf }
0x1371   :  { %v9070_v46 = vadd.f32 %v9030_v57, %v3987_v44 }
0x1373   :  { %v3997_v33 = vsel %vm508_vm5, %v9070_v46, -inf }
0x1374   :  { %3998 = vmax.xlane.f32.xlu0 %v3997_v33 }
0x1376   :  { %v4254_v13 = vpop.f32.mrb[82].mxu0 }
0x1377   :  { %v6778_v53 = vpop.f32.mrb[83].mxu0  ;;  %v4268_v47 = vmul.f32 0.35355338, %v4254_v13 }
0x1379   :  { %v9101_v5 = vadd.f32 %v9030_v57, %v4268_v47 }
0x137a   :  { %v4259_v38 = vpop.f32.mrb[84].mxu0 }
0x137b   :  { %v4269_v56 = vmul.f32 0.35355338, %v4259_v38  ;;  %v6781_v39 = vpop.f32.mrb[85].mxu0  ;;  %3513 = vmax.xlane.f32.xlu1 %v3512_v29  ;;  %v4274_v42 = vsel %vm508_vm5, %v9101_v5, -inf }
0x137d   :  { %v9083_v40 = vadd.f32 %v9030_v57, %v4269_v56 }
0x137e   :  { %v4264_v32 = vpop.f32.mrb[86].mxu0 }
0x137f   :  { %v6784_v50 = vpop.f32.mrb[87].mxu0  ;;  %3751 = vmax.xlane.f32.xlu1 %v3750_v2  ;;  %v4277_v15 = vsel %vm508_vm5, %v9083_v40, -inf  ;;  %v4270_v19 = vmul.f32 0.35355338, %v4264_v32 }
0x1380   :  { %4278 = vmax.xlane.f32.xlu0 %v4277_v15 }
0x1381   :  { %v9108_v17 = vadd.f32 %v9030_v57, %v4270_v19  ;;  %v9148_v19 = vpop.permute.xlu1 %7342 }
0x1382   :  { %v4495_v54 = vpop.f32.mrb[88].mxu0 }
0x1383   :  { %v4509_v26 = vmul.f32 0.35355338, %v4495_v54  ;;  %v6808_v14 = vpop.f32.mrb[89].mxu0  ;;  %3757 = vmax.xlane.f32.xlu1 %v3756_v31  ;;  %v4280_v49 = vsel %vm508_vm5, %v9108_v17, -inf }
0x1384   :  { %v9146_v14 = vpop.permute.xlu0 %3546 }
0x1385   :  { %v9098_v62 = vadd.f32 %v9030_v57, %v4509_v26 }
0x1386   :  { %v4500_v4 = vpop.f32.mrb[90].mxu0 }
0x1387   :  { %v6811_v11 = vpop.f32.mrb[91].mxu0  ;;  %3995 = vmax.xlane.f32.xlu1 %v3994_v27  ;;  %v4515_v7 = vsel %vm508_vm5, %v9098_v62, -inf  ;;  %v4510_v58 = vmul.f32 0.35355338, %v4500_v4  ;;  %v9152_v27 = vpop.permute.xlu1 %7347 }
0x1388   :  { %4516 = vmax.xlane.f32.xlu0 %v4515_v7  ;;  %v9150_v4 = vpop.permute.xlu0 %3787 }
0x1389   :  { %v9116_v36 = vadd.f32 %v9030_v57, %v4510_v58 }
0x138a   :  { %v4505_v1 = vpop.f32.mrb[92].mxu0 }
0x138b   :  { %v4511_v37 = vmul.f32 0.35355338, %v4505_v1  ;;  %v6814_v9 = vpop.f32.mrb[93].mxu0  ;;  %4275 = vmax.xlane.f32.xlu1 %v4274_v42  ;;  %v4518_v13 = vsel %vm508_vm5, %v9116_v36, -inf  ;;  %v9156_v7 = vpop.permute.xlu1 %7352 }
0x138c   :  { %v9154_v11 = vpop.permute.xlu0 %4028 }
0x138d   :  { %v9113_v55 = vadd.f32 %v9030_v57, %v4511_v37 }
0x138e   :  { %v4736_v48 = vpop.f32.mrb[94].mxu0 }
0x138f   :  { %v4750_v44 = vmul.f32 0.35355338, %v4736_v48  ;;  %v6838_v12 = vpop.f32.mrb[95].mxu0  ;;  %4281 = vmax.xlane.f32.xlu1 %v4280_v49  ;;  %v4521_v6 = vsel %vm508_vm5, %v9113_v55, -inf }
0x1390   :  { %4522 = vmax.xlane.f32.xlu0 %v4521_v6 }
0x1391   :  { %v9123_v33 = vadd.f32 %v9030_v57, %v4750_v44 }
0x1392   :  { %v4741_v20 = vpop.f32.mrb[96].mxu0 }
0x1393   :  { %v4751_v53 = vmul.f32 0.35355338, %v4741_v20  ;;  %v6841_v8 = vpop.f32.mrb[97].mxu0  ;;  %4519 = vmax.xlane.f32.xlu1 %v4518_v13  ;;  %v4756_v56 = vsel %vm508_vm5, %v9123_v33, -inf }
0x1395   :  { %v9128_v38 = vadd.f32 %v9030_v57, %v4751_v53 }
0x1396   :  { %v4746_v29 = vpop.f32.mrb[98].mxu0 }
0x1397   :  { %v4752_v39 = vmul.f32 0.35355338, %v4746_v29  ;;  %v6844_v61 = vpop.f32.mrb[99].mxu0  ;;  %4757 = vmax.xlane.f32.xlu1 %v4756_v56  ;;  %v4759_v32 = vsel %vm508_vm5, %v9128_v38, -inf }
0x1398   :  { %4760 = vmax.xlane.f32.xlu0 %v4759_v32 }
0x1399   :  { %v9135_v2 = vadd.f32 %v9030_v57, %v4752_v39 }
0x139a   :  { %v4977_v50 = vpop.f32.mrb[100].mxu0 }
0x139b   :  { %v4991_v15 = vmul.f32 0.35355338, %v4977_v50  ;;  %v6868_v47 = vpop.f32.mrb[101].mxu0  ;;  %v4762_v54 = vsel %vm508_vm5, %v9135_v2, -inf }
0x139c   :  { %4763 = vmax.xlane.f32.xlu1 %v4762_v54 }
0x139d   :  { %v9140_v31 = vadd.f32 %v9030_v57, %v4991_v15 }
0x139f   :  { %v4997_v26 = vsel %vm508_vm5, %v9140_v31, -inf }
0x13a0   :  { %4998 = vmax.xlane.f32.xlu0 %v4997_v26 }
0x13b6   :  { %4311 = vrot.lane.b32.xlu0 %v8879_v23, %s7672_s4 }
0x13cf   :  { %v3270_v57 = vpop.xlane.xlu0 %3269 }
0x13d0   :  { %v3277_v58 = vsub.f32 %v9033_v51, %v3270_v57 }
0x13d2   :  { %v3280_v1 = vmul.f32 1.442695, %v3277_v58 }
0x13d3   :  { %v3273_v42 = vpop.xlane.xlu1 %3272 }
0x13d4   :  { %7520 = vpow2.f32 %v3280_v1  ;;  %v3278_v37 = vsub.f32 %v9038_v0, %v3273_v42 }
0x13d6   :  { %v3282_v9 = vmul.f32 1.442695, %v3278_v37 }
0x13d7   :  { %v3276_v48 = vpop.xlane.xlu0 %3275  ;;  %v9189_v42 = vpop.permute.xlu1 %7357 }
0x13d8   :  { %7522 = vpow2.f32 %v3282_v9  ;;  %v3279_v49 = vsub.f32 %v9043_v25, %v3276_v48 }
0x13da   :  { %v3284_v44 = vmul.f32 1.442695, %v3279_v49 }
0x13db   :  { %v3511_v12 = vpop.xlane.xlu0 %3510 }
0x13dc   :  { %7524 = vpow2.f32 %v3284_v44  ;;  %v3518_v6 = vsub.f32 %v9048_v30, %v3511_v12 }
0x13de   :  { %v9162_v20 = vpop.eup %7520  ;;  %v3521_v13 = vmul.f32 1.442695, %v3518_v6 }
0x13df   :  { %v3286_v51 = vsel %vm508_vm5, %v9162_v20, 0.0 }
0x13e0   :  { %7526 = vpow2.f32 %v3521_v13  ;;  %3287 = vadd.xlane.f32.xlu1 %v3286_v51 }
0x13e2   :  { %v9166_v53 = vpop.eup %7522 }
0x13e3   :  { %v3289_v0 = vsel %vm508_vm5, %v9166_v53, 0.0  ;;  %v3517_v8 = vpop.xlane.xlu0 %3516 }
0x13e4   :  { %3290 = vadd.xlane.f32.xlu0 %v3289_v0 }
0x13e6   :  { %v9170_v25 = vpop.eup %7524 }
0x13e7   :  { %v3292_v30 = vsel %vm508_vm5, %v9170_v25, 0.0 }
0x13e8   :  { %3293 = vadd.xlane.f32.xlu1 %v3292_v30 }
0x13ea   :  { %v9174_v29 = vpop.eup %7526 }
0x13eb   :  { %v3755_v56 = vpop.xlane.xlu0 %3754  ;;  %v3527_v39 = vsel %vm508_vm5, %v9174_v29, 0.0 }
0x13ec   :  { %v3760_v61 = vsub.f32 %v9060_v24, %v3755_v56  ;;  %3528 = vadd.xlane.f32.xlu0 %v3527_v39 }
0x13ee   :  { %v3764_v32 = vmul.f32 1.442695, %v3760_v61 }
0x13f0   :  { %7528 = vpow2.f32 %v3764_v32 }
0x13f3   :  { %v3993_v50 = vpop.xlane.xlu0 %3992 }
0x13f4   :  { %v4000_v15 = vsub.f32 %v9065_v22, %v3993_v50  ;;  %v3520_v22 = vsub.f32 %v9053_v18, %v3517_v8 }
0x13f6   :  { %v4003_v47 = vmul.f32 1.442695, %v4000_v15  ;;  %v3525_v49 = vmul.f32 1.442695, %v3520_v22 }
0x13f8   :  { %7530 = vpow2.f32 %v4003_v47 }
0x13fa   :  { %v9180_v54 = vpop.eup %7528 }
0x13fb   :  { %v3771_v26 = vsel %vm508_vm5, %v9180_v54, 0.0 }
0x13fc   :  { %3772 = vadd.xlane.f32.xlu0 %v3771_v26 }
0x1401   :  { %v3999_v57 = vpop.xlane.xlu0 %3998 }
0x1402   :  { %v9184_v58 = vpop.eup %7530  ;;  %v4002_v1 = vsub.f32 %v9070_v46, %v3999_v57 }
0x1403   :  { %v4009_v24 = vsel %vm508_vm5, %v9184_v58, 0.0 }
0x1404   :  { %v4007_v37 = vmul.f32 1.442695, %v4002_v1  ;;  %4010 = vadd.xlane.f32.xlu0 %v4009_v24 }
0x1406   :  { %7532 = vpow2.f32 %v4007_v37 }
0x1408   :  { %v3514_v9 = vpop.xlane.xlu1 %3513 }
0x1409   :  { %v3519_v48 = vsub.f32 %v9075_v28, %v3514_v9 }
0x140b   :  { %v3523_v44 = vmul.f32 1.442695, %v3519_v48 }
0x140c   :  { %v3752_v12 = vpop.xlane.xlu1 %3751 }
0x140d   :  { %7534 = vpow2.f32 %v3523_v44  ;;  %v3759_v6 = vsub.f32 %v9078_v35, %v3752_v12  ;;  %v4279_v8 = vpop.xlane.xlu0 %4278 }
0x140e   :  { %7536 = vpow2.f32 %v3525_v49  ;;  %v4284_v47 = vsub.f32 %v9083_v40, %v4279_v8 }
0x140f   :  { %v3762_v46 = vmul.f32 1.442695, %v3759_v6 }
0x1410   :  { %v9194_v13 = vpop.eup %7532  ;;  %v3758_v51 = vpop.xlane.xlu1 %3757  ;;  %v4288_v22 = vmul.f32 1.442695, %v4284_v47 }
0x1411   :  { %v3761_v0 = vsub.f32 %v9086_v21, %v3758_v51  ;;  %v4015_v30 = vsel %vm508_vm5, %v9194_v13, 0.0  ;;  %7538 = vpow2.f32 %v3762_v46 }
0x1412   :  { %4016 = vadd.xlane.f32.xlu0 %v4015_v30 }
0x1413   :  { %v3766_v18 = vmul.f32 1.442695, %v3761_v0 }
0x1414   :  { %v3996_v28 = vpop.xlane.xlu1 %3995 }
0x1415   :  { %v4001_v56 = vsub.f32 %v9093_v52, %v3996_v28  ;;  %7540 = vpow2.f32 %v3766_v18  ;;  %v4517_v21 = vpop.xlane.xlu0 %4516 }
0x1417   :  { %v9200_v39 = vpop.eup %7534  ;;  %v4005_v35 = vmul.f32 1.442695, %v4001_v56 }
0x1418   :  { %v4276_v61 = vpop.xlane.xlu1 %4275  ;;  %v3530_v32 = vsel %vm508_vm5, %v9200_v39, 0.0  ;;  %v9204_v50 = vpop.eup %7536 }
0x1419   :  { %v4283_v15 = vsub.f32 %v9101_v5, %v4276_v61  ;;  %3531 = vadd.xlane.f32.xlu1 %v3530_v32  ;;  %7542 = vpow2.f32 %v4005_v35  ;;  %v3533_v52 = vsel %vm508_vm5, %v9204_v50, 0.0  ;;  %v4524_v5 = vsub.f32 %v9098_v62, %v4517_v21 }
0x141b   :  { %v4286_v26 = vmul.f32 1.442695, %v4283_v15  ;;  %v9210_v1 = vpop.eup %7538 }
0x141c   :  { %v4282_v57 = vpop.xlane.xlu1 %4281  ;;  %v3768_v44 = vsel %vm508_vm5, %v9210_v1, 0.0 }
0x141d   :  { %v4285_v24 = vsub.f32 %v9108_v17, %v4282_v57  ;;  %v4523_v37 = vpop.xlane.xlu0 %4522  ;;  %3534 = vadd.xlane.f32.xlu1 %v3533_v52  ;;  %7544 = vpow2.f32 %v4286_v26  ;;  %v4527_v17 = vmul.f32 1.442695, %v4524_v5 }
0x141e   :  { %v4526_v9 = vsub.f32 %v9113_v55, %v4523_v37 }
0x141f   :  { %v4290_v48 = vmul.f32 1.442695, %v4285_v24  ;;  %v9217_v12 = vpop.eup %7540 }
0x1420   :  { %v4531_v40 = vmul.f32 1.442695, %v4526_v9  ;;  %v4520_v49 = vpop.xlane.xlu1 %4519  ;;  %v3774_v55 = vsel %vm508_vm5, %v9217_v12, 0.0 }
0x1421   :  { %7546 = vpow2.f32 %v4290_v48  ;;  %3769 = vadd.xlane.f32.xlu1 %v3768_v44  ;;  %v4525_v6 = vsub.f32 %v9116_v36, %v4520_v49 }
0x1422   :  { %7548 = vpow2.f32 %v4288_v22 }
0x1423   :  { %7550 = vpow2.f32 %v4531_v40  ;;  %v9222_v62 = vpop.eup %7542  ;;  %v4529_v46 = vmul.f32 1.442695, %v4525_v6 }
0x1424   :  { %7552 = vpow2.f32 %v4527_v17  ;;  %v4012_v51 = vsel %vm508_vm5, %v9222_v62, 0.0  ;;  %v4758_v24 = vpop.xlane.xlu1 %4757 }
0x1425   :  { %3775 = vadd.xlane.f32.xlu1 %v3774_v55  ;;  %7554 = vpow2.f32 %v4529_v46  ;;  %v4761_v47 = vpop.xlane.xlu0 %4760  ;;  %v4765_v22 = vsub.f32 %v9123_v33, %v4758_v24  ;;  %v7345_v46 = vunpack.i.h.bf16 %v9148_v19 }
0x1427   :  { %v9226_v0 = vpop.eup %7544  ;;  %v4768_v5 = vmul.f32 1.442695, %v4765_v22 }
0x1428   :  { %v4292_v36 = vsel %vm508_vm5, %v9226_v0, 0.0 }
0x1429   :  { %4013 = vadd.xlane.f32.xlu1 %v4012_v51  ;;  %v4764_v48 = vpop.xlane.xlu1 %4763 }
0x142a   :  { %v4767_v49 = vsub.f32 %v9135_v2, %v4764_v48 }
0x142b   :  { %v9228_v30 = vpop.eup %7546 }
0x142c   :  { %v9230_v18 = vpop.eup %7548  ;;  %v4298_v28 = vsel %vm508_vm5, %v9228_v30, 0.0  ;;  %v4772_v17 = vmul.f32 1.442695, %v4767_v49  ;;  %v7355_v49 = vunpack.i.h.bf16 %v9156_v7 }
0x142d   :  { %v9236_v8 = vpop.eup %7550  ;;  %4293 = vadd.xlane.f32.xlu1 %v4292_v36  ;;  %4299 = vadd.xlane.f32.xlu0 %v4298_v28  ;;  %v4295_v56 = vsel %vm508_vm5, %v9230_v18, 0.0  ;;  %v4999_v26 = vpop.xlane.xlu0 %4998 }
0x142e   :  { %v4539_v35 = vsel %vm508_vm5, %v9236_v8, 0.0  ;;  %v9242_v61 = vpop.eup %7552  ;;  %v5006_v57 = vsub.f32 %v9140_v31, %v4999_v26  ;;  %v4766_v31 = vsub.f32 %v9128_v38, %v4761_v47  ;;  %v7344_v38 = vunpack.i.l.bf16 %v9148_v19 }
0x142f   :  { %v4533_v32 = vsel %vm508_vm5, %v9242_v61, 0.0  ;;  %v9246_v21 = vpop.eup %7554 }
0x1430   :  { %v4536_v15 = vsel %vm508_vm5, %v9246_v21, 0.0  ;;  %v5009_v52 = vmul.f32 1.442695, %v5006_v57  ;;  %v4770_v40 = vmul.f32 1.442695, %v4766_v31 }
0x1431   :  { %4296 = vadd.xlane.f32.xlu1 %v4295_v56  ;;  %4540 = vadd.xlane.f32.xlu0 %v4539_v35  ;;  %v9268_v44 = vpop.permute.xlu0 %4311  ;;  %v7112_v35 = vpack.c.bf16 %v7345_v46, %v7344_v38 }
0x1432   :  { %7556 = vpow2.f32 %v5009_v52  ;;  %v7349_v52 = vunpack.i.l.bf16 %v9152_v27 }
0x1433   :  { %7558 = vpow2.f32 %v4768_v5 }
0x1435   :  { %4534 = vadd.xlane.f32.xlu1 %v4533_v32 }
0x1439   :  { %4537 = vadd.xlane.f32.xlu1 %v4536_v15 }
0x143c   :  { %v9261_v37 = vpop.eup %7556 }
0x143d   :  { %v5015_v9 = vsel %vm508_vm5, %v9261_v37, 0.0  ;;  %v9270_v55 = vpop.eup %7558 }
0x143e   :  { %v4774_v28 = vsel %vm508_vm5, %v9270_v55, 0.0 }
0x1447   :  { %7362 = vrot.lane.b32.xlu0 %v8869_v63, %s7675_s0 }
0x144a   :  { %4552 = vrot.lane.b32.xlu1 %v8879_v23, %s7675_s0  ;;  %s5805_s0 = sshll.u32 %s7685_s6, 4  ;;  %s5806_s0 = int_to_ptr.vmem [resolvable:$true] %s5805_s0 }
0x144b   :  { %s7644_s7 = scalar_lea.vmem %s5806_s0, 32  ;;  %p7649_p1 = scmp.lt.s32.totalorder %s5806_s0, %s5806_s0 }
0x144c   :  { %p7645_p0 = scmp.ne.s32.totalorder %s5806_s0, %s7644_s7  ;;  %p7650_p2 = scmp.lt.s32.totalorder %s7644_s7, %s7644_s7 }
0x144e   :  { %7367 = vrot.lane.b32.xlu1 %v8869_v63, %s7680_s11  ;;  %p7651_p3 = por %p7650_p2, %p7649_p1 }
0x1450   :  { %p7652_p4 = pnand %p7651_p3, %p7645_p0 }
0x1452   :  { %4793 = vrot.lane.b32.xlu1 %v8879_v23, %s7680_s11 }
0x1456   :  { %7372 = vrot.lane.b32.xlu1 %v8869_v63, %s7681_s12 }
0x1466   :  { %5016 = vadd.xlane.f32.xlu0 %v5015_v9 }
0x146d   :  { %v3288_v63 = vpop.xlane.xlu1 %3287 }
0x146e   :  { %7560 = vrcp.f32 %v3288_v63  ;;  %v7354_v63 = vunpack.i.l.bf16 %v9156_v7 }
0x146f   :  { %7562 = vpow2.f32 %v4770_v40 }
0x1470   :  { %v7126_v46 = vpack.c.bf16 %v7355_v49, %v7354_v63 }
0x1471   :  { %v3291_v6 = vpop.xlane.xlu0 %3290 }
0x1472   :  { %7564 = vrcp.f32 %v3291_v6 }
0x1473   :  { %7566 = vpow2.f32 %v4772_v17 }
0x1475   :  { %v3294_v33 = vpop.xlane.xlu1 %3293 }
0x1476   :  { %7568 = vrcp.f32 %v3294_v33 }
0x1478   :  { %v7561_v51 = vpop.eup %7560 }
0x1479   :  { %v3296_v2 = vmul.f32 %v7561_v51, %v9162_v20  ;;  %v3529_v36 = vpop.xlane.xlu0 %3528  ;;  %v9277_v56 = vpop.eup %7562 }
0x147a   :  { %7570 = vrcp.f32 %v3529_v36  ;;  %4775 = vadd.xlane.f32.xlu1 %v4774_v28  ;;  %v4777_v19 = vsel %vm508_vm5, %v9277_v56, 0.0  ;;  %v7360_v28 = vunpack.i.h.bf16 %v9189_v42 }
0x147b   :  { %6672 = vmatmul.mubr.msk.f32.vlgmr.msra.gmra.mrb[80].mxu1 %vm508_vm5, %v3296_v2 }
0x147c   :  { %v7565_v32 = vpop.eup %7564  ;;  %7113 = vmatpush3.bf16.msra.mxu1 %v7112_v35  ;;  %5034 = vrot.lane.b32.xlu0 %v8879_v23, %s7681_s12 }
0x147d   :  { %6674 = vmatprep.mubr.msk.f32.mxu1 %vm7670_vm2, %v7671_v45  ;;  %6699 = vmatprep.subr.mxu1 %v7671_v45  ;;  %v3298_v20 = vmul.f32 %v7565_v32, %v9166_v53  ;;  %v9288_v15 = vpop.eup %7566  ;;  %v7350_v53 = vunpack.i.h.bf16 %v9152_v27 }
0x147e   :  { %4778 = vadd.xlane.f32.xlu1 %v4777_v19  ;;  %v4780_v26 = vsel %vm508_vm5, %v9288_v15, 0.0 }
0x147f   :  { %6675 = vmatmul.mubr.msk.f32.gmra.mrb[82].mxu1 %vm508_vm5, %v3298_v20  ;;  %v7119_v22 = vpack.c.bf16 %v7350_v53, %v7349_v52 }
0x1480   :  { %v7569_v47 = vpop.eup %7568  ;;  %6700 = vmatpush3.msra.mxu1 %v9146_v14  ;;  %6677 = vmatprep.mubr.msk.f32.mxu1 %vm7670_vm2, %v7671_v45 }
0x1481   :  { %v3300_v57 = vmul.f32 %v7569_v47, %v9170_v25  ;;  %7118 = vmatprep.subr.bf16.mxu1 %v7668_v3 }
0x1482   :  { %4781 = vadd.xlane.f32.xlu1 %v4780_v26 }
0x1483   :  { %6678 = vmatmul.mubr.msk.f32.gmra.mrb[84].mxu1 %vm508_vm5, %v3300_v57 }
0x1484   :  { %v7571_v24 = vpop.eup %7570  ;;  %6701 = vmatprep.mubr.msk.f32.mxu1 %vm7670_vm2, %v7671_v45 }
0x1485   :  { %v3537_v14 = vmul.f32 %v7571_v24, %v9174_v29 }
0x1487   :  { %6702 = vmatmul.mubr.msk.f32.vlgmr.msra.gmra.mrb[86].mxu1 %vm508_vm5, %v3537_v14 }
0x1488   :  { %7120 = vmatpush3.bf16.msra.mxu1 %v7119_v22  ;;  %6704 = vmatprep.mubr.msk.f32.mxu1 %vm7670_vm2, %v7671_v45 }
0x1489   :  { %6729 = vmatprep.subr.mxu1 %v7671_v45  ;;  %v3773_v29 = vpop.xlane.xlu0 %3772 }
0x148c   :  { %6730 = vmatpush3.msra.mxu1 %v9150_v4 }
0x148d   :  { %7125 = vmatprep.subr.bf16.mxu1 %v7668_v3 }
0x1493   :  { %4889 = vrot.lane.b32.xlu1 %v8865_v16, %s7679_s10  ;;  %v4011_v16 = vpop.xlane.xlu0 %4010 }
0x1497   :  { %4891 = vrot.lane.b32.xlu1 %v8879_v23, %s7679_s10 }
0x149f   :  { %v4017_v38 = vpop.xlane.xlu0 %4016 }
0x14a6   :  { %v3532_v27 = vpop.xlane.xlu1 %3531 }
0x14a7   :  { %7572 = vrcp.f32 %v3532_v27 }
0x14aa   :  { %v3535_v25 = vpop.xlane.xlu1 %3534 }
0x14ab   :  { %7574 = vrcp.f32 %v3535_v25 }
0x14ae   :  { %v3770_v9 = vpop.xlane.xlu1 %3769 }
0x14af   :  { %7576 = vrcp.f32 %v3770_v9 }
0x14b0   :  { %7578 = vrcp.f32 %v3773_v29 }
0x14b1   :  { %v7573_v5 = vpop.eup %7572 }
0x14b2   :  { %v3776_v31 = vpop.xlane.xlu1 %3775  ;;  %v3539_v4 = vmul.f32 %v7573_v5, %v9200_v39 }
0x14b3   :  { %7580 = vrcp.f32 %v3776_v31 }
0x14b4   :  { %6705 = vmatmul.mubr.msk.f32.gmra.mrb[88].mxu1 %vm508_vm5, %v3539_v4  ;;  %7582 = vrcp.f32 %v4011_v16 }
0x14b5   :  { %v7575_v48 = vpop.eup %7574  ;;  %6707 = vmatprep.mubr.msk.f32.mxu1 %vm7670_vm2, %v7671_v45 }
0x14b6   :  { %v4014_v23 = vpop.xlane.xlu1 %4013  ;;  %v3541_v40 = vmul.f32 %v7575_v48, %v9204_v50 }
0x14b7   :  { %7584 = vrcp.f32 %v4014_v23 }
0x14b8   :  { %6708 = vmatmul.mubr.msk.f32.gmra.mrb[90].mxu1 %vm508_vm5, %v3541_v40  ;;  %7586 = vrcp.f32 %v4017_v38 }
0x14b9   :  { %v7577_v17 = vpop.eup %7576  ;;  %6731 = vmatprep.mubr.msk.f32.mxu1 %vm7670_vm2, %v7671_v45 }
0x14ba   :  { %v3778_v39 = vmul.f32 %v7577_v17, %v9210_v1  ;;  %v4294_v6 = vpop.xlane.xlu1 %4293  ;;  %v7579_v33 = vpop.eup %7578 }
0x14bb   :  { %v3780_v7 = vmul.f32 %v7579_v33, %v9180_v54  ;;  %v4300_v51 = vpop.xlane.xlu0 %4299  ;;  %v7359_v54 = vunpack.i.l.bf16 %v9189_v42  ;;  %7588 = vrcp.f32 %v4294_v6 }
0x14bc   :  { %6732 = vmatmul.mubr.msk.f32.vlgmr.msra.gmra.mrb[92].mxu1 %vm508_vm5, %v3778_v39 }
0x14bd   :  { %7127 = vmatpush3.bf16.msra.mxu1 %v7126_v46  ;;  %6734 = vmatprep.mubr.msk.f32.mxu1 %vm7670_vm2, %v7671_v45  ;;  %v7581_v50 = vpop.eup %7580  ;;  %v7133_v20 = vpack.c.bf16 %v7360_v28, %v7359_v54 }
0x14be   :  { %6759 = vmatprep.subr.mxu1 %v7671_v45  ;;  %v4297_v2 = vpop.xlane.xlu1 %4296  ;;  %v3782_v1 = vmul.f32 %v7581_v50, %v9217_v12  ;;  %v7583_v36 = vpop.eup %7582 }
0x14bf   :  { %v4541_v35 = vpop.xlane.xlu0 %4540  ;;  %7590 = vrcp.f32 %v4297_v2 }
0x14c0   :  { %6735 = vmatmul.mubr.msk.f32.gmra.mrb[94].mxu1 %vm508_vm5, %v3780_v7  ;;  %7592 = vrcp.f32 %v4300_v51 }
0x14c1   :  { %6760 = vmatpush3.msra.mxu1 %v9154_v11  ;;  %6737 = vmatprep.mubr.msk.f32.mxu1 %vm7670_vm2, %v7671_v45  ;;  %v4019_v11 = vmul.f32 %v7583_v36, %v9184_v58  ;;  %v7585_v19 = vpop.eup %7584 }
0x14c2   :  { %7132 = vmatprep.subr.bf16.mxu1 %v7668_v3  ;;  %v4535_v32 = vpop.xlane.xlu1 %4534  ;;  %v4021_v42 = vmul.f32 %v7585_v19, %v9222_v62  ;;  %v7587_v12 = vpop.eup %7586 }
0x14c3   :  { %v7363_v47 = vpop.permute.xlu0 %7362  ;;  %v4023_v58 = vmul.f32 %v7587_v12, %v9194_v13  ;;  %7594 = vrcp.f32 %v4535_v32  ;;  %v5174_v12 = vld [vmem:[%s9661_s1 + $0x188] sm:$0xff] }
0x14c4   :  { %6738 = vmatmul.mubr.msk.f32.gmra.mrb[96].mxu1 %vm508_vm5, %v3782_v1  ;;  %v7365_v53 = vunpack.i.h.bf16 %v7363_v47  ;;  %v7364_v52 = vunpack.i.l.bf16 %v7363_v47 }
0x14c5   :  { %6761 = vmatprep.mubr.msk.f32.mxu1 %vm7670_vm2, %v7671_v45  ;;  %v7589_v57 = vpop.eup %7588 }
0x14c6   :  { %v4538_v26 = vpop.xlane.xlu1 %4537  ;;  %v4302_v62 = vmul.f32 %v7589_v57, %v9226_v0  ;;  %v7140_v14 = vpack.c.bf16 %v7365_v53, %v7364_v52  ;;  %v5175_v57 = vld [vmem:[%s9661_s1 + $0x190] sm:$0xff]  ;;  %v5176_v53 = vld [vmem:[%s9661_s1 + $0x198] sm:$0xff] }
0x14c7   :  { %7596 = vrcp.f32 %v4538_v26 }
0x14c8   :  { %6762 = vmatmul.mubr.msk.f32.vlgmr.msra.gmra.mrb[98].mxu1 %vm508_vm5, %v4019_v11  ;;  %7598 = vrcp.f32 %v4541_v35 }
0x14c9   :  { %7134 = vmatpush3.bf16.msra.mxu1 %v7133_v20  ;;  %6764 = vmatprep.mubr.msk.f32.mxu1 %vm7670_vm2, %v7671_v45 }
0x14ca   :  { %6789 = vmatprep.subr.mxu1 %v7671_v45  ;;  %v4553_v24 = vpop.permute.xlu1 %4552 }
0x14cc   :  { %6765 = vmatmul.mubr.msk.f32.gmra.mrb[100].mxu1 %vm508_vm5, %v4021_v42  ;;  %v5173_v42 = vld [vmem:[%s9661_s1 + $0x180] sm:$0xff] }
0x14cd   :  { %6790 = vmatpush3.msra.mxu1 %v9268_v44  ;;  %6767 = vmatprep.mubr.msk.f32.mxu1 %vm7670_vm2, %v7671_v45  ;;  %v7591_v44 = vpop.eup %7590  ;;  %v7156_v26 = vpack.c.bf16 %v5174_v12, %v5173_v42 }
0x14ce   :  { %7139 = vmatprep.subr.bf16.mxu1 %v7668_v3  ;;  %v4304_v13 = vmul.f32 %v7591_v44, %v9230_v18  ;;  %v7593_v22 = vpop.eup %7592  ;;  %v7368_v27 = vpop.permute.xlu1 %7367 }
0x14cf   :  { %v4306_v0 = vmul.f32 %v7593_v22, %v9228_v30  ;;  %v7595_v25 = vpop.eup %7594  ;;  %v7370_v29 = vunpack.i.h.bf16 %v7368_v27  ;;  %v7369_v9 = vunpack.i.l.bf16 %v7368_v27  ;;  %7157 = vmatprep.subr.bf16.mxu0 %v7156_v26 }
0x14d0   :  { %6768 = vmatmul.mubr.msk.f32.gmra.mrb[102].mxu1 %vm508_vm5, %v4023_v58  ;;  %v4543_v18 = vmul.f32 %v7595_v25, %v9242_v61  ;;  %7159 = vmatpush3.bf16.msra.mxu0 %v7156_v26 }
0x14d1   :  { %6791 = vmatprep.mubr.msk.f32.mxu1 %vm7670_vm2, %v7671_v45  ;;  %v7597_v5 = vpop.eup %7596  ;;  %v7147_v31 = vpack.c.bf16 %v7370_v29, %v7369_v9 }
0x14d2   :  { %v4545_v30 = vmul.f32 %v7597_v5, %v9246_v21  ;;  %v7599_v4 = vpop.eup %7598  ;;  %v4794_v48 = vpop.permute.xlu1 %4793 }
0x14d3   :  { %v4547_v61 = vmul.f32 %v7599_v4, %v9236_v8 }
0x14d4   :  { %6792 = vmatmul.mubr.msk.f32.vlgmr.msra.gmra.mrb[104].mxu1 %vm508_vm5, %v4302_v62  ;;  %v7160_v62 = vpack.c.bf16 %v5176_v53, %v5175_v57 }
0x14d5   :  { %7141 = vmatpush3.bf16.msra.mxu1 %v7140_v14  ;;  %6794 = vmatprep.mubr.msk.f32.mxu1 %vm7670_vm2, %v7671_v45 }
0x14d6   :  { %6819 = vmatprep.subr.mxu1 %v7671_v45  ;;  %v7373_v16 = vpop.permute.xlu1 %7372  ;;  %7161 = vmatprep.subr.bf16.mxu0 %v7160_v62 }
0x14d7   :  { %v7375_v63 = vunpack.i.h.bf16 %v7373_v16  ;;  %v7374_v17 = vunpack.i.l.bf16 %v7373_v16  ;;  %7163 = vmatpush3.bf16.msra.mxu0 %v7160_v62 }
0x14d8   :  { %6795 = vmatmul.mubr.msk.f32.gmra.mrb[106].mxu1 %vm508_vm5, %v4304_v13 }
0x14d9   :  { %6820 = vmatpush3.msra.mxu1 %v4553_v24  ;;  %6797 = vmatprep.mubr.msk.f32.mxu1 %vm7670_vm2, %v7671_v45  ;;  %v7154_v33 = vpack.c.bf16 %v7375_v63, %v7374_v17 }
0x14da   :  { %7146 = vmatprep.subr.bf16.mxu1 %v7668_v3 }
0x14dc   :  { %6798 = vmatmul.mubr.msk.f32.gmra.mrb[108].mxu1 %vm508_vm5, %v4306_v0 }
0x14dd   :  { %6821 = vmatprep.mubr.msk.f32.mxu1 %vm7670_vm2, %v7671_v45 }
0x14e0   :  { %6822 = vmatmul.mubr.msk.f32.vlgmr.msra.gmra.mrb[110].mxu1 %vm508_vm5, %v4543_v18 }
0x14e1   :  { %7148 = vmatpush3.bf16.msra.mxu1 %v7147_v31  ;;  %6824 = vmatprep.mubr.msk.f32.mxu1 %vm7670_vm2, %v7671_v45 }
0x14e2   :  { %6849 = vmatprep.subr.mxu1 %v7671_v45 }
0x14e4   :  { %6825 = vmatmul.mubr.msk.f32.gmra.mrb[112].mxu1 %vm508_vm5, %v4545_v30 }
0x14e5   :  { %6850 = vmatpush3.msra.mxu1 %v4794_v48  ;;  %6827 = vmatprep.mubr.msk.f32.mxu1 %vm7670_vm2, %v7671_v45 }
0x14e6   :  { %7153 = vmatprep.subr.bf16.mxu1 %v7668_v3 }
0x14e8   :  { %6828 = vmatmul.mubr.msk.f32.gmra.mrb[114].mxu1 %vm508_vm5, %v4547_v61 }
0x14e9   :  { %6851 = vmatprep.mubr.msk.f32.mxu1 %vm7670_vm2, %v7671_v45 }
0x14f3   :  { %v5017_v40 = vpop.xlane.xlu0 %5016 }
0x1507   :  { %v4776_v23 = vpop.xlane.xlu1 %4775 }
0x1508   :  { %7600 = vrcp.f32 %v4776_v23 }
0x150b   :  { %v4779_v21 = vpop.xlane.xlu1 %4778 }
0x150c   :  { %7602 = vrcp.f32 %v4779_v21 }
0x150f   :  { %v4782_v49 = vpop.xlane.xlu1 %4781 }
0x1510   :  { %7604 = vrcp.f32 %v4782_v49 }
0x1511   :  { %7606 = vrcp.f32 %v5017_v40 }
0x1512   :  { %v7601_v39 = vpop.eup %7600 }
0x1513   :  { %v4784_v8 = vmul.f32 %v7601_v39, %v9270_v55  ;;  %v4890_v6 = vpop.permute.xlu1 %4889  ;;  %v5035_v55 = vpop.permute.xlu0 %5034 }
0x1514   :  { %6870 = vmatmul.mubr.msk.f32.gmra.mrb[102].mxu0 %vm405_vm3, %v4890_v6 }
0x1515   :  { %6852 = vmatmul.mubr.msk.f32.vlgmr.msra.gmra.mrb[116].mxu1 %vm508_vm5, %v4784_v8  ;;  %6872 = vmatprep.mubr.msk.f32.mxu0 %vm7670_vm2, %v7671_v45 }
0x1516   :  { %v7603_v46 = vpop.eup %7602  ;;  %7155 = vmatpush3.bf16.msra.mxu1 %v7154_v33  ;;  %6854 = vmatprep.mubr.msk.f32.mxu1 %vm7670_vm2, %v7671_v45 }
0x1517   :  { %v4892_v38 = vpop.permute.xlu1 %4891  ;;  %6879 = vmatprep.subr.mxu1 %v7671_v45  ;;  %v4786_v7 = vmul.f32 %v7603_v46, %v9277_v56 }
0x1518   :  { %6873 = vmatmul.mubr.msk.f32.gmra.mrb[104].mxu0 %vm405_vm3, %v4892_v38 }
0x1519   :  { %6855 = vmatmul.mubr.msk.f32.gmra.mrb[118].mxu1 %vm508_vm5, %v4786_v7 }
0x151a   :  { %v7605_v50 = vpop.eup %7604  ;;  %6880 = vmatpush3.msra.mxu1 %v5035_v55  ;;  %6857 = vmatprep.mubr.msk.f32.mxu1 %vm7670_vm2, %v7671_v45 }
0x151b   :  { %v4788_v51 = vmul.f32 %v7605_v50, %v9288_v15  ;;  %v7607_v2 = vpop.eup %7606 }
0x151c   :  { %v5025_v56 = vmul.f32 %v7607_v2, %v9261_v37 }
0x151d   :  { %6858 = vmatmul.mubr.msk.f32.gmra.mrb[120].mxu1 %vm508_vm5, %v4788_v51 }
0x151e   :  { %6881 = vmatprep.mubr.msk.f32.mxu1 %vm7670_vm2, %v7671_v45 }
0x1521   :  { %6882 = vmatmul.mubr.msk.f32.vlgmr.msra.gmra.mrb[122].mxu1 %vm508_vm5, %v5025_v56 }
0x1522   :  { %6884 = vmatprep.mubr.msk.f32.mxu1 %vm7670_vm2, %v7671_v45 }
0x154e   :  { %v9405_v1 = vpop.f32.mrb[80].mxu1 }
0x154f   :  { %v6673_v36 = vpop.f32.mrb[81].mxu1 }
0x1552   :  { %v9407_v28 = vpop.f32.mrb[82].mxu1 }
0x1553   :  { %v6676_v54 = vpop.f32.mrb[83].mxu1 }
0x1556   :  { %v9409_v15 = vpop.f32.mrb[84].mxu1 }
0x1557   :  { %v6679_v11 = vpop.f32.mrb[85].mxu1 }
0x1558   :  { %v7643_v11 = vld [vmem:[%s9662_s2] ss:$0 sm:$0xff] }
0x155a   :  { %v3626_v35 = vpop.f32.mrb[86].mxu1 }
0x155b   :  { %4125 = vrot.lane.b32.xlu1 %v3626_v35, %s7682_s13  ;;  %v6703_v32 = vpop.f32.mrb[87].mxu1 }
0x1587   :  { %v3631_v19 = vpop.f32.mrb[88].mxu1 }
0x1588   :  { %4127 = vrot.lane.b32.xlu1 %v3631_v19, %s7682_s13  ;;  %v6706_v37 = vpop.f32.mrb[89].mxu1 }
0x158b   :  { %v3636_v20 = vpop.f32.mrb[90].mxu1 }
0x158c   :  { %4129 = vrot.lane.b32.xlu0 %v3636_v20, %s7682_s13  ;;  %v6709_v47 = vpop.f32.mrb[91].mxu1 }
0x158f   :  { %v3867_v58 = vpop.f32.mrb[92].mxu1 }
0x1590   :  { %4137 = vrot.lane.b32.xlu1 %v3867_v58, %s7683_s22  ;;  %v6733_v52 = vpop.f32.mrb[93].mxu1 }
0x1593   :  { %v3872_v24 = vpop.f32.mrb[94].mxu1 }
0x1594   :  { %4139 = vrot.lane.b32.xlu1 %v3872_v24, %s7683_s22  ;;  %v6736_v44 = vpop.f32.mrb[95].mxu1 }
0x1597   :  { %v3877_v14 = vpop.f32.mrb[96].mxu1 }
0x1598   :  { %4141 = vrot.lane.b32.xlu1 %v3877_v14, %s7683_s22  ;;  %v6739_v13 = vpop.f32.mrb[97].mxu1 }
0x159b   :  { %v4108_v22 = vpop.f32.mrb[98].mxu1 }
0x159c   :  { %4149 = vrot.lane.b32.xlu0 %v4108_v22, %s7684_s23  ;;  %v6763_v27 = vpop.f32.mrb[99].mxu1 }
0x159f   :  { %v4113_v0 = vpop.f32.mrb[100].mxu1 }
0x15a0   :  { %4151 = vrot.lane.b32.xlu1 %v4113_v0, %s7684_s23  ;;  %v6766_v25 = vpop.f32.mrb[101].mxu1 }
0x15a3   :  { %v4118_v29 = vpop.f32.mrb[102].mxu1 }
0x15a4   :  { %4153 = vrot.lane.b32.xlu1 %v4118_v29, %s7684_s23  ;;  %v6769_v9 = vpop.f32.mrb[103].mxu1 }
0x15a7   :  { %v4391_v18 = vpop.f32.mrb[104].mxu1 }
0x15a8   :  { %v6793_v5 = vpop.f32.mrb[105].mxu1 }
0x15ab   :  { %v9432_v31 = vpop.f32.mrb[106].mxu1 }
0x15ac   :  { %v6796_v30 = vpop.f32.mrb[107].mxu1 }
0x15af   :  { %v9434_v4 = vpop.f32.mrb[108].mxu1 }
0x15b0   :  { %v6799_v48 = vpop.f32.mrb[109].mxu1 }
0x15b3   :  { %v4632_v61 = vpop.f32.mrb[110].mxu1 }
0x15b4   :  { %5131 = vrot.lane.b32.xlu0 %v4632_v61, %s7682_s13  ;;  %v6823_v16 = vpop.f32.mrb[111].mxu1 }
0x15b7   :  { %v9437_v23 = vpop.f32.mrb[112].mxu1 }
0x15b8   :  { %v6826_v21 = vpop.f32.mrb[113].mxu1 }
0x15bb   :  { %v9439_v40 = vpop.f32.mrb[114].mxu1 }
0x15bc   :  { %v6829_v49 = vpop.f32.mrb[115].mxu1 }
0x15cd   :  { %v4126_v2 = vpop.permute.xlu1 %4125 }
0x15ce   :  { %v4158_v20 = vsel %vm405_vm3, %v9405_v1, %v4126_v2 }
0x15e7   :  { %v4982_v63 = vpop.f32.mrb[102].mxu0 }
0x15e8   :  { %v4873_v17 = vpop.f32.mrb[116].mxu1  ;;  %v6871_v39 = vpop.f32.mrb[103].mxu0  ;;  %v4992_v36 = vmul.f32 0.35355338, %v4982_v63 }
0x15e9   :  { %5143 = vrot.lane.b32.xlu0 %v4873_v17, %s7683_s22  ;;  %v6853_v8 = vpop.f32.mrb[117].mxu1  ;;  %v9476_v39 = vld [vmem:[%s9662_s2 + $0x3c] ss:$0 sm:$0xff] }
0x15ea   :  { %v4995_v35 = vadd.f32 %v7643_v11, %v4992_v36 }
0x15eb   :  { %v4987_v6 = vpop.f32.mrb[104].mxu0 }
0x15ec   :  { %v9442_v33 = vpop.f32.mrb[118].mxu1  ;;  %v6874_v46 = vpop.f32.mrb[105].mxu0  ;;  %v5000_v32 = vsel %vm508_vm5, %v4995_v35, -inf  ;;  %v4993_v58 = vmul.f32 0.35355338, %v4987_v6 }
0x15ed   :  { %v6856_v38 = vpop.f32.mrb[119].mxu1 }
0x15ee   :  { %v4996_v24 = vadd.f32 %v7643_v11, %v4993_v58 }
0x15f0   :  { %v9444_v7 = vpop.f32.mrb[120].mxu1 }
0x15f1   :  { %v6859_v55 = vpop.f32.mrb[121].mxu1 }
0x15f4   :  { %v5114_v50 = vpop.f32.mrb[122].mxu1 }
0x15f5   :  { %5155 = vrot.lane.b32.xlu1 %v5114_v50, %s7684_s23  ;;  %v6883_v51 = vpop.f32.mrb[123].mxu1 }
0x15fa   :  { %v4128_v56 = vpop.permute.xlu1 %4127 }
0x15fb   :  { %v4159_v57 = vsel %vm405_vm3, %v9407_v28, %v4128_v56  ;;  %v5003_v28 = vsel %vm508_vm5, %v4996_v24, -inf }
0x15fe   :  { %v4130_v37 = vpop.permute.xlu0 %4129 }
0x15ff   :  { %v4160_v1 = vsel %vm405_vm3, %v9409_v15, %v4130_v37 }
0x1602   :  { %v4138_v54 = vpop.permute.xlu1 %4137 }
0x1603   :  { %v4161_v42 = vsel %vm1402_vm6, %v4158_v20, %v4138_v54 }
0x1606   :  { %v4140_v19 = vpop.permute.xlu1 %4139 }
0x1607   :  { %v4162_v53 = vsel %vm1402_vm6, %v4159_v57, %v4140_v19 }
0x1608   :  { %5001 = vmax.xlane.f32.xlu0 %v5000_v32 }
0x160a   :  { %v4142_v12 = vpop.permute.xlu1 %4141 }
0x160b   :  { %v4163_v44 = vsel %vm1402_vm6, %v4160_v1, %v4142_v12  ;;  %v5407_v1 = vld [vmem:[%s9661_s1 + $0x1a0] sm:$0xff] }
0x160e   :  { %v4150_v47 = vpop.permute.xlu0 %4149 }
0x160f   :  { %v4164_v26 = vsel %vm508_vm5, %v4161_v42, %v4150_v47 }
0x1610   :  { %6898 = vmatprep.mubr.msk.f32.mxu0 %vm174_vm1, %v4164_v26 }
0x1612   :  { %v4152_v52 = vpop.permute.xlu1 %4151 }
0x1613   :  { %v4165_v62 = vsel %vm508_vm5, %v4162_v53, %v4152_v52 }
0x1614   :  { %6899 = vmatmul.mubr.msk.f32.vlgmr.msra.gmra.mrb[106].mxu0 %vm174_vm1, %v4165_v62 }
0x1616   :  { %v4154_v14 = vpop.permute.xlu1 %4153 }
0x1617   :  { %v4166_v13 = vsel %vm508_vm5, %v4163_v44, %v4154_v14  ;;  %v5408_v44 = vld [vmem:[%s9661_s1 + $0x1a8] sm:$0xff] }
0x1618   :  { %6901 = vmatprep.mubr.msk.f32.mxu0 %vm174_vm1, %v4166_v13  ;;  %v7164_v14 = vpack.c.bf16 %v5408_v44, %v5407_v1  ;;  %v5409_v13 = vld [vmem:[%s9661_s1 + $0x1b0] sm:$0xff]  ;;  %v5562_v44 = vld [vmem:[%s9661_s1 + $0x1d8] sm:$0xff] }
0x1619   :  { %5004 = vmax.xlane.f32.xlu1 %v5003_v28  ;;  %v5410_v28 = vld [vmem:[%s9661_s1 + $0x1b8] sm:$0xff]  ;;  %v5561_v1 = vld [vmem:[%s9661_s1 + $0x1d0] sm:$0xff] }
0x161a   :  { %7165 = vmatprep.subr.bf16.mxu1 %v7164_v14 }
0x161b   :  { %7167 = vmatpush3.bf16.msra.mxu1 %v7164_v14 }
0x1626   :  { %v5132_v22 = vpop.permute.xlu0 %5131 }
0x1627   :  { %v5164_v0 = vsel %vm405_vm3, %v4391_v18, %v5132_v22  ;;  %v7168_v22 = vpack.c.bf16 %v5410_v28, %v5409_v13  ;;  %v7176_v13 = vpack.c.bf16 %v5562_v44, %v5561_v1 }
0x1629   :  { %7169 = vmatprep.subr.bf16.mxu1 %v7168_v22 }
0x162a   :  { %7171 = vmatpush3.bf16.msra.mxu1 %v7168_v22 }
0x162b   :  { %7188 = vmatprep.subr.bf16.mxu1 %v7668_v3 }
0x165b   :  { %v5144_v27 = vpop.permute.xlu0 %5143 }
0x165c   :  { %v5167_v25 = vsel %vm1402_vm6, %v5164_v0, %v5144_v27 }
0x1667   :  { %v5156_v29 = vpop.permute.xlu1 %5155 }
0x1668   :  { %v5170_v9 = vsel %vm508_vm5, %v5167_v25, %v5156_v29 }
0x1669   :  { %6902 = vmatmul.mubr.msk.f32.gmra.mrb[108].mxu0 %vm174_vm1, %v5170_v9 }
0x1695   :  { %v5002_v15 = vpop.xlane.xlu0 %5001 }
0x1696   :  { %v5007_v5 = vsub.f32 %v4995_v35, %v5002_v15 }
0x1698   :  { %v5011_v30 = vmul.f32 1.442695, %v5007_v5 }
0x169a   :  { %7608 = vpow2.f32 %v5011_v30 }
0x16a4   :  { %v7609_v48 = vpop.eup %7608 }
0x16a5   :  { %v5018_v61 = vsel %vm508_vm5, %v7609_v48, 0.0 }
0x16a6   :  { %5019 = vadd.xlane.f32.xlu0 %v5018_v61  ;;  %v5005_v16 = vpop.xlane.xlu1 %5004 }
0x16a7   :  { %v5008_v21 = vsub.f32 %v4996_v24, %v5005_v16 }
0x16a9   :  { %v5013_v49 = vmul.f32 1.442695, %v5008_v21 }
0x16ab   :  { %7610 = vpow2.f32 %v5013_v49 }
0x16b5   :  { %v7611_v18 = vpop.eup %7610 }
0x16b6   :  { %v5021_v63 = vsel %vm508_vm5, %v7611_v18, 0.0 }
0x16b7   :  { %5022 = vadd.xlane.f32.xlu0 %v5021_v63 }
0x16e7   :  { %v6900_v17 = vpop.f32.mrb[106].mxu0 }
0x16e8   :  { %v5291_v8 = vadd.f32 %v6900_v17, %v8754_v59  ;;  %v5261_v6 = vpop.f32.mrb[107].mxu0 }
0x16e9   :  { %v5290_v46 = vadd.f32 %v5261_v6, %v8756_v43 }
0x16ea   :  { %v5302_v38 = vadd.f32 %v9476_v39, %v5291_v8 }
0x16eb   :  { %v9482_v55 = vadd.f32 %v9476_v39, %v5290_v46 }
0x16ec   :  { %v5312_v50 = vsel %vm174_vm1, %v5302_v38, 0.0 }
0x16ed   :  { %5313 = vadd.xlane.f32.xlu1 %v5312_v50  ;;  %v5309_v51 = vsel %vm174_vm1, %v9482_v55, 0.0 }
0x16ee   :  { %5310 = vadd.xlane.f32.xlu0 %v5309_v51 }
0x1733   :  { %v5020_v2 = vpop.xlane.xlu0 %5019 }
0x1734   :  { %7612 = vrcp.f32 %v5020_v2 }
0x173c   :  { %v6903_v56 = vpop.f32.mrb[108].mxu0 }
0x173d   :  { %v5293_v59 = vadd.f32 %v6903_v56, %v8764_v34  ;;  %v5271_v36 = vpop.f32.mrb[109].mxu0 }
0x173e   :  { %v7613_v54 = vpop.eup %7612  ;;  %v5292_v43 = vadd.f32 %v5271_v36, %v8766_v41 }
0x173f   :  { %v9490_v11 = vadd.f32 %v9476_v39, %v5293_v59  ;;  %v5027_v35 = vmul.f32 %v7613_v54, %v7609_v48 }
0x1740   :  { %v5303_v32 = vadd.f32 %v9476_v39, %v5292_v43 }
0x1741   :  { %6885 = vmatmul.mubr.msk.f32.gmra.mrb[124].mxu1 %vm508_vm5, %v5027_v35  ;;  %v5318_v19 = vsel %vm174_vm1, %v9490_v11, 0.0 }
0x1742   :  { %5319 = vadd.xlane.f32.xlu1 %v5318_v19  ;;  %v5315_v37 = vsel %vm174_vm1, %v5303_v32, 0.0  ;;  %6887 = vmatprep.mubr.msk.f32.mxu1 %vm7670_vm2, %v7671_v45 }
0x1743   :  { %5316 = vadd.xlane.f32.xlu0 %v5315_v37 }
0x1744   :  { %v5023_v34 = vpop.xlane.xlu0 %5022 }
0x1745   :  { %7614 = vrcp.f32 %v5023_v34 }
0x174f   :  { %v7615_v41 = vpop.eup %7614 }
0x1750   :  { %v5029_v20 = vmul.f32 %v7615_v41, %v7611_v18 }
0x1752   :  { %6888 = vmatmul.mubr.msk.f32.gmra.mrb[126].mxu1 %vm508_vm5, %v5029_v20 }
0x177a   :  { %v5314_v42 = vpop.xlane.xlu1 %5313 }
0x177b   :  { %v5328_v12 = vmul.f32 0.03125, %v5314_v42  ;;  %v5311_v47 = vpop.xlane.xlu0 %5310 }
0x177c   :  { %v5327_v26 = vmul.f32 0.03125, %v5311_v47 }
0x177d   :  { %v5334_v58 = vsub.f32 %v5302_v38, %v5328_v12  ;;  %v9536_v38 = vld [vmem:[%s9662_s2 + $0x3e] ss:$0 sm:$0xff] }
0x177e   :  { %v5333_v57 = vsub.f32 %v9482_v55, %v5327_v26 }
0x177f   :  { %v5340_v53 = vmul.f32 %v5334_v58, %v5334_v58 }
0x1780   :  { %v5339_v52 = vmul.f32 %v5333_v57, %v5333_v57 }
0x1781   :  { %v5348_v62 = vsel %vm174_vm1, %v5340_v53, 0.0  ;;  %v5559_v53 = vld [vmem:[%s9661_s1 + $0x1c0] sm:$0xff] }
0x1782   :  { %5349 = vadd.xlane.f32.xlu1 %v5348_v62  ;;  %v5345_v24 = vsel %vm174_vm1, %v5339_v52, 0.0  ;;  %v5560_v52 = vld [vmem:[%s9661_s1 + $0x1c8] sm:$0xff] }
0x1783   :  { %5346 = vadd.xlane.f32.xlu0 %v5345_v24  ;;  %v7172_v62 = vpack.c.bf16 %v5560_v52, %v5559_v53 }
0x1785   :  { %7173 = vmatprep.subr.bf16.mxu0 %v7172_v62 }
0x1786   :  { %7175 = vmatpush3.bf16.msra.mxu0 %v7172_v62 }
0x1787   :  { %7177 = vmatprep.subr.bf16.mxu0 %v7176_v13 }
0x178a   :  { %7179 = vmatpush3.bf16.msra.mxu0 %v7176_v13 }
0x17cf   :  { %v5320_v27 = vpop.xlane.xlu1 %5319 }
0x17d0   :  { %v5330_v0 = vmul.f32 0.03125, %v5320_v27  ;;  %v5317_v25 = vpop.xlane.xlu0 %5316 }
0x17d1   :  { %v5329_v29 = vmul.f32 0.03125, %v5317_v25  ;;  %v5564_v25 = vld [vmem:[%s9661_s1 + $0x1e8] sm:$0xff] }
0x17d2   :  { %v5336_v9 = vsub.f32 %v9490_v11, %v5330_v0  ;;  %v5563_v0 = vld [vmem:[%s9661_s1 + $0x1e0] sm:$0xff] }
0x17d3   :  { %v5335_v15 = vsub.f32 %v5303_v32, %v5329_v29 }
0x17d4   :  { %v5342_v5 = vmul.f32 %v5336_v9, %v5336_v9 }
0x17d5   :  { %v5341_v30 = vmul.f32 %v5335_v15, %v5335_v15 }
0x17d6   :  { %v5354_v48 = vsel %vm174_vm1, %v5342_v5, 0.0 }
0x17d7   :  { %5355 = vadd.xlane.f32.xlu1 %v5354_v48  ;;  %v5351_v61 = vsel %vm174_vm1, %v5341_v30, 0.0 }
0x17d8   :  { %5352 = vadd.xlane.f32.xlu0 %v5351_v61 }
0x17e8   :  { %5135 = vrot.lane.b32.xlu1 %v9439_v40, %s7682_s13 }
0x17ec   :  { %5145 = vrot.lane.b32.xlu1 %v9442_v33, %s7683_s22 }
0x17ee   :  { %5133 = vrot.lane.b32.xlu0 %v9437_v23, %s7682_s13  ;;  %v9531_v23 = vld [vmem:[%s9662_s2 + $0x3d] ss:$0 sm:$0xff] }
0x17f0   :  { %5147 = vrot.lane.b32.xlu1 %v9444_v7, %s7683_s22 }
0x180f   :  { %v5350_v16 = vpop.xlane.xlu1 %5349 }
0x1810   :  { %v5364_v21 = vmul.f32 0.03125, %v5350_v16  ;;  %v5347_v49 = vpop.xlane.xlu0 %5346 }
0x1811   :  { %v5363_v18 = vmul.f32 0.03125, %v5347_v49  ;;  %v9588_v49 = vld [vmem:[%s9662_s2 + $0x3f] ss:$0 sm:$0xff] }
0x1812   :  { %v5370_v63 = vadd.f32 1e-06, %v5364_v21 }
0x1813   :  { %v5369_v17 = vadd.f32 1e-06, %v5363_v18 }
0x1814   :  { %7616 = vrsqrt.f32 %v5370_v63  ;;  %v5119_v8 = vpop.f32.mrb[124].mxu1 }
0x1815   :  { %7618 = vrsqrt.f32 %v5369_v17  ;;  %v6886_v6 = vpop.f32.mrb[125].mxu1  ;;  %5157 = vrot.lane.b32.xlu0 %v5119_v8, %s7684_s23 }
0x181e   :  { %v7617_v40 = vpop.eup %7616 }
0x181f   :  { %v7619_v33 = vpop.eup %7618  ;;  %v5382_v7 = vmul.f32 %v7617_v40, %v5334_v58 }
0x1820   :  { %v5381_v46 = vmul.f32 %v7619_v33, %v5333_v57 }
0x1821   :  { %v5392_v50 = vmul.f32 %v9531_v23, %v5382_v7 }
0x1822   :  { %v5391_v51 = vmul.f32 %v9531_v23, %v5381_v46 }
0x1823   :  { %v5402_v56 = vadd.f32 %v9536_v38, %v5392_v50 }
0x1824   :  { %v5401_v2 = vadd.f32 %v9536_v38, %v5391_v51 }
0x1825   :  { %v5124_v59 = vpop.f32.mrb[126].mxu1 }
0x1826   :  { %v6889_v36 = vpop.f32.mrb[127].mxu1  ;;  %5159 = vrot.lane.b32.xlu1 %v5124_v59, %s7684_s23  ;;  %6915 = vmatprep.mubr.msk.f32.mxu1 %vm174_vm1, %v5401_v2 }
0x1827   :  { %6916 = vmatmul.mubr.msk.f32.vlgmr.msra.gmra.mrb[128].mxu1 %vm174_vm1, %v5402_v56 }
0x1864   :  { %v5356_v54 = vpop.xlane.xlu1 %5355 }
0x1865   :  { %v5366_v43 = vmul.f32 0.03125, %v5356_v54  ;;  %v5353_v35 = vpop.xlane.xlu0 %5352 }
0x1866   :  { %v5365_v32 = vmul.f32 0.03125, %v5353_v35 }
0x1867   :  { %v5372_v19 = vadd.f32 1e-06, %v5366_v43 }
0x1868   :  { %v5371_v37 = vadd.f32 1e-06, %v5365_v32  ;;  %v5136_v57 = vpop.permute.xlu1 %5135 }
0x1869   :  { %7620 = vrsqrt.f32 %v5372_v19  ;;  %v5134_v24 = vpop.permute.xlu0 %5133  ;;  %v5166_v48 = vsel %vm405_vm3, %v9434_v4, %v5136_v57 }
0x186a   :  { %7622 = vrsqrt.f32 %v5371_v37  ;;  %v5165_v28 = vsel %vm405_vm3, %v9432_v31, %v5134_v24  ;;  %v5565_v31 = vld [vmem:[%s9661_s1 + $0x1f0] sm:$0xff] }
0x186c   :  { %v5146_v14 = vpop.permute.xlu1 %5145 }
0x186d   :  { %v5168_v22 = vsel %vm1402_vm6, %v5165_v28, %v5146_v14 }
0x1870   :  { %v5148_v30 = vpop.permute.xlu1 %5147 }
0x1871   :  { %v5169_v61 = vsel %vm1402_vm6, %v5166_v48, %v5148_v30  ;;  %v6027_v30 = vld [vmem:[%s9662_s2 + $0x40] ss:$0 sm:$0xff] }
0x1873   :  { %v7621_v34 = vpop.eup %7620 }
0x1874   :  { %v7623_v41 = vpop.eup %7622  ;;  %v5384_v20 = vmul.f32 %v7621_v34, %v5336_v9  ;;  %v7180_v9 = vpack.c.bf16 %v5564_v25, %v5563_v0 }
0x1875   :  { %v5383_v42 = vmul.f32 %v7623_v41, %v5335_v15  ;;  %v5566_v15 = vld [vmem:[%s9661_s1 + $0x1f8] sm:$0xff] }
0x1876   :  { %v5394_v12 = vmul.f32 %v9531_v23, %v5384_v20  ;;  %7181 = vmatprep.subr.bf16.mxu0 %v7180_v9  ;;  %v7184_v5 = vpack.c.bf16 %v5566_v15, %v5565_v31 }
0x1877   :  { %v5393_v47 = vmul.f32 %v9531_v23, %v5383_v42  ;;  %7183 = vmatpush3.bf16.msra.mxu0 %v7180_v9 }
0x1878   :  { %v5404_v58 = vadd.f32 %v9536_v38, %v5394_v12  ;;  %7185 = vmatprep.subr.bf16.mxu0 %v7184_v5 }
0x1879   :  { %v5403_v26 = vadd.f32 %v9536_v38, %v5393_v47 }
0x187b   :  { %6918 = vmatprep.mubr.msk.f32.mxu1 %vm174_vm1, %v5403_v26  ;;  %7187 = vmatpush3.bf16.msra.mxu0 %v7184_v5 }
0x187c   :  { %6919 = vmatmul.mubr.msk.f32.gmra.mrb[130].mxu1 %vm174_vm1, %v5404_v58 }
0x1887   :  { %v5158_v27 = vpop.permute.xlu0 %5157 }
0x1888   :  { %v5171_v29 = vsel %vm508_vm5, %v5168_v22, %v5158_v27 }
0x1889   :  { %6904 = vmatprep.mubr.msk.f32.mxu0 %vm174_vm1, %v5171_v29 }
0x1898   :  { %v5160_v16 = vpop.permute.xlu1 %5159 }
0x1899   :  { %v5172_v21 = vsel %vm508_vm5, %v5169_v61, %v5160_v16 }
0x189a   :  { %6905 = vmatmul.mubr.msk.f32.gmra.mrb[110].mxu0 %vm174_vm1, %v5172_v21 }
0x18fa   :  { %v6917_v18 = vpop.f32.mrb[128].mxu1 }
0x18fb   :  { %v5506_v63 = vadd.f32 %v6917_v18, %v9588_v49  ;;  %v5500_v17 = vpop.f32.mrb[129].mxu1 }
0x18fc   :  { %v5501_v8 = vadd.f32 %v9588_v49, %v5500_v17 }
0x18fd   :  { %v5536_v6 = vmul.f32 0.70710677, %v5506_v63  ;;  %v5530_v51 = vmul.f32 0.5, %v5506_v63 }
0x18fe   :  { %v5535_v4 = vmul.f32 0.70710677, %v5501_v8  ;;  %v5529_v46 = vmul.f32 0.5, %v5501_v8 }
0x18ff   :  { %7624 = verf.f32 %v5536_v6 }
0x1900   :  { %7626 = verf.f32 %v5535_v4 }
0x1909   :  { %v7625_v40 = vpop.eup %7624 }
0x190a   :  { %v7627_v33 = vpop.eup %7626  ;;  %v5548_v7 = vadd.f32 1.0, %v7625_v40 }
0x190b   :  { %v5547_v50 = vadd.f32 1.0, %v7627_v33 }
0x190c   :  { %v5554_v56 = vmul.f32 %v5548_v7, %v5530_v51 }
0x190d   :  { %v5553_v2 = vmul.f32 %v5547_v50, %v5529_v46 }
0x190f   :  { %6940 = vmatprep.mubr.msk.f32.mxu0 %vm57_vm0, %v5553_v2 }
0x1910   :  { %6941 = vmatmul.mubr.msk.f32.vlgmr.msra.gmra.mrb[112].mxu0 %vm57_vm0, %v5554_v56 }
0x194f   :  { %v6920_v59 = vpop.f32.mrb[130].mxu1 }
0x1950   :  { %v5516_v36 = vadd.f32 %v6920_v59, %v9588_v49  ;;  %v5510_v54 = vpop.f32.mrb[131].mxu1 }
0x1951   :  { %v5511_v43 = vadd.f32 %v9588_v49, %v5510_v54 }
0x1952   :  { %v5538_v35 = vmul.f32 0.70710677, %v5516_v36  ;;  %v5532_v42 = vmul.f32 0.5, %v5516_v36 }
0x1953   :  { %v5537_v32 = vmul.f32 0.70710677, %v5511_v43  ;;  %v5531_v41 = vmul.f32 0.5, %v5511_v43 }
0x1954   :  { %7628 = verf.f32 %v5538_v35  ;;  %v5716_v35 = vld [vmem:[%s9661_s1 + $0x200] sm:$0xff] }
0x1955   :  { %7630 = verf.f32 %v5537_v32  ;;  %v5719_v32 = vld [vmem:[%s9661_s1 + $0x218] sm:$0xff] }
0x195e   :  { %v7629_v19 = vpop.eup %7628 }
0x195f   :  { %v7631_v37 = vpop.eup %7630  ;;  %v5550_v34 = vadd.f32 1.0, %v7629_v19 }
0x1960   :  { %v5549_v20 = vadd.f32 1.0, %v7631_v37 }
0x1961   :  { %v5556_v47 = vmul.f32 %v5550_v34, %v5532_v42  ;;  %v6028_v42 = vld [vmem:[%s9662_s2 + $0x41] ss:$0 sm:$0xff] }
0x1962   :  { %v5555_v12 = vmul.f32 %v5549_v20, %v5531_v41 }
0x1964   :  { %6943 = vmatprep.mubr.msk.f32.mxu0 %vm57_vm0, %v5555_v12  ;;  %v6029_v12 = vld [vmem:[%s9662_s2 + $0x42] ss:$0 sm:$0xff] }
0x1965   :  { %6944 = vmatmul.mubr.msk.f32.gmra.mrb[114].mxu0 %vm57_vm0, %v5556_v47 }
0x196d   :  { %v6906_v26 = vpop.f32.mrb[110].mxu0 }
0x196e   :  { %v5295_v58 = vadd.f32 %v6906_v26, %v8774_v10  ;;  %v5281_v57 = vpop.f32.mrb[111].mxu0 }
0x196f   :  { %v5294_v53 = vadd.f32 %v5281_v57, %v8776_v60 }
0x1970   :  { %v5306_v52 = vadd.f32 %v9476_v39, %v5295_v58 }
0x1971   :  { %v5305_v62 = vadd.f32 %v9476_v39, %v5294_v53 }
0x1972   :  { %v5324_v24 = vsel %vm174_vm1, %v5306_v52, 0.0 }
0x1973   :  { %5325 = vadd.xlane.f32.xlu1 %v5324_v24  ;;  %v5321_v1 = vsel %vm174_vm1, %v5305_v62, 0.0 }
0x1974   :  { %5322 = vadd.xlane.f32.xlu0 %v5321_v1 }
0x19e3   :  { %v6942_v44 = vpop.f32.mrb[112].mxu0 }
0x19e4   :  { %v5651_v14 = vpop.f32.mrb[113].mxu0 }
0x19e5   :  { %v5676_v31 = vadd.f32 %v5651_v14, %v9482_v55 }
0x19e7   :  { %v5683_v61 = vadd.f32 %v6027_v30, %v5676_v31 }
0x1a00   :  { %v5326_v13 = vpop.xlane.xlu1 %5325 }
0x1a01   :  { %v5332_v28 = vmul.f32 0.03125, %v5326_v13  ;;  %v5323_v22 = vpop.xlane.xlu0 %5322 }
0x1a02   :  { %v5331_v27 = vmul.f32 0.03125, %v5323_v22 }
0x1a03   :  { %v5338_v10 = vsub.f32 %v5306_v52, %v5332_v28 }
0x1a04   :  { %v5337_v0 = vsub.f32 %v5305_v62, %v5331_v27 }
0x1a05   :  { %v5344_v29 = vmul.f32 %v5338_v10, %v5338_v10 }
0x1a06   :  { %v5343_v25 = vmul.f32 %v5337_v0, %v5337_v0 }
0x1a07   :  { %v5360_v39 = vsel %vm174_vm1, %v5344_v29, 0.0 }
0x1a08   :  { %v5357_v60 = vsel %vm174_vm1, %v5343_v25, 0.0 }
0x1a09   :  { %5358 = vadd.xlane.f32.xlu0 %v5357_v60 }
0x1a0d   :  { %5361 = vadd.xlane.f32.xlu0 %v5360_v39 }
0x1a38   :  { %v6945_v9 = vpop.f32.mrb[114].mxu0 }
0x1a39   :  { %v5677_v15 = vadd.f32 %v6945_v9, %v9490_v11  ;;  %v5660_v5 = vpop.f32.mrb[115].mxu0 }
0x1a3b   :  { %v5684_v48 = vadd.f32 %v6027_v30, %v5677_v15 }
0x1a3d   :  { %v5686_v16 = vrot.slane %v5684_v48, 7 }
0x1a3f   :  { %v5689_v21 = vsel %vm5688_vm7, %v5683_v61, %v5686_v16 }
0x1a40   :  { %v5693_v18 = vsel %vm5692_vm8, %v5689_v21, 0.0 }
0x1a41   :  { %5694 = vadd.xlane.f32.xlu0 %v5693_v18 }
0x1a96   :  { %v5359_v63 = vpop.xlane.xlu0 %5358 }
0x1a97   :  { %v5367_v17 = vmul.f32 0.03125, %v5359_v63 }
0x1a99   :  { %v5373_v8 = vadd.f32 1e-06, %v5367_v17 }
0x1a9a   :  { %v5362_v55 = vpop.xlane.xlu0 %5361 }
0x1a9b   :  { %7632 = vrsqrt.f32 %v5373_v8  ;;  %v5368_v11 = vmul.f32 0.03125, %v5362_v55 }
0x1a9d   :  { %v5374_v6 = vadd.f32 1e-06, %v5368_v11 }
0x1a9f   :  { %7634 = vrsqrt.f32 %v5374_v6 }
0x1aa5   :  { %v7633_v4 = vpop.eup %7632 }
0x1aa6   :  { %v5385_v40 = vmul.f32 %v7633_v4, %v5337_v0 }
0x1aa8   :  { %v5395_v33 = vmul.f32 %v9531_v23, %v5385_v40 }
0x1aa9   :  { %v7635_v7 = vpop.eup %7634 }
0x1aaa   :  { %v5405_v46 = vadd.f32 %v9536_v38, %v5395_v33  ;;  %v5386_v50 = vmul.f32 %v7635_v7, %v5338_v10 }
0x1aac   :  { %6921 = vmatprep.mubr.msk.f32.mxu1 %vm174_vm1, %v5405_v46  ;;  %v5396_v51 = vmul.f32 %v9531_v23, %v5386_v50  ;;  %v5717_v23 = vld [vmem:[%s9661_s1 + $0x208] sm:$0xff] }
0x1aae   :  { %v5406_v2 = vadd.f32 %v9536_v38, %v5396_v51  ;;  %v7189_v38 = vpack.c.bf16 %v5717_v23, %v5716_v35 }
0x1ab0   :  { %6922 = vmatmul.mubr.msk.f32.gmra.mrb[132].mxu1 %vm174_vm1, %v5406_v2 }
0x1ab1   :  { %6957 = vmatprep.mubr.msk.f32.mxu1 %vm7670_vm2, %v7671_v45  ;;  %7190 = vmatpush3.bf16.msra.mxu1 %v7189_v38  ;;  %v5718_v45 = vld [vmem:[%s9661_s1 + $0x210] sm:$0xff] }
0x1ab2   :  { %7191 = vmatprep.subr.bf16.mxu1 %v7668_v3  ;;  %v7192_v19 = vpack.c.bf16 %v5719_v32, %v5718_v45 }
0x1ab5   :  { %7193 = vmatpush3.bf16.msra.mxu1 %v7192_v19 }
0x1ace   :  { %v5695_v56 = vpop.xlane.xlu0 %5694 }
0x1acf   :  { %v5696_v59 = vmul.f32 0.03125, %v5695_v56 }
0x1ad1   :  { %v5697_v36 = vsub.f32 %v5689_v21, %v5696_v59 }
0x1ad3   :  { %v5698_v54 = vmul.f32 %v5697_v36, %v5697_v36 }
0x1ad5   :  { %v5699_v43 = vsel %vm5692_vm8, %v5698_v54, 0.0 }
0x1ad6   :  { %5700 = vadd.xlane.f32.xlu1 %v5699_v43 }
0x1b63   :  { %v5701_v37 = vpop.xlane.xlu1 %5700 }
0x1b64   :  { %v5702_v34 = vmul.f32 0.03125, %v5701_v37 }
0x1b66   :  { %v5703_v41 = vadd.f32 1e-06, %v5702_v34 }
0x1b68   :  { %7636 = vrsqrt.f32 %v5703_v41 }
0x1b72   :  { %v7637_v20 = vpop.eup %7636 }
0x1b73   :  { %v5705_v3 = vmul.f32 %v7637_v20, %v5697_v36 }
0x1b75   :  { %v5710_v47 = vmul.f32 %v6028_v42, %v5705_v3 }
0x1b77   :  { %v5715_v26 = vadd.f32 %v6029_v12, %v5710_v47 }
0x1b79   :  { %6958 = vmatmul.mubr.msk.f32.vlgmr.msra.gmra.mrb[134].mxu1 %vm174_vm1, %v5715_v26 }
0x1b83   :  { %v6923_v58 = vpop.f32.mrb[132].mxu1 }
0x1b84   :  { %v5526_v57 = vadd.f32 %v6923_v58, %v9588_v49  ;;  %v5520_v53 = vpop.f32.mrb[133].mxu1 }
0x1b85   :  { %v5521_v52 = vadd.f32 %v9588_v49, %v5520_v53  ;;  %v6030_v49 = vld [vmem:[%s9662_s2 + $0x43] ss:$0 sm:$0xff] }
0x1b86   :  { %v5540_v62 = vmul.f32 0.70710677, %v5526_v57  ;;  %v5534_v22 = vmul.f32 0.5, %v5526_v57 }
0x1b87   :  { %v5539_v24 = vmul.f32 0.70710677, %v5521_v52  ;;  %v5533_v13 = vmul.f32 0.5, %v5521_v52 }
0x1b88   :  { %7638 = verf.f32 %v5540_v62 }
0x1b89   :  { %7640 = verf.f32 %v5539_v24 }
0x1b92   :  { %v7639_v1 = vpop.eup %7638 }
0x1b93   :  { %v7641_v44 = vpop.eup %7640  ;;  %v5552_v14 = vadd.f32 1.0, %v7639_v1 }
0x1b94   :  { %v5551_v28 = vadd.f32 1.0, %v7641_v44 }
0x1b95   :  { %v5558_v10 = vmul.f32 %v5552_v14, %v5534_v22 }
0x1b96   :  { %v5557_v27 = vmul.f32 %v5551_v28, %v5533_v13 }
0x1b98   :  { %6946 = vmatprep.mubr.msk.f32.mxu0 %vm57_vm0, %v5557_v27 }
0x1b99   :  { %6947 = vmatmul.mubr.msk.f32.gmra.mrb[116].mxu0 %vm57_vm0, %v5558_v10 }
0x1c4c   :  { %v5794_v0 = vpop.f32.mrb[134].mxu1 }
0x1c4d   :  { %v5795_v25 = vadd.f32 %v6030_v49, %v5794_v0  ;;  %v6959_v60 = vpop.f32.mrb[135].mxu1 }
0x1c4f   :  { %5798 = vst [vmem:[#allocation2] sm:$0x3] %v5795_v25 }
0x1c50   :  { %7655 = shalt.err (!%p7652_p4)
}
0x1c51   :  { %s7656_s10 = scalar_lea.hbm %s9663_s3, 32 }
0x1c52   :  { %p7657_p5 = scmp.ne.s32.totalorder %s9663_s3, %s7656_s10  ;;  %p7660_p6 = scmp.lt.u32.totalorder %s7656_s10, %s9663_s3 }
0x1c54   :  { %p7662_p7 = pnand %p7660_p6, %p7657_p5 }
0x1c56   :  { %7665 = shalt.err (!%p7662_p7)
}
0x1c57   :  { %5808 = dma.vmem_to_hbm [thread:$0]  %s5806_s0, 32, %s9663_s3, [#allocation3]  }
0x1c6c   :  { %v6948_v29 = vpop.f32.mrb[116].mxu0 }
0x1c6d   :  { %v5669_v39 = vpop.f32.mrb[117].mxu0 }
0x1c6e   :  { %7666 = dma.done.wait [#allocation3], 32  }
0x1c6f   :  { %7667 = vsyncadd [#allocation3], 4294967264 }
0x1c70   :  { %5812 = vsyncpa [#allocation3], 1 }

</bundles_post_ra>
